<compile_context>
chip_gen: v7x
topology: tpu7x:2x2x1
jax: 0.10.0
libtpu: 0.0.40
codegen_flags: <defaults>
</compile_context>

<pallas_src>
import functools

import jax
import jax.numpy as jnp
from jax.experimental import pallas as pl
from jax.experimental.pallas import tpu as pltpu


# ------------------------------ configuration ------------------------------

class Config:
    image_size = 16
    patch_size = 4
    num_channels = 3
    hidden_size = 32
    num_layers = 2
    num_heads = 4
    intermediate_size = 64
    layer_norm_eps = 1e-12

    @property
    def num_patches(self):
        return (self.image_size // self.patch_size) ** 2

    @property
    def patch_dim(self):
        return self.num_channels * self.patch_size ** 2


# ------------------------------ fused kernel -------------------------------

def _layer_norm(x, g, b, eps):
    mean = jnp.mean(x, axis=-1, keepdims=True)
    xc = x - mean
    var = jnp.mean(xc * xc, axis=-1, keepdims=True)
    return (xc * jax.lax.rsqrt(var + eps)) * g + b


def _gelu_tanh(x):
    # TODO(synk): HF ViT uses exact erf-GELU; tanh approximation used here
    # (maps onto the EUP tanh unit; erf lowering is not guaranteed on Mosaic).
    c = 0.7978845608028654  # sqrt(2/pi)
    return 0.5 * x * (1.0 + jnp.tanh(c * (x + 0.044715 * x * x * x)))


def _mae_fused_kernel(
        patches_ref, emb_add_ref, patch_w_ref,
        ln1_g_ref, ln1_b_ref, wqkv_ref, bqkv_ref, wo_ref, bo_ref,
        ln2_g_ref, ln2_b_ref, w1_ref, b1_ref, w2_ref, b2_ref,
        lnf_g_ref, lnf_b_ref, dec_w_ref, dec_b_ref,
        out_ref,
        *, num_layers, num_heads, head_dim, ln_eps):
    f32 = jnp.float32

    # ---- patch embedding (+ CLS token + positional embedding) ----
    # patches_ref row 0 is all-zero (CLS slot); emb_add carries
    # [cls + pos[0]] for row 0 and [patch_bias + pos[1:]] for the patch rows,
    # so one matmul + add produces the full embedded sequence (no concat).
    x_p = patches_ref[0].astype(f32)                                  # (S, Pd)
    h = jnp.dot(x_p, patch_w_ref[...], preferred_element_type=f32) + emb_add_ref[...]

    hidden = num_heads * head_dim
    scale = 1.0 / (head_dim ** 0.5)

    for i in range(num_layers):                 # static unroll (tiny model)
        # ---------------- attention block (pre-LN) ----------------
        resid = h
        hn = _layer_norm(h, ln1_g_ref[i], ln1_b_ref[i], ln_eps)
        # Fused QKV projection: one lane-dense (S, 3H) matmul instead of 3.
        qkv = jnp.dot(hn, wqkv_ref[i], preferred_element_type=f32) + bqkv_ref[i]
        wo_i = wo_ref[i]                                              # (H, H)

        attn_out = jnp.zeros_like(h)
        for hd in range(num_heads):             # static unroll over heads
            lo, hi = hd * head_dim, (hd + 1) * head_dim
            q = qkv[:, lo:hi]                                         # (S, Dh)
            k = qkv[:, hidden + lo:hidden + hi]                       # (S, Dh)
            v = qkv[:, 2 * hidden + lo:2 * hidden + hi]               # (S, Dh)
            s = jax.lax.dot_general(
                q, k, (((1,), (1,)), ((), ())),
                preferred_element_type=f32) * scale                   # (S, S)
            m = jnp.max(s, axis=-1, keepdims=True)
            p = jnp.exp(s - m)
            p = p * pl.reciprocal(jnp.sum(p, axis=-1, keepdims=True), approx=True)
            ctx_h = jnp.dot(p, v, preferred_element_type=f32)         # (S, Dh)
            # Fold the output projection per head instead of materializing the
            # concatenated (S, H) context:
            #   ctx @ Wo == sum_h ctx_h @ Wo[h*Dh:(h+1)*Dh, :]
            attn_out = attn_out + jnp.dot(
                ctx_h, wo_i[lo:hi, :], preferred_element_type=f32)
        h = resid + attn_out + bo_ref[i]

        # ---------------- MLP block (pre-LN, fused GELU) ----------------
        resid = h
        hn = _layer_norm(h, ln2_g_ref[i], ln2_b_ref[i], ln_eps)
        ff = jnp.dot(hn, w1_ref[i], preferred_element_type=f32) + b1_ref[i]
        ff = _gelu_tanh(ff)
        h = resid + jnp.dot(ff, w2_ref[i], preferred_element_type=f32) + b2_ref[i]

    # ---------------- final LayerNorm + linear decoder ----------------
    h = _layer_norm(h, lnf_g_ref[...], lnf_b_ref[...], ln_eps)
    dec = jnp.dot(h, dec_w_ref[...], preferred_element_type=f32) + dec_b_ref[...]
    out_ref[0] = dec                          # (S, Pd); CLS row dropped outside


# ------------------------------ params / glue -------------------------------

def init_params(key, cfg):
    def nrm(k, shape, scale=0.02):
        return scale * jax.random.normal(k, shape, dtype=jnp.float32)

    keys = iter(jax.random.split(key, 128))
    p = {}
    p["patch_w"] = nrm(next(keys), (cfg.patch_dim, cfg.hidden_size))
    p["patch_b"] = jnp.zeros((cfg.hidden_size,), jnp.float32)
    p["cls"] = nrm(next(keys), (1, 1, cfg.hidden_size))
    p["pos"] = nrm(next(keys), (1, cfg.num_patches + 1, cfg.hidden_size))
    p["layers"] = []
    H = cfg.hidden_size
    for _ in range(cfg.num_layers):
        lp = {
            "ln1_g": jnp.ones((H,), jnp.float32), "ln1_b": jnp.zeros((H,), jnp.float32),
            "wq": nrm(next(keys), (H, H)), "bq": jnp.zeros((H,), jnp.float32),
            "wk": nrm(next(keys), (H, H)), "bk": jnp.zeros((H,), jnp.float32),
            "wv": nrm(next(keys), (H, H)), "bv": jnp.zeros((H,), jnp.float32),
            "wo": nrm(next(keys), (H, H)), "bo": jnp.zeros((H,), jnp.float32),
            "ln2_g": jnp.ones((H,), jnp.float32), "ln2_b": jnp.zeros((H,), jnp.float32),
            "w_fc1": nrm(next(keys), (H, cfg.intermediate_size)),
            "b_fc1": jnp.zeros((cfg.intermediate_size,), jnp.float32),
            "w_fc2": nrm(next(keys), (cfg.intermediate_size, H)),
            "b_fc2": jnp.zeros((H,), jnp.float32),
        }
        p["layers"].append(lp)
    p["lnf_g"] = jnp.ones((H,), jnp.float32)
    p["lnf_b"] = jnp.zeros((H,), jnp.float32)
    p["dec_w"] = nrm(next(keys), (H, cfg.patch_dim))
    p["dec_b"] = jnp.zeros((cfg.patch_dim,), jnp.float32)
    return p


def patchify_conv_order(x, cfg):
    """NCHW image -> (B, num_patches, 3*p*p) with (c, ph, pw) ordering
    (matches flattening a Conv2d weight of shape (hidden, 3, p, p))."""
    B, C, H, W = x.shape
    p = cfg.patch_size
    g = H // p
    x = x.reshape(B, C, g, p, g, p)
    x = x.transpose(0, 2, 4, 1, 3, 5)          # (B, gh, gw, C, ph, pw)
    return x.reshape(B, g * g, C * p * p)


def _full_spec(arr):
    """Whole-array VMEM block, constant across the batch grid axis."""
    shape = tuple(arr.shape)
    return pl.BlockSpec(shape, lambda b, _n=len(shape): (0,) * _n)


def masked_autoencoder_forward(params, x, cfg, mask=True):
    """Reproduces MaskedAutoencoder.forward. The random patch masking in the
    PyTorch code modifies a throw-away copy and never influences the output,
    so it is intentionally omitted."""
    B, C, Himg, Wimg = x.shape
    p = cfg.patch_size
    N, S = cfg.num_patches, cfg.num_patches + 1
    H, I, Pd = cfg.hidden_size, cfg.intermediate_size, cfg.patch_dim
    L = cfg.num_layers

    # ---- tiny one-time layout prep (pure reshapes, stays in XLA) ----
    patches = patchify_conv_order(x, cfg).astype(jnp.float32)           # (B, N, Pd)
    patches_ext = jnp.concatenate(
        [jnp.zeros((B, 1, Pd), jnp.float32), patches], axis=1)          # (B, S, Pd)

    pos = params["pos"][0]                                               # (S, H)
    emb_add = jnp.concatenate(
        [params["cls"].reshape(1, H) + pos[0:1, :],
         pos[1:, :] + params["patch_b"][None, :]], axis=0)               # (S, H)

    layers = params["layers"]
    stack = lambda name: jnp.stack([lp[name] for lp in layers])
    ln1_g = stack("ln1_g").reshape(L, 1, H)
    ln1_b = stack("ln1_b").reshape(L, 1, H)
    wqkv = jnp.stack([jnp.concatenate([lp["wq"], lp["wk"], lp["wv"]], axis=1)
                      for lp in layers])                                 # (L, H, 3H)
    bqkv = jnp.stack([jnp.concatenate([lp["bq"], lp["bk"], lp["bv"]])
                      for lp in layers]).reshape(L, 1, 3 * H)
    wo = stack("wo")                                                     # (L, H, H)
    bo = stack("bo").reshape(L, 1, H)
    ln2_g = stack("ln2_g").reshape(L, 1, H)
    ln2_b = stack("ln2_b").reshape(L, 1, H)
    w1 = stack("w_fc1")                                                  # (L, H, I)
    b1 = stack("b_fc1").reshape(L, 1, I)
    w2 = stack("w_fc2")                                                  # (L, I, H)
    b2 = stack("b_fc2").reshape(L, 1, H)
    lnf_g = params["lnf_g"].reshape(1, H)
    lnf_b = params["lnf_b"].reshape(1, H)
    dec_w = params["dec_w"]                                              # (H, Pd)
    dec_b = params["dec_b"].reshape(1, Pd)

    weights = (emb_add, params["patch_w"], ln1_g, ln1_b, wqkv, bqkv, wo, bo,
               ln2_g, ln2_b, w1, b1, w2, b2, lnf_g, lnf_b, dec_w, dec_b)

    kernel = functools.partial(
        _mae_fused_kernel,
        num_layers=L, num_heads=cfg.num_heads,
        head_dim=H // cfg.num_heads, ln_eps=cfg.layer_norm_eps)

    decoded_all = pl.pallas_call(
        kernel,
        out_shape=jax.ShapeDtypeStruct((B, S, Pd), jnp.float32),
        grid=(B,),
        in_specs=[pl.BlockSpec((1, S, Pd), lambda b: (b, 0, 0))]
                 + [_full_spec(w) for w in weights],
        out_specs=pl.BlockSpec((1, S, Pd), lambda b: (b, 0, 0)),
        compiler_params=pltpu.CompilerParams(dimension_semantics=("parallel",)),
    )(patches_ext, *weights)

    # ---- drop CLS and pixel-unshuffle back to (B, 3, H, W) (XLA layout op) ----
    decoded = decoded_all[:, 1:, :]                                      # (B, N, Pd)
    g = int(round(N ** 0.5))
    decoded = decoded.reshape(B, g, g, p, p, 3)
    decoded = decoded.transpose(0, 5, 1, 3, 2, 4)                        # (B, 3, g, p, g, p)
    return decoded.reshape(B, 3, Himg, Wimg)


# --------------------------------- main ------------------------------------

if __name__ == "__main__":
    cfg = Config()
    key = jax.random.PRNGKey(0)
    k_param, k_x = jax.random.split(key)

    params = init_params(k_param, cfg)
    x = jax.random.normal(k_x, (2, 3, cfg.image_size, cfg.image_size), dtype=jnp.float32)

    fwd = jax.jit(functools.partial(masked_autoencoder_forward, cfg=cfg))
    out = fwd(params, x)
    out = jax.block_until_ready(out)

    assert out.shape == (2, 3, cfg.image_size, cfg.image_size), out.shape
    assert out.dtype == jnp.float32
    print("KERNEL_OK")
</pallas_src>

<mosaic_0001>
module attributes {stable_mosaic.version = 11 : i64} {
  func.func @_mae_fused_kernel(%arg0: i32, %arg1: memref<1x17x48xf32, #tpu.memory_space<vmem>>, %arg2: memref<17x32xf32, #tpu.memory_space<vmem>>, %arg3: memref<48x32xf32, #tpu.memory_space<vmem>>, %arg4: memref<2x1x32xf32, #tpu.memory_space<vmem>>, %arg5: memref<2x1x32xf32, #tpu.memory_space<vmem>>, %arg6: memref<2x32x96xf32, #tpu.memory_space<vmem>>, %arg7: memref<2x1x96xf32, #tpu.memory_space<vmem>>, %arg8: memref<2x32x32xf32, #tpu.memory_space<vmem>>, %arg9: memref<2x1x32xf32, #tpu.memory_space<vmem>>, %arg10: memref<2x1x32xf32, #tpu.memory_space<vmem>>, %arg11: memref<2x1x32xf32, #tpu.memory_space<vmem>>, %arg12: memref<2x32x64xf32, #tpu.memory_space<vmem>>, %arg13: memref<2x1x64xf32, #tpu.memory_space<vmem>>, %arg14: memref<2x64x32xf32, #tpu.memory_space<vmem>>, %arg15: memref<2x1x32xf32, #tpu.memory_space<vmem>>, %arg16: memref<1x32xf32, #tpu.memory_space<vmem>>, %arg17: memref<1x32xf32, #tpu.memory_space<vmem>>, %arg18: memref<32x48xf32, #tpu.memory_space<vmem>>, %arg19: memref<1x48xf32, #tpu.memory_space<vmem>>, %arg20: memref<1x17x48xf32, #tpu.memory_space<vmem>>) attributes {dimension_semantics = [#tpu.dimension_semantics<parallel>], iteration_bounds = array<i64: 2>, scalar_prefetch = 0 : i64, scratch_operands = 0 : i64, tpu.core_type = #tpu.core_type<tc>, window_params = [{transform_indices = @transform_0, window_bounds = array<i64: 1, 17, 48>}, {pipeline_mode = #tpu.pipeline_mode<synchronous>, transform_indices = @transform_1, window_bounds = array<i64: 17, 32>}, {pipeline_mode = #tpu.pipeline_mode<synchronous>, transform_indices = @transform_2, window_bounds = array<i64: 48, 32>}, {pipeline_mode = #tpu.pipeline_mode<synchronous>, transform_indices = @transform_3, window_bounds = array<i64: 2, 1, 32>}, {pipeline_mode = #tpu.pipeline_mode<synchronous>, transform_indices = @transform_4, window_bounds = array<i64: 2, 1, 32>}, {pipeline_mode = #tpu.pipeline_mode<synchronous>, transform_indices = @transform_5, window_bounds = array<i64: 2, 32, 96>}, {pipeline_mode = #tpu.pipeline_mode<synchronous>, transform_indices = @transform_6, window_bounds = array<i64: 2, 1, 96>}, {pipeline_mode = #tpu.pipeline_mode<synchronous>, transform_indices = @transform_7, window_bounds = array<i64: 2, 32, 32>}, {pipeline_mode = #tpu.pipeline_mode<synchronous>, transform_indices = @transform_8, window_bounds = array<i64: 2, 1, 32>}, {pipeline_mode = #tpu.pipeline_mode<synchronous>, transform_indices = @transform_9, window_bounds = array<i64: 2, 1, 32>}, {pipeline_mode = #tpu.pipeline_mode<synchronous>, transform_indices = @transform_10, window_bounds = array<i64: 2, 1, 32>}, {pipeline_mode = #tpu.pipeline_mode<synchronous>, transform_indices = @transform_11, window_bounds = array<i64: 2, 32, 64>}, {pipeline_mode = #tpu.pipeline_mode<synchronous>, transform_indices = @transform_12, window_bounds = array<i64: 2, 1, 64>}, {pipeline_mode = #tpu.pipeline_mode<synchronous>, transform_indices = @transform_13, window_bounds = array<i64: 2, 64, 32>}, {pipeline_mode = #tpu.pipeline_mode<synchronous>, transform_indices = @transform_14, window_bounds = array<i64: 2, 1, 32>}, {pipeline_mode = #tpu.pipeline_mode<synchronous>, transform_indices = @transform_15, window_bounds = array<i64: 1, 32>}, {pipeline_mode = #tpu.pipeline_mode<synchronous>, transform_indices = @transform_16, window_bounds = array<i64: 1, 32>}, {pipeline_mode = #tpu.pipeline_mode<synchronous>, transform_indices = @transform_17, window_bounds = array<i64: 32, 48>}, {pipeline_mode = #tpu.pipeline_mode<synchronous>, transform_indices = @transform_18, window_bounds = array<i64: 1, 48>}, {transform_indices = @transform_19, window_bounds = array<i64: 1, 17, 48>}]} {
    %c0 = arith.constant 0 : index
    %c0_0 = arith.constant 0 : index
    %c0_1 = arith.constant 0 : index
    %0 = vector.load %arg1[%c0, %c0_0, %c0_1] : memref<1x17x48xf32, #tpu.memory_space<vmem>>, vector<1x17x48xf32>
    %1 = vector.shape_cast %0 : vector<1x17x48xf32> to vector<17x48xf32>
    %c0_2 = arith.constant 0 : index
    %c0_3 = arith.constant 0 : index
    %2 = vector.load %arg3[%c0_2, %c0_3] : memref<48x32xf32, #tpu.memory_space<vmem>>, vector<48x32xf32>
    %cst = arith.constant dense<0.000000e+00> : vector<17x32xf32>
    %3 = tpu.matmul %1, %2, %cst {dimension_numbers = #tpu.dot_dimension_numbers<[1], [0], [0], [1], [0, 0, 1, 1], [], []>} : vector<17x48xf32>, vector<48x32xf32>, vector<17x32xf32> -> vector<17x32xf32>
    %c0_4 = arith.constant 0 : index
    %c0_5 = arith.constant 0 : index
    %4 = vector.load %arg2[%c0_4, %c0_5] : memref<17x32xf32, #tpu.memory_space<vmem>>, vector<17x32xf32>
    %5 = arith.addf %3, %4 : vector<17x32xf32>
    %c0_6 = arith.constant 0 : index
    %c0_7 = arith.constant 0 : index
    %c0_8 = arith.constant 0 : index
    %6 = vector.load %arg4[%c0_6, %c0_7, %c0_8] : memref<2x1x32xf32, #tpu.memory_space<vmem>>, vector<1x1x32xf32>
    %7 = vector.shape_cast %6 : vector<1x1x32xf32> to vector<1x32xf32>
    %c0_9 = arith.constant 0 : index
    %c0_10 = arith.constant 0 : index
    %c0_11 = arith.constant 0 : index
    %8 = vector.load %arg5[%c0_9, %c0_10, %c0_11] : memref<2x1x32xf32, #tpu.memory_space<vmem>>, vector<1x1x32xf32>
    %9 = vector.shape_cast %8 : vector<1x1x32xf32> to vector<1x32xf32>
    %cst_12 = arith.constant dense<0.000000e+00> : vector<17xf32>
    %10 = vector.multi_reduction <add>, %5, %cst_12 [1] : vector<17x32xf32> to vector<17xf32>
    %11 = vector.shape_cast %10 : vector<17xf32> to vector<17x1xf32>
    %cst_13 = arith.constant 3.200000e+01 : f32
    %12 = vector.broadcast %cst_13 : f32 to vector<17x1xf32>
    %13 = arith.divf %11, %12 : vector<17x1xf32>
    %14 = vector.broadcast %13 : vector<17x1xf32> to vector<17x32xf32>
    %15 = arith.subf %5, %14 : vector<17x32xf32>
    %16 = arith.mulf %15, %15 : vector<17x32xf32>
    %cst_14 = arith.constant dense<0.000000e+00> : vector<17xf32>
    %17 = vector.multi_reduction <add>, %16, %cst_14 [1] : vector<17x32xf32> to vector<17xf32>
    %18 = vector.shape_cast %17 : vector<17xf32> to vector<17x1xf32>
    %cst_15 = arith.constant 3.200000e+01 : f32
    %19 = vector.broadcast %cst_15 : f32 to vector<17x1xf32>
    %20 = arith.divf %18, %19 : vector<17x1xf32>
    %cst_16 = arith.constant 9.99999996E-13 : f32
    %21 = vector.broadcast %cst_16 : f32 to vector<17x1xf32>
    %22 = arith.addf %20, %21 : vector<17x1xf32>
    %23 = math.rsqrt %22 : vector<17x1xf32>
    %24 = vector.broadcast %23 : vector<17x1xf32> to vector<17x32xf32>
    %25 = arith.mulf %15, %24 : vector<17x32xf32>
    %26 = vector.broadcast %7 : vector<1x32xf32> to vector<17x32xf32>
    %27 = arith.mulf %25, %26 : vector<17x32xf32>
    %28 = vector.broadcast %9 : vector<1x32xf32> to vector<17x32xf32>
    %29 = arith.addf %27, %28 : vector<17x32xf32>
    %c0_17 = arith.constant 0 : index
    %c0_18 = arith.constant 0 : index
    %c0_19 = arith.constant 0 : index
    %30 = vector.load %arg6[%c0_17, %c0_18, %c0_19] : memref<2x32x96xf32, #tpu.memory_space<vmem>>, vector<1x32x96xf32>
    %31 = vector.shape_cast %30 : vector<1x32x96xf32> to vector<32x96xf32>
    %cst_20 = arith.constant dense<0.000000e+00> : vector<17x96xf32>
    %32 = tpu.matmul %29, %31, %cst_20 {dimension_numbers = #tpu.dot_dimension_numbers<[1], [0], [0], [1], [0, 0, 1, 1], [], []>} : vector<17x32xf32>, vector<32x96xf32>, vector<17x96xf32> -> vector<17x96xf32>
    %c0_21 = arith.constant 0 : index
    %c0_22 = arith.constant 0 : index
    %c0_23 = arith.constant 0 : index
    %33 = vector.load %arg7[%c0_21, %c0_22, %c0_23] : memref<2x1x96xf32, #tpu.memory_space<vmem>>, vector<1x1x96xf32>
    %34 = vector.shape_cast %33 : vector<1x1x96xf32> to vector<1x96xf32>
    %35 = vector.broadcast %34 : vector<1x96xf32> to vector<17x96xf32>
    %36 = arith.addf %32, %35 : vector<17x96xf32>
    %c0_24 = arith.constant 0 : index
    %c0_25 = arith.constant 0 : index
    %c0_26 = arith.constant 0 : index
    %37 = vector.load %arg8[%c0_24, %c0_25, %c0_26] : memref<2x32x32xf32, #tpu.memory_space<vmem>>, vector<1x32x32xf32>
    %38 = vector.shape_cast %37 : vector<1x32x32xf32> to vector<32x32xf32>
    %cst_27 = arith.constant 0.000000e+00 : f32
    %39 = vector.broadcast %cst_27 : f32 to vector<17x32xf32>
    %40 = vector.extract_strided_slice %36 {offsets = [0, 0], sizes = [17, 8], strides = [1, 1]} : vector<17x96xf32> to vector<17x8xf32>
    %41 = vector.extract_strided_slice %36 {offsets = [0, 32], sizes = [17, 8], strides = [1, 1]} : vector<17x96xf32> to vector<17x8xf32>
    %42 = vector.extract_strided_slice %36 {offsets = [0, 64], sizes = [17, 8], strides = [1, 1]} : vector<17x96xf32> to vector<17x8xf32>
    %cst_28 = arith.constant dense<0.000000e+00> : vector<17x17xf32>
    %43 = tpu.matmul %40, %41, %cst_28 {dimension_numbers = #tpu.dot_dimension_numbers<[1], [1], [0], [0], [0, 0, 1, 0], [], []>} : vector<17x8xf32>, vector<17x8xf32>, vector<17x17xf32> -> vector<17x17xf32>
    %cst_29 = arith.constant 0.353553385 : f32
    %44 = vector.broadcast %cst_29 : f32 to vector<17x17xf32>
    %45 = arith.mulf %43, %44 : vector<17x17xf32>
    %cst_30 = arith.constant dense<0xFF800000> : vector<17xf32>
    %46 = vector.multi_reduction <maximumf>, %45, %cst_30 [1] : vector<17x17xf32> to vector<17xf32>
    %47 = vector.shape_cast %46 : vector<17xf32> to vector<17x1xf32>
    %48 = vector.broadcast %47 : vector<17x1xf32> to vector<17x17xf32>
    %49 = arith.subf %45, %48 : vector<17x17xf32>
    %50 = math.exp %49 : vector<17x17xf32>
    %cst_31 = arith.constant dense<0.000000e+00> : vector<17xf32>
    %51 = vector.multi_reduction <add>, %50, %cst_31 [1] : vector<17x17xf32> to vector<17xf32>
    %52 = vector.shape_cast %51 : vector<17xf32> to vector<17x1xf32>
    %53 = tpu.reciprocal %52 {approx = true} : vector<17x1xf32> -> vector<17x1xf32>
    %54 = vector.broadcast %53 : vector<17x1xf32> to vector<17x17xf32>
    %55 = arith.mulf %50, %54 : vector<17x17xf32>
    %cst_32 = arith.constant dense<0.000000e+00> : vector<17x8xf32>
    %56 = tpu.matmul %55, %42, %cst_32 {dimension_numbers = #tpu.dot_dimension_numbers<[1], [0], [0], [1], [0, 0, 1, 1], [], []>} : vector<17x17xf32>, vector<17x8xf32>, vector<17x8xf32> -> vector<17x8xf32>
    %57 = vector.extract_strided_slice %38 {offsets = [0, 0], sizes = [8, 32], strides = [1, 1]} : vector<32x32xf32> to vector<8x32xf32>
    %cst_33 = arith.constant dense<0.000000e+00> : vector<17x32xf32>
    %58 = tpu.matmul %56, %57, %cst_33 {dimension_numbers = #tpu.dot_dimension_numbers<[1], [0], [0], [1], [0, 0, 1, 1], [], []>} : vector<17x8xf32>, vector<8x32xf32>, vector<17x32xf32> -> vector<17x32xf32>
    %59 = arith.addf %39, %58 : vector<17x32xf32>
    %60 = vector.extract_strided_slice %36 {offsets = [0, 8], sizes = [17, 8], strides = [1, 1]} : vector<17x96xf32> to vector<17x8xf32>
    %61 = vector.extract_strided_slice %36 {offsets = [0, 40], sizes = [17, 8], strides = [1, 1]} : vector<17x96xf32> to vector<17x8xf32>
    %62 = vector.extract_strided_slice %36 {offsets = [0, 72], sizes = [17, 8], strides = [1, 1]} : vector<17x96xf32> to vector<17x8xf32>
    %cst_34 = arith.constant dense<0.000000e+00> : vector<17x17xf32>
    %63 = tpu.matmul %60, %61, %cst_34 {dimension_numbers = #tpu.dot_dimension_numbers<[1], [1], [0], [0], [0, 0, 1, 0], [], []>} : vector<17x8xf32>, vector<17x8xf32>, vector<17x17xf32> -> vector<17x17xf32>
    %cst_35 = arith.constant 0.353553385 : f32
    %64 = vector.broadcast %cst_35 : f32 to vector<17x17xf32>
    %65 = arith.mulf %63, %64 : vector<17x17xf32>
    %cst_36 = arith.constant dense<0xFF800000> : vector<17xf32>
    %66 = vector.multi_reduction <maximumf>, %65, %cst_36 [1] : vector<17x17xf32> to vector<17xf32>
    %67 = vector.shape_cast %66 : vector<17xf32> to vector<17x1xf32>
    %68 = vector.broadcast %67 : vector<17x1xf32> to vector<17x17xf32>
    %69 = arith.subf %65, %68 : vector<17x17xf32>
    %70 = math.exp %69 : vector<17x17xf32>
    %cst_37 = arith.constant dense<0.000000e+00> : vector<17xf32>
    %71 = vector.multi_reduction <add>, %70, %cst_37 [1] : vector<17x17xf32> to vector<17xf32>
    %72 = vector.shape_cast %71 : vector<17xf32> to vector<17x1xf32>
    %73 = tpu.reciprocal %72 {approx = true} : vector<17x1xf32> -> vector<17x1xf32>
    %74 = vector.broadcast %73 : vector<17x1xf32> to vector<17x17xf32>
    %75 = arith.mulf %70, %74 : vector<17x17xf32>
    %cst_38 = arith.constant dense<0.000000e+00> : vector<17x8xf32>
    %76 = tpu.matmul %75, %62, %cst_38 {dimension_numbers = #tpu.dot_dimension_numbers<[1], [0], [0], [1], [0, 0, 1, 1], [], []>} : vector<17x17xf32>, vector<17x8xf32>, vector<17x8xf32> -> vector<17x8xf32>
    %77 = vector.extract_strided_slice %38 {offsets = [8, 0], sizes = [8, 32], strides = [1, 1]} : vector<32x32xf32> to vector<8x32xf32>
    %cst_39 = arith.constant dense<0.000000e+00> : vector<17x32xf32>
    %78 = tpu.matmul %76, %77, %cst_39 {dimension_numbers = #tpu.dot_dimension_numbers<[1], [0], [0], [1], [0, 0, 1, 1], [], []>} : vector<17x8xf32>, vector<8x32xf32>, vector<17x32xf32> -> vector<17x32xf32>
    %79 = arith.addf %59, %78 : vector<17x32xf32>
    %80 = vector.extract_strided_slice %36 {offsets = [0, 16], sizes = [17, 8], strides = [1, 1]} : vector<17x96xf32> to vector<17x8xf32>
    %81 = vector.extract_strided_slice %36 {offsets = [0, 48], sizes = [17, 8], strides = [1, 1]} : vector<17x96xf32> to vector<17x8xf32>
    %82 = vector.extract_strided_slice %36 {offsets = [0, 80], sizes = [17, 8], strides = [1, 1]} : vector<17x96xf32> to vector<17x8xf32>
    %cst_40 = arith.constant dense<0.000000e+00> : vector<17x17xf32>
    %83 = tpu.matmul %80, %81, %cst_40 {dimension_numbers = #tpu.dot_dimension_numbers<[1], [1], [0], [0], [0, 0, 1, 0], [], []>} : vector<17x8xf32>, vector<17x8xf32>, vector<17x17xf32> -> vector<17x17xf32>
    %cst_41 = arith.constant 0.353553385 : f32
    %84 = vector.broadcast %cst_41 : f32 to vector<17x17xf32>
    %85 = arith.mulf %83, %84 : vector<17x17xf32>
    %cst_42 = arith.constant dense<0xFF800000> : vector<17xf32>
    %86 = vector.multi_reduction <maximumf>, %85, %cst_42 [1] : vector<17x17xf32> to vector<17xf32>
    %87 = vector.shape_cast %86 : vector<17xf32> to vector<17x1xf32>
    %88 = vector.broadcast %87 : vector<17x1xf32> to vector<17x17xf32>
    %89 = arith.subf %85, %88 : vector<17x17xf32>
    %90 = math.exp %89 : vector<17x17xf32>
    %cst_43 = arith.constant dense<0.000000e+00> : vector<17xf32>
    %91 = vector.multi_reduction <add>, %90, %cst_43 [1] : vector<17x17xf32> to vector<17xf32>
    %92 = vector.shape_cast %91 : vector<17xf32> to vector<17x1xf32>
    %93 = tpu.reciprocal %92 {approx = true} : vector<17x1xf32> -> vector<17x1xf32>
    %94 = vector.broadcast %93 : vector<17x1xf32> to vector<17x17xf32>
    %95 = arith.mulf %90, %94 : vector<17x17xf32>
    %cst_44 = arith.constant dense<0.000000e+00> : vector<17x8xf32>
    %96 = tpu.matmul %95, %82, %cst_44 {dimension_numbers = #tpu.dot_dimension_numbers<[1], [0], [0], [1], [0, 0, 1, 1], [], []>} : vector<17x17xf32>, vector<17x8xf32>, vector<17x8xf32> -> vector<17x8xf32>
    %97 = vector.extract_strided_slice %38 {offsets = [16, 0], sizes = [8, 32], strides = [1, 1]} : vector<32x32xf32> to vector<8x32xf32>
    %cst_45 = arith.constant dense<0.000000e+00> : vector<17x32xf32>
    %98 = tpu.matmul %96, %97, %cst_45 {dimension_numbers = #tpu.dot_dimension_numbers<[1], [0], [0], [1], [0, 0, 1, 1], [], []>} : vector<17x8xf32>, vector<8x32xf32>, vector<17x32xf32> -> vector<17x32xf32>
    %99 = arith.addf %79, %98 : vector<17x32xf32>
    %100 = vector.extract_strided_slice %36 {offsets = [0, 24], sizes = [17, 8], strides = [1, 1]} : vector<17x96xf32> to vector<17x8xf32>
    %101 = vector.extract_strided_slice %36 {offsets = [0, 56], sizes = [17, 8], strides = [1, 1]} : vector<17x96xf32> to vector<17x8xf32>
    %102 = vector.extract_strided_slice %36 {offsets = [0, 88], sizes = [17, 8], strides = [1, 1]} : vector<17x96xf32> to vector<17x8xf32>
    %cst_46 = arith.constant dense<0.000000e+00> : vector<17x17xf32>
    %103 = tpu.matmul %100, %101, %cst_46 {dimension_numbers = #tpu.dot_dimension_numbers<[1], [1], [0], [0], [0, 0, 1, 0], [], []>} : vector<17x8xf32>, vector<17x8xf32>, vector<17x17xf32> -> vector<17x17xf32>
    %cst_47 = arith.constant 0.353553385 : f32
    %104 = vector.broadcast %cst_47 : f32 to vector<17x17xf32>
    %105 = arith.mulf %103, %104 : vector<17x17xf32>
    %cst_48 = arith.constant dense<0xFF800000> : vector<17xf32>
    %106 = vector.multi_reduction <maximumf>, %105, %cst_48 [1] : vector<17x17xf32> to vector<17xf32>
    %107 = vector.shape_cast %106 : vector<17xf32> to vector<17x1xf32>
    %108 = vector.broadcast %107 : vector<17x1xf32> to vector<17x17xf32>
    %109 = arith.subf %105, %108 : vector<17x17xf32>
    %110 = math.exp %109 : vector<17x17xf32>
    %cst_49 = arith.constant dense<0.000000e+00> : vector<17xf32>
    %111 = vector.multi_reduction <add>, %110, %cst_49 [1] : vector<17x17xf32> to vector<17xf32>
    %112 = vector.shape_cast %111 : vector<17xf32> to vector<17x1xf32>
    %113 = tpu.reciprocal %112 {approx = true} : vector<17x1xf32> -> vector<17x1xf32>
    %114 = vector.broadcast %113 : vector<17x1xf32> to vector<17x17xf32>
    %115 = arith.mulf %110, %114 : vector<17x17xf32>
    %cst_50 = arith.constant dense<0.000000e+00> : vector<17x8xf32>
    %116 = tpu.matmul %115, %102, %cst_50 {dimension_numbers = #tpu.dot_dimension_numbers<[1], [0], [0], [1], [0, 0, 1, 1], [], []>} : vector<17x17xf32>, vector<17x8xf32>, vector<17x8xf32> -> vector<17x8xf32>
    %117 = vector.extract_strided_slice %38 {offsets = [24, 0], sizes = [8, 32], strides = [1, 1]} : vector<32x32xf32> to vector<8x32xf32>
    %cst_51 = arith.constant dense<0.000000e+00> : vector<17x32xf32>
    %118 = tpu.matmul %116, %117, %cst_51 {dimension_numbers = #tpu.dot_dimension_numbers<[1], [0], [0], [1], [0, 0, 1, 1], [], []>} : vector<17x8xf32>, vector<8x32xf32>, vector<17x32xf32> -> vector<17x32xf32>
    %119 = arith.addf %99, %118 : vector<17x32xf32>
    %120 = arith.addf %5, %119 : vector<17x32xf32>
    %c0_52 = arith.constant 0 : index
    %c0_53 = arith.constant 0 : index
    %c0_54 = arith.constant 0 : index
    %121 = vector.load %arg9[%c0_52, %c0_53, %c0_54] : memref<2x1x32xf32, #tpu.memory_space<vmem>>, vector<1x1x32xf32>
    %122 = vector.shape_cast %121 : vector<1x1x32xf32> to vector<1x32xf32>
    %123 = vector.broadcast %122 : vector<1x32xf32> to vector<17x32xf32>
    %124 = arith.addf %120, %123 : vector<17x32xf32>
    %c0_55 = arith.constant 0 : index
    %c0_56 = arith.constant 0 : index
    %c0_57 = arith.constant 0 : index
    %125 = vector.load %arg10[%c0_55, %c0_56, %c0_57] : memref<2x1x32xf32, #tpu.memory_space<vmem>>, vector<1x1x32xf32>
    %126 = vector.shape_cast %125 : vector<1x1x32xf32> to vector<1x32xf32>
    %c0_58 = arith.constant 0 : index
    %c0_59 = arith.constant 0 : index
    %c0_60 = arith.constant 0 : index
    %127 = vector.load %arg11[%c0_58, %c0_59, %c0_60] : memref<2x1x32xf32, #tpu.memory_space<vmem>>, vector<1x1x32xf32>
    %128 = vector.shape_cast %127 : vector<1x1x32xf32> to vector<1x32xf32>
    %cst_61 = arith.constant dense<0.000000e+00> : vector<17xf32>
    %129 = vector.multi_reduction <add>, %124, %cst_61 [1] : vector<17x32xf32> to vector<17xf32>
    %130 = vector.shape_cast %129 : vector<17xf32> to vector<17x1xf32>
    %cst_62 = arith.constant 3.200000e+01 : f32
    %131 = vector.broadcast %cst_62 : f32 to vector<17x1xf32>
    %132 = arith.divf %130, %131 : vector<17x1xf32>
    %133 = vector.broadcast %132 : vector<17x1xf32> to vector<17x32xf32>
    %134 = arith.subf %124, %133 : vector<17x32xf32>
    %135 = arith.mulf %134, %134 : vector<17x32xf32>
    %cst_63 = arith.constant dense<0.000000e+00> : vector<17xf32>
    %136 = vector.multi_reduction <add>, %135, %cst_63 [1] : vector<17x32xf32> to vector<17xf32>
    %137 = vector.shape_cast %136 : vector<17xf32> to vector<17x1xf32>
    %cst_64 = arith.constant 3.200000e+01 : f32
    %138 = vector.broadcast %cst_64 : f32 to vector<17x1xf32>
    %139 = arith.divf %137, %138 : vector<17x1xf32>
    %cst_65 = arith.constant 9.99999996E-13 : f32
    %140 = vector.broadcast %cst_65 : f32 to vector<17x1xf32>
    %141 = arith.addf %139, %140 : vector<17x1xf32>
    %142 = math.rsqrt %141 : vector<17x1xf32>
    %143 = vector.broadcast %142 : vector<17x1xf32> to vector<17x32xf32>
    %144 = arith.mulf %134, %143 : vector<17x32xf32>
    %145 = vector.broadcast %126 : vector<1x32xf32> to vector<17x32xf32>
    %146 = arith.mulf %144, %145 : vector<17x32xf32>
    %147 = vector.broadcast %128 : vector<1x32xf32> to vector<17x32xf32>
    %148 = arith.addf %146, %147 : vector<17x32xf32>
    %c0_66 = arith.constant 0 : index
    %c0_67 = arith.constant 0 : index
    %c0_68 = arith.constant 0 : index
    %149 = vector.load %arg12[%c0_66, %c0_67, %c0_68] : memref<2x32x64xf32, #tpu.memory_space<vmem>>, vector<1x32x64xf32>
    %150 = vector.shape_cast %149 : vector<1x32x64xf32> to vector<32x64xf32>
    %cst_69 = arith.constant dense<0.000000e+00> : vector<17x64xf32>
    %151 = tpu.matmul %148, %150, %cst_69 {dimension_numbers = #tpu.dot_dimension_numbers<[1], [0], [0], [1], [0, 0, 1, 1], [], []>} : vector<17x32xf32>, vector<32x64xf32>, vector<17x64xf32> -> vector<17x64xf32>
    %c0_70 = arith.constant 0 : index
    %c0_71 = arith.constant 0 : index
    %c0_72 = arith.constant 0 : index
    %152 = vector.load %arg13[%c0_70, %c0_71, %c0_72] : memref<2x1x64xf32, #tpu.memory_space<vmem>>, vector<1x1x64xf32>
    %153 = vector.shape_cast %152 : vector<1x1x64xf32> to vector<1x64xf32>
    %154 = vector.broadcast %153 : vector<1x64xf32> to vector<17x64xf32>
    %155 = arith.addf %151, %154 : vector<17x64xf32>
    %cst_73 = arith.constant 5.000000e-01 : f32
    %156 = vector.broadcast %cst_73 : f32 to vector<17x64xf32>
    %157 = arith.mulf %156, %155 : vector<17x64xf32>
    %cst_74 = arith.constant 4.471500e-02 : f32
    %158 = vector.broadcast %cst_74 : f32 to vector<17x64xf32>
    %159 = arith.mulf %158, %155 : vector<17x64xf32>
    %160 = arith.mulf %159, %155 : vector<17x64xf32>
    %161 = arith.mulf %160, %155 : vector<17x64xf32>
    %162 = arith.addf %155, %161 : vector<17x64xf32>
    %cst_75 = arith.constant 0.797884583 : f32
    %163 = vector.broadcast %cst_75 : f32 to vector<17x64xf32>
    %164 = arith.mulf %163, %162 : vector<17x64xf32>
    %165 = math.tanh %164 : vector<17x64xf32>
    %cst_76 = arith.constant 1.000000e+00 : f32
    %166 = vector.broadcast %cst_76 : f32 to vector<17x64xf32>
    %167 = arith.addf %166, %165 : vector<17x64xf32>
    %168 = arith.mulf %157, %167 : vector<17x64xf32>
    %c0_77 = arith.constant 0 : index
    %c0_78 = arith.constant 0 : index
    %c0_79 = arith.constant 0 : index
    %169 = vector.load %arg14[%c0_77, %c0_78, %c0_79] : memref<2x64x32xf32, #tpu.memory_space<vmem>>, vector<1x64x32xf32>
    %170 = vector.shape_cast %169 : vector<1x64x32xf32> to vector<64x32xf32>
    %cst_80 = arith.constant dense<0.000000e+00> : vector<17x32xf32>
    %171 = tpu.matmul %168, %170, %cst_80 {dimension_numbers = #tpu.dot_dimension_numbers<[1], [0], [0], [1], [0, 0, 1, 1], [], []>} : vector<17x64xf32>, vector<64x32xf32>, vector<17x32xf32> -> vector<17x32xf32>
    %172 = arith.addf %124, %171 : vector<17x32xf32>
    %c0_81 = arith.constant 0 : index
    %c0_82 = arith.constant 0 : index
    %c0_83 = arith.constant 0 : index
    %173 = vector.load %arg15[%c0_81, %c0_82, %c0_83] : memref<2x1x32xf32, #tpu.memory_space<vmem>>, vector<1x1x32xf32>
    %174 = vector.shape_cast %173 : vector<1x1x32xf32> to vector<1x32xf32>
    %175 = vector.broadcast %174 : vector<1x32xf32> to vector<17x32xf32>
    %176 = arith.addf %172, %175 : vector<17x32xf32>
    %c1 = arith.constant 1 : index
    %c0_84 = arith.constant 0 : index
    %c0_85 = arith.constant 0 : index
    %177 = vector.load %arg4[%c1, %c0_84, %c0_85] : memref<2x1x32xf32, #tpu.memory_space<vmem>>, vector<1x1x32xf32>
    %178 = vector.shape_cast %177 : vector<1x1x32xf32> to vector<1x32xf32>
    %c1_86 = arith.constant 1 : index
    %c0_87 = arith.constant 0 : index
    %c0_88 = arith.constant 0 : index
    %179 = vector.load %arg5[%c1_86, %c0_87, %c0_88] : memref<2x1x32xf32, #tpu.memory_space<vmem>>, vector<1x1x32xf32>
    %180 = vector.shape_cast %179 : vector<1x1x32xf32> to vector<1x32xf32>
    %cst_89 = arith.constant dense<0.000000e+00> : vector<17xf32>
    %181 = vector.multi_reduction <add>, %176, %cst_89 [1] : vector<17x32xf32> to vector<17xf32>
    %182 = vector.shape_cast %181 : vector<17xf32> to vector<17x1xf32>
    %cst_90 = arith.constant 3.200000e+01 : f32
    %183 = vector.broadcast %cst_90 : f32 to vector<17x1xf32>
    %184 = arith.divf %182, %183 : vector<17x1xf32>
    %185 = vector.broadcast %184 : vector<17x1xf32> to vector<17x32xf32>
    %186 = arith.subf %176, %185 : vector<17x32xf32>
    %187 = arith.mulf %186, %186 : vector<17x32xf32>
    %cst_91 = arith.constant dense<0.000000e+00> : vector<17xf32>
    %188 = vector.multi_reduction <add>, %187, %cst_91 [1] : vector<17x32xf32> to vector<17xf32>
    %189 = vector.shape_cast %188 : vector<17xf32> to vector<17x1xf32>
    %cst_92 = arith.constant 3.200000e+01 : f32
    %190 = vector.broadcast %cst_92 : f32 to vector<17x1xf32>
    %191 = arith.divf %189, %190 : vector<17x1xf32>
    %cst_93 = arith.constant 9.99999996E-13 : f32
    %192 = vector.broadcast %cst_93 : f32 to vector<17x1xf32>
    %193 = arith.addf %191, %192 : vector<17x1xf32>
    %194 = math.rsqrt %193 : vector<17x1xf32>
    %195 = vector.broadcast %194 : vector<17x1xf32> to vector<17x32xf32>
    %196 = arith.mulf %186, %195 : vector<17x32xf32>
    %197 = vector.broadcast %178 : vector<1x32xf32> to vector<17x32xf32>
    %198 = arith.mulf %196, %197 : vector<17x32xf32>
    %199 = vector.broadcast %180 : vector<1x32xf32> to vector<17x32xf32>
    %200 = arith.addf %198, %199 : vector<17x32xf32>
    %c1_94 = arith.constant 1 : index
    %c0_95 = arith.constant 0 : index
    %c0_96 = arith.constant 0 : index
    %201 = vector.load %arg6[%c1_94, %c0_95, %c0_96] : memref<2x32x96xf32, #tpu.memory_space<vmem>>, vector<1x32x96xf32>
    %202 = vector.shape_cast %201 : vector<1x32x96xf32> to vector<32x96xf32>
    %cst_97 = arith.constant dense<0.000000e+00> : vector<17x96xf32>
    %203 = tpu.matmul %200, %202, %cst_97 {dimension_numbers = #tpu.dot_dimension_numbers<[1], [0], [0], [1], [0, 0, 1, 1], [], []>} : vector<17x32xf32>, vector<32x96xf32>, vector<17x96xf32> -> vector<17x96xf32>
    %c1_98 = arith.constant 1 : index
    %c0_99 = arith.constant 0 : index
    %c0_100 = arith.constant 0 : index
    %204 = vector.load %arg7[%c1_98, %c0_99, %c0_100] : memref<2x1x96xf32, #tpu.memory_space<vmem>>, vector<1x1x96xf32>
    %205 = vector.shape_cast %204 : vector<1x1x96xf32> to vector<1x96xf32>
    %206 = vector.broadcast %205 : vector<1x96xf32> to vector<17x96xf32>
    %207 = arith.addf %203, %206 : vector<17x96xf32>
    %c1_101 = arith.constant 1 : index
    %c0_102 = arith.constant 0 : index
    %c0_103 = arith.constant 0 : index
    %208 = vector.load %arg8[%c1_101, %c0_102, %c0_103] : memref<2x32x32xf32, #tpu.memory_space<vmem>>, vector<1x32x32xf32>
    %209 = vector.shape_cast %208 : vector<1x32x32xf32> to vector<32x32xf32>
    %cst_104 = arith.constant 0.000000e+00 : f32
    %210 = vector.broadcast %cst_104 : f32 to vector<17x32xf32>
    %211 = vector.extract_strided_slice %207 {offsets = [0, 0], sizes = [17, 8], strides = [1, 1]} : vector<17x96xf32> to vector<17x8xf32>
    %212 = vector.extract_strided_slice %207 {offsets = [0, 32], sizes = [17, 8], strides = [1, 1]} : vector<17x96xf32> to vector<17x8xf32>
    %213 = vector.extract_strided_slice %207 {offsets = [0, 64], sizes = [17, 8], strides = [1, 1]} : vector<17x96xf32> to vector<17x8xf32>
    %cst_105 = arith.constant dense<0.000000e+00> : vector<17x17xf32>
    %214 = tpu.matmul %211, %212, %cst_105 {dimension_numbers = #tpu.dot_dimension_numbers<[1], [1], [0], [0], [0, 0, 1, 0], [], []>} : vector<17x8xf32>, vector<17x8xf32>, vector<17x17xf32> -> vector<17x17xf32>
    %cst_106 = arith.constant 0.353553385 : f32
    %215 = vector.broadcast %cst_106 : f32 to vector<17x17xf32>
    %216 = arith.mulf %214, %215 : vector<17x17xf32>
    %cst_107 = arith.constant dense<0xFF800000> : vector<17xf32>
    %217 = vector.multi_reduction <maximumf>, %216, %cst_107 [1] : vector<17x17xf32> to vector<17xf32>
    %218 = vector.shape_cast %217 : vector<17xf32> to vector<17x1xf32>
    %219 = vector.broadcast %218 : vector<17x1xf32> to vector<17x17xf32>
    %220 = arith.subf %216, %219 : vector<17x17xf32>
    %221 = math.exp %220 : vector<17x17xf32>
    %cst_108 = arith.constant dense<0.000000e+00> : vector<17xf32>
    %222 = vector.multi_reduction <add>, %221, %cst_108 [1] : vector<17x17xf32> to vector<17xf32>
    %223 = vector.shape_cast %222 : vector<17xf32> to vector<17x1xf32>
    %224 = tpu.reciprocal %223 {approx = true} : vector<17x1xf32> -> vector<17x1xf32>
    %225 = vector.broadcast %224 : vector<17x1xf32> to vector<17x17xf32>
    %226 = arith.mulf %221, %225 : vector<17x17xf32>
    %cst_109 = arith.constant dense<0.000000e+00> : vector<17x8xf32>
    %227 = tpu.matmul %226, %213, %cst_109 {dimension_numbers = #tpu.dot_dimension_numbers<[1], [0], [0], [1], [0, 0, 1, 1], [], []>} : vector<17x17xf32>, vector<17x8xf32>, vector<17x8xf32> -> vector<17x8xf32>
    %228 = vector.extract_strided_slice %209 {offsets = [0, 0], sizes = [8, 32], strides = [1, 1]} : vector<32x32xf32> to vector<8x32xf32>
    %cst_110 = arith.constant dense<0.000000e+00> : vector<17x32xf32>
    %229 = tpu.matmul %227, %228, %cst_110 {dimension_numbers = #tpu.dot_dimension_numbers<[1], [0], [0], [1], [0, 0, 1, 1], [], []>} : vector<17x8xf32>, vector<8x32xf32>, vector<17x32xf32> -> vector<17x32xf32>
    %230 = arith.addf %210, %229 : vector<17x32xf32>
    %231 = vector.extract_strided_slice %207 {offsets = [0, 8], sizes = [17, 8], strides = [1, 1]} : vector<17x96xf32> to vector<17x8xf32>
    %232 = vector.extract_strided_slice %207 {offsets = [0, 40], sizes = [17, 8], strides = [1, 1]} : vector<17x96xf32> to vector<17x8xf32>
    %233 = vector.extract_strided_slice %207 {offsets = [0, 72], sizes = [17, 8], strides = [1, 1]} : vector<17x96xf32> to vector<17x8xf32>
    %cst_111 = arith.constant dense<0.000000e+00> : vector<17x17xf32>
    %234 = tpu.matmul %231, %232, %cst_111 {dimension_numbers = #tpu.dot_dimension_numbers<[1], [1], [0], [0], [0, 0, 1, 0], [], []>} : vector<17x8xf32>, vector<17x8xf32>, vector<17x17xf32> -> vector<17x17xf32>
    %cst_112 = arith.constant 0.353553385 : f32
    %235 = vector.broadcast %cst_112 : f32 to vector<17x17xf32>
    %236 = arith.mulf %234, %235 : vector<17x17xf32>
    %cst_113 = arith.constant dense<0xFF800000> : vector<17xf32>
    %237 = vector.multi_reduction <maximumf>, %236, %cst_113 [1] : vector<17x17xf32> to vector<17xf32>
    %238 = vector.shape_cast %237 : vector<17xf32> to vector<17x1xf32>
    %239 = vector.broadcast %238 : vector<17x1xf32> to vector<17x17xf32>
    %240 = arith.subf %236, %239 : vector<17x17xf32>
    %241 = math.exp %240 : vector<17x17xf32>
    %cst_114 = arith.constant dense<0.000000e+00> : vector<17xf32>
    %242 = vector.multi_reduction <add>, %241, %cst_114 [1] : vector<17x17xf32> to vector<17xf32>
    %243 = vector.shape_cast %242 : vector<17xf32> to vector<17x1xf32>
    %244 = tpu.reciprocal %243 {approx = true} : vector<17x1xf32> -> vector<17x1xf32>
    %245 = vector.broadcast %244 : vector<17x1xf32> to vector<17x17xf32>
    %246 = arith.mulf %241, %245 : vector<17x17xf32>
    %cst_115 = arith.constant dense<0.000000e+00> : vector<17x8xf32>
    %247 = tpu.matmul %246, %233, %cst_115 {dimension_numbers = #tpu.dot_dimension_numbers<[1], [0], [0], [1], [0, 0, 1, 1], [], []>} : vector<17x17xf32>, vector<17x8xf32>, vector<17x8xf32> -> vector<17x8xf32>
    %248 = vector.extract_strided_slice %209 {offsets = [8, 0], sizes = [8, 32], strides = [1, 1]} : vector<32x32xf32> to vector<8x32xf32>
    %cst_116 = arith.constant dense<0.000000e+00> : vector<17x32xf32>
    %249 = tpu.matmul %247, %248, %cst_116 {dimension_numbers = #tpu.dot_dimension_numbers<[1], [0], [0], [1], [0, 0, 1, 1], [], []>} : vector<17x8xf32>, vector<8x32xf32>, vector<17x32xf32> -> vector<17x32xf32>
    %250 = arith.addf %230, %249 : vector<17x32xf32>
    %251 = vector.extract_strided_slice %207 {offsets = [0, 16], sizes = [17, 8], strides = [1, 1]} : vector<17x96xf32> to vector<17x8xf32>
    %252 = vector.extract_strided_slice %207 {offsets = [0, 48], sizes = [17, 8], strides = [1, 1]} : vector<17x96xf32> to vector<17x8xf32>
    %253 = vector.extract_strided_slice %207 {offsets = [0, 80], sizes = [17, 8], strides = [1, 1]} : vector<17x96xf32> to vector<17x8xf32>
    %cst_117 = arith.constant dense<0.000000e+00> : vector<17x17xf32>
    %254 = tpu.matmul %251, %252, %cst_117 {dimension_numbers = #tpu.dot_dimension_numbers<[1], [1], [0], [0], [0, 0, 1, 0], [], []>} : vector<17x8xf32>, vector<17x8xf32>, vector<17x17xf32> -> vector<17x17xf32>
    %cst_118 = arith.constant 0.353553385 : f32
    %255 = vector.broadcast %cst_118 : f32 to vector<17x17xf32>
    %256 = arith.mulf %254, %255 : vector<17x17xf32>
    %cst_119 = arith.constant dense<0xFF800000> : vector<17xf32>
    %257 = vector.multi_reduction <maximumf>, %256, %cst_119 [1] : vector<17x17xf32> to vector<17xf32>
    %258 = vector.shape_cast %257 : vector<17xf32> to vector<17x1xf32>
    %259 = vector.broadcast %258 : vector<17x1xf32> to vector<17x17xf32>
    %260 = arith.subf %256, %259 : vector<17x17xf32>
    %261 = math.exp %260 : vector<17x17xf32>
    %cst_120 = arith.constant dense<0.000000e+00> : vector<17xf32>
    %262 = vector.multi_reduction <add>, %261, %cst_120 [1] : vector<17x17xf32> to vector<17xf32>
    %263 = vector.shape_cast %262 : vector<17xf32> to vector<17x1xf32>
    %264 = tpu.reciprocal %263 {approx = true} : vector<17x1xf32> -> vector<17x1xf32>
    %265 = vector.broadcast %264 : vector<17x1xf32> to vector<17x17xf32>
    %266 = arith.mulf %261, %265 : vector<17x17xf32>
    %cst_121 = arith.constant dense<0.000000e+00> : vector<17x8xf32>
    %267 = tpu.matmul %266, %253, %cst_121 {dimension_numbers = #tpu.dot_dimension_numbers<[1], [0], [0], [1], [0, 0, 1, 1], [], []>} : vector<17x17xf32>, vector<17x8xf32>, vector<17x8xf32> -> vector<17x8xf32>
    %268 = vector.extract_strided_slice %209 {offsets = [16, 0], sizes = [8, 32], strides = [1, 1]} : vector<32x32xf32> to vector<8x32xf32>
    %cst_122 = arith.constant dense<0.000000e+00> : vector<17x32xf32>
    %269 = tpu.matmul %267, %268, %cst_122 {dimension_numbers = #tpu.dot_dimension_numbers<[1], [0], [0], [1], [0, 0, 1, 1], [], []>} : vector<17x8xf32>, vector<8x32xf32>, vector<17x32xf32> -> vector<17x32xf32>
    %270 = arith.addf %250, %269 : vector<17x32xf32>
    %271 = vector.extract_strided_slice %207 {offsets = [0, 24], sizes = [17, 8], strides = [1, 1]} : vector<17x96xf32> to vector<17x8xf32>
    %272 = vector.extract_strided_slice %207 {offsets = [0, 56], sizes = [17, 8], strides = [1, 1]} : vector<17x96xf32> to vector<17x8xf32>
    %273 = vector.extract_strided_slice %207 {offsets = [0, 88], sizes = [17, 8], strides = [1, 1]} : vector<17x96xf32> to vector<17x8xf32>
    %cst_123 = arith.constant dense<0.000000e+00> : vector<17x17xf32>
    %274 = tpu.matmul %271, %272, %cst_123 {dimension_numbers = #tpu.dot_dimension_numbers<[1], [1], [0], [0], [0, 0, 1, 0], [], []>} : vector<17x8xf32>, vector<17x8xf32>, vector<17x17xf32> -> vector<17x17xf32>
    %cst_124 = arith.constant 0.353553385 : f32
    %275 = vector.broadcast %cst_124 : f32 to vector<17x17xf32>
    %276 = arith.mulf %274, %275 : vector<17x17xf32>
    %cst_125 = arith.constant dense<0xFF800000> : vector<17xf32>
    %277 = vector.multi_reduction <maximumf>, %276, %cst_125 [1] : vector<17x17xf32> to vector<17xf32>
    %278 = vector.shape_cast %277 : vector<17xf32> to vector<17x1xf32>
    %279 = vector.broadcast %278 : vector<17x1xf32> to vector<17x17xf32>
    %280 = arith.subf %276, %279 : vector<17x17xf32>
    %281 = math.exp %280 : vector<17x17xf32>
    %cst_126 = arith.constant dense<0.000000e+00> : vector<17xf32>
    %282 = vector.multi_reduction <add>, %281, %cst_126 [1] : vector<17x17xf32> to vector<17xf32>
    %283 = vector.shape_cast %282 : vector<17xf32> to vector<17x1xf32>
    %284 = tpu.reciprocal %283 {approx = true} : vector<17x1xf32> -> vector<17x1xf32>
    %285 = vector.broadcast %284 : vector<17x1xf32> to vector<17x17xf32>
    %286 = arith.mulf %281, %285 : vector<17x17xf32>
    %cst_127 = arith.constant dense<0.000000e+00> : vector<17x8xf32>
    %287 = tpu.matmul %286, %273, %cst_127 {dimension_numbers = #tpu.dot_dimension_numbers<[1], [0], [0], [1], [0, 0, 1, 1], [], []>} : vector<17x17xf32>, vector<17x8xf32>, vector<17x8xf32> -> vector<17x8xf32>
    %288 = vector.extract_strided_slice %209 {offsets = [24, 0], sizes = [8, 32], strides = [1, 1]} : vector<32x32xf32> to vector<8x32xf32>
    %cst_128 = arith.constant dense<0.000000e+00> : vector<17x32xf32>
    %289 = tpu.matmul %287, %288, %cst_128 {dimension_numbers = #tpu.dot_dimension_numbers<[1], [0], [0], [1], [0, 0, 1, 1], [], []>} : vector<17x8xf32>, vector<8x32xf32>, vector<17x32xf32> -> vector<17x32xf32>
    %290 = arith.addf %270, %289 : vector<17x32xf32>
    %291 = arith.addf %176, %290 : vector<17x32xf32>
    %c1_129 = arith.constant 1 : index
    %c0_130 = arith.constant 0 : index
    %c0_131 = arith.constant 0 : index
    %292 = vector.load %arg9[%c1_129, %c0_130, %c0_131] : memref<2x1x32xf32, #tpu.memory_space<vmem>>, vector<1x1x32xf32>
    %293 = vector.shape_cast %292 : vector<1x1x32xf32> to vector<1x32xf32>
    %294 = vector.broadcast %293 : vector<1x32xf32> to vector<17x32xf32>
    %295 = arith.addf %291, %294 : vector<17x32xf32>
    %c1_132 = arith.constant 1 : index
    %c0_133 = arith.constant 0 : index
    %c0_134 = arith.constant 0 : index
    %296 = vector.load %arg10[%c1_132, %c0_133, %c0_134] : memref<2x1x32xf32, #tpu.memory_space<vmem>>, vector<1x1x32xf32>
    %297 = vector.shape_cast %296 : vector<1x1x32xf32> to vector<1x32xf32>
    %c1_135 = arith.constant 1 : index
    %c0_136 = arith.constant 0 : index
    %c0_137 = arith.constant 0 : index
    %298 = vector.load %arg11[%c1_135, %c0_136, %c0_137] : memref<2x1x32xf32, #tpu.memory_space<vmem>>, vector<1x1x32xf32>
    %299 = vector.shape_cast %298 : vector<1x1x32xf32> to vector<1x32xf32>
    %cst_138 = arith.constant dense<0.000000e+00> : vector<17xf32>
    %300 = vector.multi_reduction <add>, %295, %cst_138 [1] : vector<17x32xf32> to vector<17xf32>
    %301 = vector.shape_cast %300 : vector<17xf32> to vector<17x1xf32>
    %cst_139 = arith.constant 3.200000e+01 : f32
    %302 = vector.broadcast %cst_139 : f32 to vector<17x1xf32>
    %303 = arith.divf %301, %302 : vector<17x1xf32>
    %304 = vector.broadcast %303 : vector<17x1xf32> to vector<17x32xf32>
    %305 = arith.subf %295, %304 : vector<17x32xf32>
    %306 = arith.mulf %305, %305 : vector<17x32xf32>
    %cst_140 = arith.constant dense<0.000000e+00> : vector<17xf32>
    %307 = vector.multi_reduction <add>, %306, %cst_140 [1] : vector<17x32xf32> to vector<17xf32>
    %308 = vector.shape_cast %307 : vector<17xf32> to vector<17x1xf32>
    %cst_141 = arith.constant 3.200000e+01 : f32
    %309 = vector.broadcast %cst_141 : f32 to vector<17x1xf32>
    %310 = arith.divf %308, %309 : vector<17x1xf32>
    %cst_142 = arith.constant 9.99999996E-13 : f32
    %311 = vector.broadcast %cst_142 : f32 to vector<17x1xf32>
    %312 = arith.addf %310, %311 : vector<17x1xf32>
    %313 = math.rsqrt %312 : vector<17x1xf32>
    %314 = vector.broadcast %313 : vector<17x1xf32> to vector<17x32xf32>
    %315 = arith.mulf %305, %314 : vector<17x32xf32>
    %316 = vector.broadcast %297 : vector<1x32xf32> to vector<17x32xf32>
    %317 = arith.mulf %315, %316 : vector<17x32xf32>
    %318 = vector.broadcast %299 : vector<1x32xf32> to vector<17x32xf32>
    %319 = arith.addf %317, %318 : vector<17x32xf32>
    %c1_143 = arith.constant 1 : index
    %c0_144 = arith.constant 0 : index
    %c0_145 = arith.constant 0 : index
    %320 = vector.load %arg12[%c1_143, %c0_144, %c0_145] : memref<2x32x64xf32, #tpu.memory_space<vmem>>, vector<1x32x64xf32>
    %321 = vector.shape_cast %320 : vector<1x32x64xf32> to vector<32x64xf32>
    %cst_146 = arith.constant dense<0.000000e+00> : vector<17x64xf32>
    %322 = tpu.matmul %319, %321, %cst_146 {dimension_numbers = #tpu.dot_dimension_numbers<[1], [0], [0], [1], [0, 0, 1, 1], [], []>} : vector<17x32xf32>, vector<32x64xf32>, vector<17x64xf32> -> vector<17x64xf32>
    %c1_147 = arith.constant 1 : index
    %c0_148 = arith.constant 0 : index
    %c0_149 = arith.constant 0 : index
    %323 = vector.load %arg13[%c1_147, %c0_148, %c0_149] : memref<2x1x64xf32, #tpu.memory_space<vmem>>, vector<1x1x64xf32>
    %324 = vector.shape_cast %323 : vector<1x1x64xf32> to vector<1x64xf32>
    %325 = vector.broadcast %324 : vector<1x64xf32> to vector<17x64xf32>
    %326 = arith.addf %322, %325 : vector<17x64xf32>
    %cst_150 = arith.constant 5.000000e-01 : f32
    %327 = vector.broadcast %cst_150 : f32 to vector<17x64xf32>
    %328 = arith.mulf %327, %326 : vector<17x64xf32>
    %cst_151 = arith.constant 4.471500e-02 : f32
    %329 = vector.broadcast %cst_151 : f32 to vector<17x64xf32>
    %330 = arith.mulf %329, %326 : vector<17x64xf32>
    %331 = arith.mulf %330, %326 : vector<17x64xf32>
    %332 = arith.mulf %331, %326 : vector<17x64xf32>
    %333 = arith.addf %326, %332 : vector<17x64xf32>
    %cst_152 = arith.constant 0.797884583 : f32
    %334 = vector.broadcast %cst_152 : f32 to vector<17x64xf32>
    %335 = arith.mulf %334, %333 : vector<17x64xf32>
    %336 = math.tanh %335 : vector<17x64xf32>
    %cst_153 = arith.constant 1.000000e+00 : f32
    %337 = vector.broadcast %cst_153 : f32 to vector<17x64xf32>
    %338 = arith.addf %337, %336 : vector<17x64xf32>
    %339 = arith.mulf %328, %338 : vector<17x64xf32>
    %c1_154 = arith.constant 1 : index
    %c0_155 = arith.constant 0 : index
    %c0_156 = arith.constant 0 : index
    %340 = vector.load %arg14[%c1_154, %c0_155, %c0_156] : memref<2x64x32xf32, #tpu.memory_space<vmem>>, vector<1x64x32xf32>
    %341 = vector.shape_cast %340 : vector<1x64x32xf32> to vector<64x32xf32>
    %cst_157 = arith.constant dense<0.000000e+00> : vector<17x32xf32>
    %342 = tpu.matmul %339, %341, %cst_157 {dimension_numbers = #tpu.dot_dimension_numbers<[1], [0], [0], [1], [0, 0, 1, 1], [], []>} : vector<17x64xf32>, vector<64x32xf32>, vector<17x32xf32> -> vector<17x32xf32>
    %343 = arith.addf %295, %342 : vector<17x32xf32>
    %c1_158 = arith.constant 1 : index
    %c0_159 = arith.constant 0 : index
    %c0_160 = arith.constant 0 : index
    %344 = vector.load %arg15[%c1_158, %c0_159, %c0_160] : memref<2x1x32xf32, #tpu.memory_space<vmem>>, vector<1x1x32xf32>
    %345 = vector.shape_cast %344 : vector<1x1x32xf32> to vector<1x32xf32>
    %346 = vector.broadcast %345 : vector<1x32xf32> to vector<17x32xf32>
    %347 = arith.addf %343, %346 : vector<17x32xf32>
    %c0_161 = arith.constant 0 : index
    %c0_162 = arith.constant 0 : index
    %348 = vector.load %arg16[%c0_161, %c0_162] : memref<1x32xf32, #tpu.memory_space<vmem>>, vector<1x32xf32>
    %c0_163 = arith.constant 0 : index
    %c0_164 = arith.constant 0 : index
    %349 = vector.load %arg17[%c0_163, %c0_164] : memref<1x32xf32, #tpu.memory_space<vmem>>, vector<1x32xf32>
    %cst_165 = arith.constant dense<0.000000e+00> : vector<17xf32>
    %350 = vector.multi_reduction <add>, %347, %cst_165 [1] : vector<17x32xf32> to vector<17xf32>
    %351 = vector.shape_cast %350 : vector<17xf32> to vector<17x1xf32>
    %cst_166 = arith.constant 3.200000e+01 : f32
    %352 = vector.broadcast %cst_166 : f32 to vector<17x1xf32>
    %353 = arith.divf %351, %352 : vector<17x1xf32>
    %354 = vector.broadcast %353 : vector<17x1xf32> to vector<17x32xf32>
    %355 = arith.subf %347, %354 : vector<17x32xf32>
    %356 = arith.mulf %355, %355 : vector<17x32xf32>
    %cst_167 = arith.constant dense<0.000000e+00> : vector<17xf32>
    %357 = vector.multi_reduction <add>, %356, %cst_167 [1] : vector<17x32xf32> to vector<17xf32>
    %358 = vector.shape_cast %357 : vector<17xf32> to vector<17x1xf32>
    %cst_168 = arith.constant 3.200000e+01 : f32
    %359 = vector.broadcast %cst_168 : f32 to vector<17x1xf32>
    %360 = arith.divf %358, %359 : vector<17x1xf32>
    %cst_169 = arith.constant 9.99999996E-13 : f32
    %361 = vector.broadcast %cst_169 : f32 to vector<17x1xf32>
    %362 = arith.addf %360, %361 : vector<17x1xf32>
    %363 = math.rsqrt %362 : vector<17x1xf32>
    %364 = vector.broadcast %363 : vector<17x1xf32> to vector<17x32xf32>
    %365 = arith.mulf %355, %364 : vector<17x32xf32>
    %366 = vector.broadcast %348 : vector<1x32xf32> to vector<17x32xf32>
    %367 = arith.mulf %365, %366 : vector<17x32xf32>
    %368 = vector.broadcast %349 : vector<1x32xf32> to vector<17x32xf32>
    %369 = arith.addf %367, %368 : vector<17x32xf32>
    %c0_170 = arith.constant 0 : index
    %c0_171 = arith.constant 0 : index
    %370 = vector.load %arg18[%c0_170, %c0_171] : memref<32x48xf32, #tpu.memory_space<vmem>>, vector<32x48xf32>
    %cst_172 = arith.constant dense<0.000000e+00> : vector<17x48xf32>
    %371 = tpu.matmul %369, %370, %cst_172 {dimension_numbers = #tpu.dot_dimension_numbers<[1], [0], [0], [1], [0, 0, 1, 1], [], []>} : vector<17x32xf32>, vector<32x48xf32>, vector<17x48xf32> -> vector<17x48xf32>
    %c0_173 = arith.constant 0 : index
    %c0_174 = arith.constant 0 : index
    %372 = vector.load %arg19[%c0_173, %c0_174] : memref<1x48xf32, #tpu.memory_space<vmem>>, vector<1x48xf32>
    %373 = vector.broadcast %372 : vector<1x48xf32> to vector<17x48xf32>
    %374 = arith.addf %371, %373 : vector<17x48xf32>
    %c0_175 = arith.constant 0 : index
    %c0_176 = arith.constant 0 : index
    %c0_177 = arith.constant 0 : index
    %375 = vector.load %arg20[%c0_175, %c0_176, %c0_177] : memref<1x17x48xf32, #tpu.memory_space<vmem>>, vector<1x17x48xf32>
    %376 = vector.shape_cast %375 : vector<1x17x48xf32> to vector<17x48xf32>
    %377 = vector.shape_cast %374 : vector<17x48xf32> to vector<1x17x48xf32>
    tpu.vector_store %arg20[%c0_175, %c0_176, %c0_177], %377 {strides = array<i32>} : memref<1x17x48xf32, #tpu.memory_space<vmem>>, vector<1x17x48xf32>,
    return
  }
  func.func @transform_0(%arg0: i32) -> (i32, i32, i32) {
    %c0_i32 = arith.constant 0 : i32
    %c0_i32_0 = arith.constant 0 : i32
    %c0_i32_1 = arith.constant 0 : i32
    return %arg0, %c0_i32, %c0_i32_0 : i32, i32, i32
  }
  func.func @transform_1(%arg0: i32) -> (i32, i32) {
    %c0_i32 = arith.constant 0 : i32
    %c0_i32_0 = arith.constant 0 : i32
    %c0_i32_1 = arith.constant 0 : i32
    return %c0_i32, %c0_i32_0 : i32, i32
  }
  func.func @transform_2(%arg0: i32) -> (i32, i32) {
    %c0_i32 = arith.constant 0 : i32
    %c0_i32_0 = arith.constant 0 : i32
    %c0_i32_1 = arith.constant 0 : i32
    return %c0_i32, %c0_i32_0 : i32, i32
  }
  func.func @transform_3(%arg0: i32) -> (i32, i32, i32) {
    %c0_i32 = arith.constant 0 : i32
    %c0_i32_0 = arith.constant 0 : i32
    %c0_i32_1 = arith.constant 0 : i32
    %c0_i32_2 = arith.constant 0 : i32
    return %c0_i32, %c0_i32_0, %c0_i32_1 : i32, i32, i32
  }
  func.func @transform_4(%arg0: i32) -> (i32, i32, i32) {
    %c0_i32 = arith.constant 0 : i32
    %c0_i32_0 = arith.constant 0 : i32
    %c0_i32_1 = arith.constant 0 : i32
    %c0_i32_2 = arith.constant 0 : i32
    return %c0_i32, %c0_i32_0, %c0_i32_1 : i32, i32, i32
  }
  func.func @transform_5(%arg0: i32) -> (i32, i32, i32) {
    %c0_i32 = arith.constant 0 : i32
    %c0_i32_0 = arith.constant 0 : i32
    %c0_i32_1 = arith.constant 0 : i32
    %c0_i32_2 = arith.constant 0 : i32
    return %c0_i32, %c0_i32_0, %c0_i32_1 : i32, i32, i32
  }
  func.func @transform_6(%arg0: i32) -> (i32, i32, i32) {
    %c0_i32 = arith.constant 0 : i32
    %c0_i32_0 = arith.constant 0 : i32
    %c0_i32_1 = arith.constant 0 : i32
    %c0_i32_2 = arith.constant 0 : i32
    return %c0_i32, %c0_i32_0, %c0_i32_1 : i32, i32, i32
  }
  func.func @transform_7(%arg0: i32) -> (i32, i32, i32) {
    %c0_i32 = arith.constant 0 : i32
    %c0_i32_0 = arith.constant 0 : i32
    %c0_i32_1 = arith.constant 0 : i32
    %c0_i32_2 = arith.constant 0 : i32
    return %c0_i32, %c0_i32_0, %c0_i32_1 : i32, i32, i32
  }
  func.func @transform_8(%arg0: i32) -> (i32, i32, i32) {
    %c0_i32 = arith.constant 0 : i32
    %c0_i32_0 = arith.constant 0 : i32
    %c0_i32_1 = arith.constant 0 : i32
    %c0_i32_2 = arith.constant 0 : i32
    return %c0_i32, %c0_i32_0, %c0_i32_1 : i32, i32, i32
  }
  func.func @transform_9(%arg0: i32) -> (i32, i32, i32) {
    %c0_i32 = arith.constant 0 : i32
    %c0_i32_0 = arith.constant 0 : i32
    %c0_i32_1 = arith.constant 0 : i32
    %c0_i32_2 = arith.constant 0 : i32
    return %c0_i32, %c0_i32_0, %c0_i32_1 : i32, i32, i32
  }
  func.func @transform_10(%arg0: i32) -> (i32, i32, i32) {
    %c0_i32 = arith.constant 0 : i32
    %c0_i32_0 = arith.constant 0 : i32
    %c0_i32_1 = arith.constant 0 : i32
    %c0_i32_2 = arith.constant 0 : i32
    return %c0_i32, %c0_i32_0, %c0_i32_1 : i32, i32, i32
  }
  func.func @transform_11(%arg0: i32) -> (i32, i32, i32) {
    %c0_i32 = arith.constant 0 : i32
    %c0_i32_0 = arith.constant 0 : i32
    %c0_i32_1 = arith.constant 0 : i32
    %c0_i32_2 = arith.constant 0 : i32
    return %c0_i32, %c0_i32_0, %c0_i32_1 : i32, i32, i32
  }
  func.func @transform_12(%arg0: i32) -> (i32, i32, i32) {
    %c0_i32 = arith.constant 0 : i32
    %c0_i32_0 = arith.constant 0 : i32
    %c0_i32_1 = arith.constant 0 : i32
    %c0_i32_2 = arith.constant 0 : i32
    return %c0_i32, %c0_i32_0, %c0_i32_1 : i32, i32, i32
  }
  func.func @transform_13(%arg0: i32) -> (i32, i32, i32) {
    %c0_i32 = arith.constant 0 : i32
    %c0_i32_0 = arith.constant 0 : i32
    %c0_i32_1 = arith.constant 0 : i32
    %c0_i32_2 = arith.constant 0 : i32
    return %c0_i32, %c0_i32_0, %c0_i32_1 : i32, i32, i32
  }
  func.func @transform_14(%arg0: i32) -> (i32, i32, i32) {
    %c0_i32 = arith.constant 0 : i32
    %c0_i32_0 = arith.constant 0 : i32
    %c0_i32_1 = arith.constant 0 : i32
    %c0_i32_2 = arith.constant 0 : i32
    return %c0_i32, %c0_i32_0, %c0_i32_1 : i32, i32, i32
  }
  func.func @transform_15(%arg0: i32) -> (i32, i32) {
    %c0_i32 = arith.constant 0 : i32
    %c0_i32_0 = arith.constant 0 : i32
    %c0_i32_1 = arith.constant 0 : i32
    return %c0_i32, %c0_i32_0 : i32, i32
  }
  func.func @transform_16(%arg0: i32) -> (i32, i32) {
    %c0_i32 = arith.constant 0 : i32
    %c0_i32_0 = arith.constant 0 : i32
    %c0_i32_1 = arith.constant 0 : i32
    return %c0_i32, %c0_i32_0 : i32, i32
  }
  func.func @transform_17(%arg0: i32) -> (i32, i32) {
    %c0_i32 = arith.constant 0 : i32
    %c0_i32_0 = arith.constant 0 : i32
    %c0_i32_1 = arith.constant 0 : i32
    return %c0_i32, %c0_i32_0 : i32, i32
  }
  func.func @transform_18(%arg0: i32) -> (i32, i32) {
    %c0_i32 = arith.constant 0 : i32
    %c0_i32_0 = arith.constant 0 : i32
    %c0_i32_1 = arith.constant 0 : i32
    return %c0_i32, %c0_i32_0 : i32, i32
  }
  func.func @transform_19(%arg0: i32) -> (i32, i32, i32) {
    %c0_i32 = arith.constant 0 : i32
    %c0_i32_0 = arith.constant 0 : i32
    %c0_i32_1 = arith.constant 0 : i32
    return %arg0, %c0_i32, %c0_i32_0 : i32, i32, i32
  }
}

</mosaic_0001>

<bundles_post_ra>
// kernel: masked_autoencoder_forward.1
= control target key start
LH: loop header
LB: loop body
LE: loop exit
PB: predicated region body
PF: predicated region fallthrough
CT: control target
= control target key end

     0   :  { %s6772_s0 = inlined_call_operand.vmem [shape: f32[2,17,48], index: 0, kind: input, shape index: {}]   ;;  %s6773_s1 = inlined_call_operand.vmem [shape: f32[17,32], index: 1, kind: input, shape index: {}]   ;;  %s6774_s2 = inlined_call_operand.vmem [shape: f32[48,32], index: 2, kind: input, shape index: {}]   ;;  %s6775_s3 = inlined_call_operand.vmem [shape: f32[2,1,32], index: 3, kind: input, shape index: {}]   ;;  %s6776_s4 = inlined_call_operand.vmem [shape: f32[2,1,32], index: 4, kind: input, shape index: {}]   ;;  %s6777_s5 = inlined_call_operand.vmem [shape: f32[2,32,96], index: 5, kind: input, shape index: {}]   ;;  %s6778_s6 = inlined_call_operand.vmem [shape: f32[2,1,96], index: 6, kind: input, shape index: {}]   ;;  %s6779_s7 = inlined_call_operand.vmem [shape: f32[2,32,32], index: 7, kind: input, shape index: {}]   ;;  %s6780_s8 = inlined_call_operand.vmem [shape: f32[2,1,32], index: 8, kind: input, shape index: {}]   ;;  %s6781_s9 = inlined_call_operand.vmem [shape: f32[2,1,32], index: 9, kind: input, shape index: {}]   ;;  %s6782_s10 = inlined_call_operand.vmem [shape: f32[2,1,32], index: 10, kind: input, shape index: {}]   ;;  %s6783_s11 = inlined_call_operand.vmem [shape: f32[2,32,64], index: 11, kind: input, shape index: {}]   ;;  %s6784_s12 = inlined_call_operand.vmem [shape: f32[2,1,64], index: 12, kind: input, shape index: {}]   ;;  %s6785_s13 = inlined_call_operand.vmem [shape: f32[2,64,32], index: 13, kind: input, shape index: {}]   ;;  %s6786_s14 = inlined_call_operand.vmem [shape: f32[2,1,32], index: 14, kind: input, shape index: {}]   ;;  %s6787_s15 = inlined_call_operand.vmem [shape: f32[1,32], index: 15, kind: input, shape index: {}]   ;;  %s6788_s16 = inlined_call_operand.vmem [shape: f32[1,32], index: 16, kind: input, shape index: {}]   ;;  %s6789_s17 = inlined_call_operand.vmem [shape: f32[32,48], index: 17, kind: input, shape index: {}]   ;;  %s6790_s18 = inlined_call_operand.vmem [shape: f32[1,48], index: 18, kind: input, shape index: {}]   ;;  %s6791_s19 = inlined_call_operand.vmem [shape: f32[2,17,48], index: 19, kind: output, shape index: {}]  }
   0x1   :  { %6814 = sst [smem:[#allocation2_spill]] %s6772_s0  ;;  %s5861_s0 = smov 0  }
   0x2   :  { %6815 = sst [smem:[#allocation3_spill]] %s6773_s1 }
   0x3   :  { %6816 = sst [smem:[#allocation4_spill]] %s6774_s2 }
   0x4   :  { %6817 = sst [smem:[#allocation5_spill]] %s6775_s3 }
   0x5 LB: > { %s4517_s30 = sadd.s32 4294967295, %s5745_s0   ;;  %p4521_p0 = scmp.ge.s32.totalorder %s5745_s0, 1  ;;  %s5745_s0 = sphi %s5861_s0, %s29_s0  }
   0x6   : > { %p537_p1 = scmp.lt.s32.totalorder %s5745_s0, 3 }
   0x8   : > { %p538_p2 = pnand %p4521_p0, %p537_p1 }
   0x9   : > { %s6818_s1 = sld [smem:[#allocation4_spill]] (!%p538_p2)  ;;  %v5747_v3 = vmov (!%p538_p2), 0.0|0.0   ;;  %vm5748_vm0 = vmmov (!%p538_p2), 0   ;;  %v5749_v6 = vmov (!%p538_p2), 0.0   ;;  %p593_p3 = scmp.lt.s32.totalorder (!%p538_p2), %s4517_s30, 1  ;;  %vm615_vm1 = vcmask (!%p538_p2), 392192  }
   0xa   : > { %541 = sbr.rel (%p538_p2) target bundleno = 8207 (0x200f), region = 96  ;;  %5379 = vmatprep.subr.bf16.mxu0 (!%p538_p2), %v5747_v3  ;;  %4907 = vmatprep.mubr.msk.f32.mxu0 (!%p538_p2), %vm5748_vm0, %v5749_v6  ;;  %s6819_s2 = sld [smem:[#allocation2_spill]] (!%p538_p2)  ;;  %vm707_vm2 = vcmask (!%p538_p2), 261120   ;;  %vm714_vm3 = vcmask (!%p538_p2), 253952   ;;  %v767_v44 = vld [vmem:[%s6777_s5] sm:$0xff] (!%p538_p2)  ;;  %v768_v45 = vld [vmem:[%s6777_s5 + $0x8] sm:$0xff] (!%p538_p2) }
   0xb   : > { %5388 = vmatprep.subr.bf16.mxu1 (!%p538_p2), %v5747_v3  ;;  %4924 = vmatprep.mubr.msk.f32.mxu1 (!%p538_p2), %vm5748_vm0, %v5749_v6  ;;  %s6820_s3 = sld [smem:[#allocation3_spill]] (!%p538_p2)  ;;  %v5389_v46 = vpack.c.bf16 (!%p538_p2), %v768_v45, %v767_v44  ;;  %v769_v47 = vld [vmem:[%s6777_s5 + $0x10] sm:$0xff] (!%p538_p2)  ;;  %v770_v48 = vld [vmem:[%s6777_s5 + $0x18] sm:$0xff] (!%p538_p2)  ;;  %s6821_s21 = sld [smem:[#allocation5_spill]] (!%p538_p2)  ;;  %v4528_v62 = vld [vmem:[%s6776_s4] ss:$0 sm:$0xff] (!%p538_p2) }
   0xc   : > { %v5392_v49 = vpack.c.bf16 (!%p538_p2), %v770_v48, %v769_v47  ;;  %s5750_s25 = smov (!%p538_p2), 96   ;;  %s6812_s26 = smov (!%p538_p2), 120   ;;  %vm880_vm4 = vcmask (!%p538_p2), 64512   ;;  %vm976_vm6 = vcmask (!%p538_p2), 138240   ;;  %vm983_vm7 = vcmask (!%p538_p2), 131072  }
   0xd   : > { %5390 = vmatpush3.bf16.msra.mxu1 (!%p538_p2), %v5389_v46  ;;  %s5752_s27 = smov (!%p538_p2), 88   ;;  %vm5998_vm5 = vmpackc.low (!%p538_p2), %vm880_vm4, %vm880_vm4  ;;  %s6810_s28 = smov (!%p538_p2), 64   ;;  %vm1028_vm8 = vcmask (!%p538_p2), 1040384   ;;  %vm2397_vm9 = vcmask (!%p538_p2), 523264   ;;  %vm4460_vm10 = vcmask (!%p538_p2), 385024  }
   0xe   : > { %5391 = vmatprep.subr.bf16.mxu1 (!%p538_p2), %v5747_v3  ;;  %s6808_s29 = smov (!%p538_p2), 56   ;;  %s6806_s22 = smov (!%p538_p2), 80  }
   0xf   : > { %v606_v0 = vld [vmem:[%s6818_s1] sm:$0xff] (!%p538_p2)  ;;  %v607_v1 = vld [vmem:[%s6818_s1 + $0x8] sm:$0xff] (!%p538_p2)  ;;  %v608_v2 = vld [vmem:[%s6818_s1 + $0x10] sm:$0xff] (!%p538_p2)  ;;  %s6827_s24 = smov (!%p538_p2), 80  }
  0x10   : > { %v5380_v4 = vpack.c.bf16 (!%p538_p2), %v607_v1, %v606_v0  ;;  %v609_v5 = vld [vmem:[%s6818_s1 + $0x18] sm:$0xff] (!%p538_p2)  ;;  %v610_v8 = vld [vmem:[%s6818_s1 + $0x20] sm:$0xff] (!%p538_p2)  ;;  %v611_v9 = vld [vmem:[%s6818_s1 + $0x28] sm:$0xff] (!%p538_p2) }
  0x11   : > { %v5383_v7 = vpack.c.bf16 %v609_v5, %v608_v2  ;;  %s6835_s30 = smov (!%p593_p3, %s4517_s30), 1  ;;  %v5386_v10 = vpack.c.bf16 %v611_v9, %v610_v8  ;;  %v612_v14 = vld [vmem:[%s6820_s3] sm:$0xff]  ;;  %v613_v18 = vld [vmem:[%s6820_s3 + $0x8] sm:$0xff]  ;;  %v614_v23 = vld [vmem:[%s6820_s3 + $0x10] sm:$0x1]  ;;  %5393 = vmatpush3.bf16.msra.mxu1 %v5392_v49 }
  0x12   : > { %5381 = vmatpush3.bf16.msra.mxu0 %v5380_v4  ;;  %s6795_s20 = smul.u32 24, %s6835_s30  ;;  %5394 = vmatprep.subr.bf16.mxu1 %v5747_v3  ;;  %v4527_v60 = vld [vmem:[%s6821_s21] ss:$0 sm:$0xff] }
  0x13   : > { %5382 = vmatprep.subr.bf16.mxu0 %v5747_v3 }
  0x14   : > { %s597_s23 = scalar_lea.vmem %s6819_s2, %s6795_s20  ;;  %s6796_s2 = smov 112  }
  0x15   : > { %v603_v11 = vld [vmem:[%s597_s23] sm:$0xff]  ;;  %v604_v12 = vld [vmem:[%s597_s23 + $0x8] sm:$0xff]  ;;  %v605_v13 = vld [vmem:[%s597_s23 + $0x10] sm:$0x1]  ;;  %s6804_s20 = smov 48   ;;  %s6798_s23 = smov 104  }
  0x16   : > { %5384 = vmatpush3.bf16.msra.mxu0 %v5383_v7 }
  0x17   : > { %5385 = vmatprep.subr.bf16.mxu0 %v5747_v3 }
  0x1a   : > { %5387 = vmatpush3.bf16.msra.mxu0 %v5386_v10 }
  0x1b   : > { %5398 = vmatprep.subr.bf16.mxu0 %v5747_v3 }
  0x1d   : > { %4908 = vmatmul.mubr.msk.f32.vlgmr.msra.gmra.mrb[0].mxu0 %vm615_vm1, %v603_v11 }
  0x1e   : > { %4910 = vmatprep.mubr.msk.f32.mxu0 %vm5748_vm0, %v5749_v6 }
  0x21   : > { %4911 = vmatmul.mubr.msk.f32.gmra.mrb[2].mxu0 %vm615_vm1, %v604_v12 }
  0x22   : > { %4913 = vmatprep.mubr.msk.f32.mxu0 %vm5748_vm0, %v5749_v6 }
  0x25   : > { %4914 = vmatmul.mubr.msk.f32.gmra.mrb[4].mxu0 %vm615_vm1, %v605_v13  ;;  %v4529_v13 = vld [vmem:[%s6778_s6] ss:$0 sm:$0xff] }
  0x26   : > { %4954 = vmatprep.mubr.msk.f32.mxu0 %vm5748_vm0, %v5749_v6 }
  0xf0   : > { %v691_v15 = vpop.f32.mrb[0].mxu0 }
  0xf1   : > { %v5916_v16 = vadd.f32 %v691_v15, %v612_v14  ;;  %v4909_v17 = vpop.f32.mrb[1].mxu0 }
  0xf3   : > { %v708_v19 = vsel %vm707_vm2, %v5916_v16, 0.0 }
  0xf4   : > { %709 = vadd.xlane.f32.xlu0 %v708_v19  ;;  %v696_v20 = vpop.f32.mrb[2].mxu0 }
  0xf5   : > { %v5923_v21 = vadd.f32 %v696_v20, %v613_v18  ;;  %v4912_v22 = vpop.f32.mrb[3].mxu0 }
  0xf7   : > { %v711_v24 = vsel %vm707_vm2, %v5923_v21, 0.0 }
  0xf8   : > { %712 = vadd.xlane.f32.xlu0 %v711_v24  ;;  %v701_v25 = vpop.f32.mrb[4].mxu0 }
  0xf9   : > { %v5930_v26 = vadd.f32 %v701_v25, %v614_v23  ;;  %v4915_v27 = vpop.f32.mrb[5].mxu0 }
  0xfb   : > { %v715_v28 = vsel %vm714_vm3, %v5930_v26, 0.0 }
  0xfc   : > { %716 = vadd.xlane.f32.xlu1 %v715_v28 }
 0x181   : > { %v710_v29 = vpop.xlane.xlu0 %709 }
 0x182   : > { %v719_v30 = vmul.f32 0.03125, %v710_v29 }
 0x184   : > { %v722_v31 = vsub.f32 %v5916_v16, %v719_v30 }
 0x185   : > { %v713_v32 = vpop.xlane.xlu0 %712 }
 0x186   : > { %v720_v33 = vmul.f32 0.03125, %v713_v32  ;;  %v725_v34 = vmul.f32 %v722_v31, %v722_v31 }
 0x188   : > { %v723_v35 = vsub.f32 %v5923_v21, %v720_v33  ;;  %v728_v36 = vsel %vm707_vm2, %v725_v34, 0.0 }
 0x189   : > { %729 = vadd.xlane.f32.xlu1 %v728_v36  ;;  %v717_v37 = vpop.xlane.xlu1 %716 }
 0x18a   : > { %v721_v38 = vmul.f32 0.03125, %v717_v37  ;;  %v726_v39 = vmul.f32 %v723_v35, %v723_v35 }
 0x18c   : > { %v724_v40 = vsub.f32 %v5930_v26, %v721_v38  ;;  %v731_v41 = vsel %vm707_vm2, %v726_v39, 0.0 }
 0x18d   : > { %732 = vadd.xlane.f32.xlu0 %v731_v41 }
 0x18e   : > { %v727_v42 = vmul.f32 %v724_v40, %v724_v40 }
 0x190   : > { %v734_v43 = vsel %vm714_vm3, %v727_v42, 0.0 }
 0x191   : > { %735 = vadd.xlane.f32.xlu1 %v734_v43 }
 0x216   : > { %v730_v50 = vpop.xlane.xlu1 %729 }
 0x217   : > { %v737_v51 = vmul.f32 0.03125, %v730_v50 }
 0x219   : > { %v740_v52 = vadd.f32 1e-12, %v737_v51 }
 0x21a   : > { %v733_v53 = vpop.xlane.xlu0 %732 }
 0x21b   : > { %5601 = vrsqrt.f32 %v740_v52  ;;  %v738_v54 = vmul.f32 0.03125, %v733_v53 }
 0x21d   : > { %v741_v55 = vadd.f32 1e-12, %v738_v54 }
 0x21e   : > { %v736_v56 = vpop.xlane.xlu1 %735 }
 0x21f   : > { %5603 = vrsqrt.f32 %v741_v55  ;;  %v739_v57 = vmul.f32 0.03125, %v736_v56 }
 0x221   : > { %v742_v58 = vadd.f32 1e-12, %v739_v57 }
 0x223   : > { %5605 = vrsqrt.f32 %v742_v58 }
 0x225   : > { %v5602_v59 = vpop.eup %5601 }
 0x226   : > { %v746_v61 = vmul.f32 %v5602_v59, %v722_v31 }
 0x228   : > { %v755_v63 = vmul.f32 %v4527_v60, %v746_v61 }
 0x229   : > { %v5604_v0 = vpop.eup %5603 }
 0x22a   : > { %v764_v1 = vadd.f32 %v4528_v62, %v755_v63  ;;  %v747_v2 = vmul.f32 %v5604_v0, %v723_v35 }
 0x22c   : > { %4925 = vmatmul.mubr.msk.f32.vlgmr.msra.gmra.mrb[0].mxu1 %vm707_vm2, %v764_v1  ;;  %v756_v4 = vmul.f32 %v4527_v60, %v747_v2 }
 0x22d   : > { %v5606_v5 = vpop.eup %5605  ;;  %4927 = vmatprep.mubr.msk.f32.mxu1 %vm5748_vm0, %v5749_v6 }
 0x22e   : > { %v765_v7 = vadd.f32 %v4528_v62, %v756_v4  ;;  %v748_v8 = vmul.f32 %v5606_v5, %v724_v40 }
 0x230   : > { %4928 = vmatmul.mubr.msk.f32.gmra.mrb[2].mxu1 %vm707_vm2, %v765_v7  ;;  %v757_v9 = vmul.f32 %v4527_v60, %v748_v8 }
 0x231   : > { %4930 = vmatprep.mubr.msk.f32.mxu1 %vm5748_vm0, %v5749_v6 }
 0x232   : > { %v766_v10 = vadd.f32 %v4528_v62, %v757_v9 }
 0x234   : > { %4931 = vmatmul.mubr.msk.f32.gmra.mrb[4].mxu1 %vm707_vm2, %v766_v10 }
 0x235   : > { %4939 = vmatprep.mubr.msk.f32.mxu1 %vm5748_vm0, %v5749_v6 }
 0x2ff   : > { %v853_v11 = vpop.f32.mrb[0].mxu1 }
 0x300   : > { %v4926_v12 = vpop.f32.mrb[1].mxu1  ;;  %v5972_v15 = vadd.f32 %v4529_v13, %v853_v11 }
 0x303   : > { %v858_v14 = vpop.f32.mrb[2].mxu1 }
 0x304   : > { %v5974_v17 = vadd.f32 %v4529_v13, %v858_v14  ;;  %v4929_v18 = vpop.f32.mrb[3].mxu1 }
 0x306   : > { %v5978_v19 = vpack.i.bf16 %v5974_v17, %v5972_v15 }
 0x307   : > { %v863_v20 = vpop.f32.mrb[4].mxu1 }
 0x308   : > { %v5980_v22 = vadd.f32 %v4529_v13, %v863_v20  ;;  %5522 = vrot.lane.b32.xlu0 %v5978_v19, %s5750_s25  ;;  %v4932_v23 = vpop.f32.mrb[5].mxu1 }
 0x30a   : > { %878 = vrot.lane.b32.xlu1 %v5980_v22, %s5750_s25 }
 0x30c   : > { %1111 = vrot.lane.b32.xlu0 %v5972_v15, %s6812_s26 }
 0x30e   : > { %5527 = vrot.lane.b32.xlu1 %v5978_v19, %s5752_s27 }
 0x310   : > { %1115 = vrot.lane.b32.xlu0 %v5980_v22, %s6812_s26 }
 0x312   : > { %1121 = vrot.lane.b32.xlu1 %v5980_v22, %s5752_s27 }
 0x316   : > { %1113 = vrot.lane.b32.xlu1 %v5974_v17, %s6812_s26  ;;  %s6833_s26 = smul.u32 24, %s6835_s30 }
 0x37a   : > { %v5523_v24 = vpop.permute.xlu0 %5522 }
 0x37b   : > { %v5525_v25 = vunpack.i.h.bf16 %v5523_v24  ;;  %v5524_v27 = vunpack.i.l.bf16 %v5523_v24 }
 0x37c   : > { %v879_v28 = vpop.permute.xlu1 %878 }
 0x37d   : > { %v5395_v30 = vpack.c.bf16 %v5525_v25, %v5524_v27 }
 0x37e   : > { %v1112_v36 = vpop.permute.xlu0 %1111 }
 0x37f   : > { %5397 = vmatpush3.bf16.xpose.msk.msra.mxu1 %vm5998_vm5, %v5395_v30 }
 0x380   : > { %4937 = vmatprep.subr.mxu1 %v5749_v6  ;;  %v5528_v31 = vpop.permute.xlu1 %5527 }
 0x381   : > { %v5530_v32 = vunpack.i.h.bf16 %v5528_v31  ;;  %v5529_v33 = vunpack.i.l.bf16 %v5528_v31 }
 0x382   : > { %v1116_v38 = vpop.permute.xlu0 %1115 }
 0x383   : > { %v5402_v34 = vpack.c.bf16 %v5530_v32, %v5529_v33 }
 0x384   : > { %v1122_v35 = vpop.permute.xlu1 %1121 }
 0x387   : > { %4938 = vmatpush3.xpose.msk.msra.mxu1 %vm880_vm4, %v879_v28 }
 0x388   : > { %5401 = vmatprep.subr.bf16.mxu1 %v5747_v3  ;;  %v1114_v37 = vpop.permute.xlu1 %1113 }
 0x38a   : > { %4940 = vmatmul.mubr.msk.f32.vlgmr.msra.gmra.mrb[6].mxu1 %vm880_vm4, %v5972_v15 }
 0x38b   : > { %5404 = vmatpush3.bf16.xpose.msk.msra.mxu1 %vm5998_vm5, %v5402_v34  ;;  %4942 = vmatprep.mubr.msk.f32.mxu1 %vm5748_vm0, %v5749_v6 }
 0x38c   : > { %4967 = vmatprep.subr.mxu1 %v5749_v6 }
 0x38e   : > { %4943 = vmatmul.mubr.msk.f32.gmra.mrb[8].mxu1 %vm880_vm4, %v5974_v17 }
 0x38f   : > { %4945 = vmatprep.mubr.msk.f32.mxu1 %vm5748_vm0, %v5749_v6 }
 0x392   : > { %4946 = vmatmul.mubr.msk.f32.gmra.mrb[10].mxu1 %vm880_vm4, %v5980_v22 }
 0x393   : > { %4968 = vmatpush3.xpose.msk.msra.mxu1 %vm880_vm4, %v1122_v35  ;;  %4969 = vmatprep.mubr.msk.f32.mxu1 %vm5748_vm0, %v5749_v6 }
 0x394   : > { %4993 = vmatprep.subr.mxu1 %v5749_v6 }
 0x396   : > { %4970 = vmatmul.mubr.msk.f32.vlgmr.msra.gmra.mrb[12].mxu1 %vm880_vm4, %v1112_v36 }
 0x397   : > { %4972 = vmatprep.mubr.msk.f32.mxu1 %vm5748_vm0, %v5749_v6 }
 0x39a   : > { %4973 = vmatmul.mubr.msk.f32.gmra.mrb[14].mxu1 %vm880_vm4, %v1114_v37 }
 0x39b   : > { %4975 = vmatprep.mubr.msk.f32.mxu1 %vm5748_vm0, %v5749_v6 }
 0x39e   : > { %4976 = vmatmul.mubr.msk.f32.gmra.mrb[16].mxu1 %vm880_vm4, %v1116_v38 }
 0x39f   : > { %4995 = vmatprep.mubr.msk.f32.mxu1 %vm5748_vm0, %v5749_v6 }
 0x45d   : > { %v959_v39 = vpop.f32.mrb[6].mxu1 }
 0x45e   : > { %v973_v40 = vmul.f32 0.35355338, %v959_v39  ;;  %v4941_v41 = vpop.f32.mrb[7].mxu1 }
 0x460   : > { %v977_v42 = vsel %vm976_vm6, %v973_v40, -inf }
 0x461   : > { %978 = vmax.xlane.f32.xlu1 %v977_v42  ;;  %v964_v43 = vpop.f32.mrb[8].mxu1 }
 0x462   : > { %v974_v44 = vmul.f32 0.35355338, %v964_v43  ;;  %v4944_v45 = vpop.f32.mrb[9].mxu1 }
 0x464   : > { %v980_v46 = vsel %vm976_vm6, %v974_v44, -inf }
 0x465   : > { %981 = vmax.xlane.f32.xlu0 %v980_v46  ;;  %v969_v47 = vpop.f32.mrb[10].mxu1 }
 0x466   : > { %v975_v48 = vmul.f32 0.35355338, %v969_v47  ;;  %v4947_v49 = vpop.f32.mrb[11].mxu1 }
 0x468   : > { %v984_v50 = vsel %vm983_vm7, %v975_v48, -inf }
 0x469   : > { %985 = vmax.xlane.f32.xlu0 %v984_v50  ;;  %v1201_v51 = vpop.f32.mrb[12].mxu1 }
 0x46a   : > { %v1215_v52 = vmul.f32 0.35355338, %v1201_v51  ;;  %v4971_v53 = vpop.f32.mrb[13].mxu1 }
 0x46c   : > { %v1218_v54 = vsel %vm976_vm6, %v1215_v52, -inf }
 0x46d   : > { %1219 = vmax.xlane.f32.xlu0 %v1218_v54  ;;  %v1206_v55 = vpop.f32.mrb[14].mxu1 }
 0x46e   : > { %v1216_v56 = vmul.f32 0.35355338, %v1206_v55  ;;  %v4974_v57 = vpop.f32.mrb[15].mxu1 }
 0x470   : > { %v1221_v58 = vsel %vm976_vm6, %v1216_v56, -inf }
 0x471   : > { %1222 = vmax.xlane.f32.xlu1 %v1221_v58  ;;  %v1211_v59 = vpop.f32.mrb[16].mxu1 }
 0x472   : > { %v1217_v60 = vmul.f32 0.35355338, %v1211_v59  ;;  %v4977_v61 = vpop.f32.mrb[17].mxu1 }
 0x474   : > { %v1224_v62 = vsel %vm983_vm7, %v1217_v60, -inf }
 0x475   : > { %1225 = vmax.xlane.f32.xlu0 %v1224_v62 }
 0x482   : > { %1015 = vrot.lane.b32.xlu1 %v5980_v22, %s6810_s28 }
 0x48b   : > { %5532 = vrot.lane.b32.xlu0 %v5978_v19, %s6810_s28 }
 0x4ee   : > { %v979_v63 = vpop.xlane.xlu1 %978 }
 0x4ef   : > { %v987_v0 = vsub.f32 %v973_v40, %v979_v63 }
 0x4f1   : > { %v990_v1 = vmul.f32 1.442695, %v987_v0 }
 0x4f2   : > { %v982_v2 = vpop.xlane.xlu0 %981 }
 0x4f3   : > { %5607 = vpow2.f32 %v990_v1  ;;  %v988_v4 = vsub.f32 %v974_v44, %v982_v2 }
 0x4f5   : > { %v992_v5 = vmul.f32 1.442695, %v988_v4  ;;  %v867_v4 = vld [vmem:[%s6779_s7] sm:$0xff] }
 0x4f6   : > { %v986_v7 = vpop.xlane.xlu0 %985 }
 0x4f7   : > { %5609 = vpow2.f32 %v992_v5  ;;  %v989_v8 = vsub.f32 %v975_v48, %v986_v7  ;;  %v868_v5 = vld [vmem:[%s6779_s7 + $0x8] sm:$0xff] }
 0x4f8   : > { %4994 = vmatpush3.msra.mxu1 %v868_v5 }
 0x4f9   : > { %v994_v9 = vmul.f32 1.442695, %v989_v8  ;;  %5408 = vmatprep.subr.bf16.mxu1 %v5747_v3 }
 0x4fa   : > { %v1220_v10 = vpop.xlane.xlu0 %1219 }
 0x4fb   : > { %5611 = vpow2.f32 %v994_v9  ;;  %v1227_v11 = vsub.f32 %v1215_v52, %v1220_v10 }
 0x4fd   : > { %v5608_v12 = vpop.eup %5607  ;;  %v1230_v13 = vmul.f32 1.442695, %v1227_v11 }
 0x4fe   : > { %v1223_v14 = vpop.xlane.xlu1 %1222  ;;  %v996_v18 = vsel %vm976_vm6, %v5608_v12, 0.0 }
 0x4ff   : > { %5613 = vpow2.f32 %v1230_v13  ;;  %v1228_v20 = vsub.f32 %v1216_v56, %v1223_v14  ;;  %997 = vadd.xlane.f32.xlu1 %v996_v18 }
 0x501   : > { %v5610_v23 = vpop.eup %5609  ;;  %v1232_v24 = vmul.f32 1.442695, %v1228_v20 }
 0x502   : > { %v1226_v25 = vpop.xlane.xlu0 %1225  ;;  %v999_v27 = vsel %vm976_vm6, %v5610_v23, 0.0  ;;  %v1016_v40 = vpop.permute.xlu1 %1015 }
 0x503   : > { %5615 = vpow2.f32 %v1232_v24  ;;  %v1229_v28 = vsub.f32 %v1217_v60, %v1226_v25  ;;  %1000 = vadd.xlane.f32.xlu0 %v999_v27 }
 0x505   : > { %v5612_v30 = vpop.eup %5611  ;;  %v1234_v31 = vmul.f32 1.442695, %v1229_v28 }
 0x506   : > { %v5533_v32 = vpop.permute.xlu0 %5532  ;;  %v1002_v33 = vsel %vm983_vm7, %v5612_v30, 0.0 }
 0x507   : > { %5617 = vpow2.f32 %v1234_v31  ;;  %v5535_v34 = vunpack.i.h.bf16 %v5533_v32  ;;  %v5534_v35 = vunpack.i.l.bf16 %v5533_v32  ;;  %1003 = vadd.xlane.f32.xlu1 %v1002_v33 }
 0x509   : > { %v5614_v36 = vpop.eup %5613  ;;  %v5399_v37 = vpack.c.bf16 %v5535_v34, %v5534_v35 }
 0x50a   : > { %v1236_v38 = vsel %vm976_vm6, %v5614_v36, 0.0 }
 0x50b   : > { %1237 = vadd.xlane.f32.xlu0 %v1236_v38  ;;  %5400 = vmatpush3.bf16.msra.mxu0 %v5399_v37 }
 0x50c   : > { %4952 = vmatprep.subr.mxu0 %v5749_v6 }
 0x50d   : > { %v5616_v39 = vpop.eup %5615 }
 0x50e   : > { %v1239_v41 = vsel %vm976_vm6, %v5616_v39, 0.0 }
 0x50f   : > { %1240 = vadd.xlane.f32.xlu1 %v1239_v41  ;;  %4953 = vmatpush3.msk.msra.mxu0 %vm1028_vm8, %v1016_v40 }
 0x510   : > { %5405 = vmatprep.subr.bf16.mxu0 %v5747_v3 }
 0x511   : > { %v5618_v42 = vpop.eup %5617 }
 0x512   : > { %v1242_v43 = vsel %vm983_vm7, %v5618_v42, 0.0 }
 0x513   : > { %1243 = vadd.xlane.f32.xlu1 %v1242_v43 }
 0x521   : > { %1255 = vrot.lane.b32.xlu0 %v5980_v22, %s6808_s29 }
 0x524   : > { %5537 = vrot.lane.b32.xlu1 %v5978_v19, %s6808_s29  ;;  %s6828_s29 = smov 112  }
 0x525   : > { %1538 = vrot.lane.b32.xlu0 %v5980_v22, %s6806_s22 }
 0x528   : > { %5542 = vrot.lane.b32.xlu1 %v5978_v19, %s6806_s22 }
 0x529   : > { %1530 = vrot.lane.b32.xlu0 %v5974_v17, %s6796_s2 }
 0x52c   : > { %1528 = vrot.lane.b32.xlu1 %v5972_v15, %s6796_s2 }
 0x530   : > { %1532 = vrot.lane.b32.xlu1 %v5980_v22, %s6796_s2  ;;  %s6800_s2 = smov 72  }
 0x58c   : > { %v998_v44 = vpop.xlane.xlu1 %997 }
 0x58d   : > { %5619 = vrcp.f32 %v998_v44 }
 0x590   : > { %v1001_v45 = vpop.xlane.xlu0 %1000 }
 0x591   : > { %5621 = vrcp.f32 %v1001_v45 }
 0x594   : > { %v1004_v46 = vpop.xlane.xlu1 %1003 }
 0x595   : > { %5623 = vrcp.f32 %v1004_v46 }
 0x597   : > { %v5620_v47 = vpop.eup %5619 }
 0x598   : > { %v1008_v48 = vmul.f32 %v5620_v47, %v5608_v12  ;;  %v1238_v50 = vpop.xlane.xlu0 %1237 }
 0x599   : > { %5625 = vrcp.f32 %v1238_v50 }
 0x59a   : > { %4955 = vmatmul.mubr.msk.f32.vlgmr.msra.gmra.mrb[6].mxu0 %vm976_vm6, %v1008_v48 }
 0x59b   : > { %v5622_v49 = vpop.eup %5621  ;;  %4957 = vmatprep.mubr.msk.f32.mxu0 %vm5748_vm0, %v5749_v6 }
 0x59c   : > { %v1241_v51 = vpop.xlane.xlu1 %1240  ;;  %v1009_v52 = vmul.f32 %v5622_v49, %v5610_v23  ;;  %v1256_v62 = vpop.permute.xlu0 %1255 }
 0x59d   : > { %5627 = vrcp.f32 %v1241_v51 }
 0x59e   : > { %4958 = vmatmul.mubr.msk.f32.gmra.mrb[8].mxu0 %vm976_vm6, %v1009_v52 }
 0x59f   : > { %v5624_v53 = vpop.eup %5623  ;;  %4960 = vmatprep.mubr.msk.f32.mxu0 %vm5748_vm0, %v5749_v6 }
 0x5a0   : > { %v1244_v54 = vpop.xlane.xlu1 %1243  ;;  %v1010_v55 = vmul.f32 %v5624_v53, %v5612_v30  ;;  %v1539_v30 = vpop.permute.xlu0 %1538 }
 0x5a1   : > { %5629 = vrcp.f32 %v1244_v54 }
 0x5a2   : > { %4961 = vmatmul.mubr.msk.f32.gmra.mrb[10].mxu0 %vm976_vm6, %v1010_v55 }
 0x5a3   : > { %4984 = vmatprep.mubr.msk.f32.mxu0 %vm5748_vm0, %v5749_v6  ;;  %v5626_v60 = vpop.eup %5625 }
 0x5a4   : > { %v5538_v56 = vpop.permute.xlu1 %5537  ;;  %v1248_v61 = vmul.f32 %v5626_v60, %v5614_v36  ;;  %v1531_v33 = vpop.permute.xlu0 %1530 }
 0x5a5   : > { %v5540_v57 = vunpack.i.h.bf16 %v5538_v56  ;;  %v5539_v58 = vunpack.i.l.bf16 %v5538_v56 }
 0x5a7   : > { %v5406_v59 = vpack.c.bf16 %v5540_v57, %v5539_v58  ;;  %v5628_v63 = vpop.eup %5627 }
 0x5a8   : > { %v1249_v0 = vmul.f32 %v5628_v63, %v5616_v39  ;;  %v5543_v13 = vpop.permute.xlu1 %5542 }
 0x5a9   : > { %5407 = vmatpush3.bf16.msra.mxu0 %v5406_v59  ;;  %v5545_v14 = vunpack.i.h.bf16 %v5543_v13  ;;  %v5544_v18 = vunpack.i.l.bf16 %v5543_v13 }
 0x5aa   : > { %4982 = vmatprep.subr.mxu0 %v5749_v6 }
 0x5ab   : > { %v5630_v1 = vpop.eup %5629  ;;  %v5409_v20 = vpack.c.bf16 %v5545_v14, %v5544_v18 }
 0x5ac   : > { %v1250_v2 = vmul.f32 %v5630_v1, %v5618_v42  ;;  %v1529_v32 = vpop.permute.xlu1 %1528 }
 0x5ad   : > { %4983 = vmatpush3.msk.msra.mxu0 %vm1028_vm8, %v1256_v62 }
 0x5ae   : > { %4985 = vmatmul.mubr.msk.f32.vlgmr.msra.gmra.mrb[12].mxu0 %vm976_vm6, %v1248_v61  ;;  %5004 = vmatprep.subr.mxu0 %v5749_v6 }
 0x5af   : > { %4987 = vmatprep.mubr.msk.f32.mxu0 %vm5748_vm0, %v5749_v6  ;;  %5005 = vmatpush3.msra.mxu0 %v867_v4 }
 0x5b0   : > { %5412 = vmatprep.subr.bf16.mxu0 %v5747_v3  ;;  %v1533_v34 = vpop.permute.xlu1 %1532 }
 0x5b2   : > { %4988 = vmatmul.mubr.msk.f32.gmra.mrb[14].mxu0 %vm976_vm6, %v1249_v0 }
 0x5b3   : > { %4990 = vmatprep.mubr.msk.f32.mxu0 %vm5748_vm0, %v5749_v6 }
 0x5b6   : > { %4991 = vmatmul.mubr.msk.f32.gmra.mrb[16].mxu0 %vm976_vm6, %v1250_v2 }
 0x5b7   : > { %5006 = vmatprep.mubr.msk.f32.mxu0 %vm5748_vm0, %v5749_v6 }
 0x66d   : > { %v1097_v7 = vpop.f32.mrb[6].mxu0 }
 0x66e   : > { %v4956_v8 = vpop.f32.mrb[7].mxu0  ;;  %5007 = vmatmul.mubr.msk.f32.vlgmr.msra.gmra.mrb[18].mxu0 %vm880_vm4, %v1097_v7 }
 0x66f   : > { %5009 = vmatprep.mubr.msk.f32.mxu0 %vm5748_vm0, %v5749_v6 }
 0x671   : > { %v1102_v9 = vpop.f32.mrb[8].mxu0 }
 0x672   : > { %v4959_v10 = vpop.f32.mrb[9].mxu0  ;;  %5010 = vmatmul.mubr.msk.f32.gmra.mrb[20].mxu0 %vm880_vm4, %v1102_v9 }
 0x673   : > { %5012 = vmatprep.mubr.msk.f32.mxu0 %vm5748_vm0, %v5749_v6 }
 0x675   : > { %v1107_v11 = vpop.f32.mrb[10].mxu0 }
 0x676   : > { %v4962_v12 = vpop.f32.mrb[11].mxu0  ;;  %5013 = vmatmul.mubr.msk.f32.gmra.mrb[22].mxu0 %vm880_vm4, %v1107_v11 }
 0x677   : > { %5036 = vmatprep.mubr.msk.f32.mxu0 %vm5748_vm0, %v5749_v6 }
 0x681   : > { %v1336_v23 = vpop.f32.mrb[12].mxu0 }
 0x682   : > { %v4986_v24 = vpop.f32.mrb[13].mxu0  ;;  %4996 = vmatmul.mubr.msk.f32.vlgmr.msra.gmra.mrb[18].mxu1 %vm880_vm4, %v1336_v23 }
 0x683   : > { %5411 = vmatpush3.bf16.xpose.msk.msra.mxu1 %vm5998_vm5, %v5409_v20  ;;  %4998 = vmatprep.mubr.msk.f32.mxu1 %vm5748_vm0, %v5749_v6 }
 0x684   : > { %5019 = vmatprep.subr.mxu1 %v5749_v6 }
 0x685   : > { %v1341_v25 = vpop.f32.mrb[14].mxu0 }
 0x686   : > { %v4989_v27 = vpop.f32.mrb[15].mxu0  ;;  %4999 = vmatmul.mubr.msk.f32.gmra.mrb[20].mxu1 %vm880_vm4, %v1341_v25 }
 0x687   : > { %5001 = vmatprep.mubr.msk.f32.mxu1 %vm5748_vm0, %v5749_v6 }
 0x689   : > { %v1346_v28 = vpop.f32.mrb[16].mxu0 }
 0x68a   : > { %v4992_v31 = vpop.f32.mrb[17].mxu0  ;;  %5002 = vmatmul.mubr.msk.f32.gmra.mrb[22].mxu1 %vm880_vm4, %v1346_v28 }
 0x68b   : > { %5020 = vmatpush3.xpose.msk.msra.mxu1 %vm880_vm4, %v1539_v30  ;;  %5021 = vmatprep.mubr.msk.f32.mxu1 %vm5748_vm0, %v5749_v6 }
 0x68c   : > { %5045 = vmatprep.subr.mxu1 %v5749_v6 }
 0x68e   : > { %5022 = vmatmul.mubr.msk.f32.vlgmr.msra.gmra.mrb[24].mxu1 %vm880_vm4, %v1529_v32 }
 0x68f   : > { %5024 = vmatprep.mubr.msk.f32.mxu1 %vm5748_vm0, %v5749_v6 }
 0x692   : > { %5025 = vmatmul.mubr.msk.f32.gmra.mrb[26].mxu1 %vm880_vm4, %v1531_v33 }
 0x693   : > { %5027 = vmatprep.mubr.msk.f32.mxu1 %vm5748_vm0, %v5749_v6 }
 0x696   : > { %5028 = vmatmul.mubr.msk.f32.gmra.mrb[28].mxu1 %vm880_vm4, %v1533_v34 }
 0x697   : > { %5047 = vmatprep.mubr.msk.f32.mxu1 %vm5748_vm0, %v5749_v6 }
 0x741   : > { %v1514_v35 = vpop.f32.mrb[18].mxu0 }
 0x742   : > { %v5008_v36 = vpop.f32.mrb[19].mxu0 }
 0x745   : > { %v1519_v37 = vpop.f32.mrb[20].mxu0 }
 0x746   : > { %v5011_v38 = vpop.f32.mrb[21].mxu0 }
 0x749   : > { %v1524_v39 = vpop.f32.mrb[22].mxu0 }
 0x74a   : > { %v5014_v40 = vpop.f32.mrb[23].mxu0 }
 0x755   : > { %v1425_v41 = vpop.f32.mrb[18].mxu1 }
 0x756   : > { %v6127_v42 = vadd.f32 %v1514_v35, %v1425_v41  ;;  %v4997_v43 = vpop.f32.mrb[19].mxu1 }
 0x759   : > { %v1430_v44 = vpop.f32.mrb[20].mxu1 }
 0x75a   : > { %v6129_v45 = vadd.f32 %v1519_v37, %v1430_v44  ;;  %v5000_v46 = vpop.f32.mrb[21].mxu1  ;;  %v869_v44 = vld [vmem:[%s6779_s7 + $0x10] sm:$0xff] }
 0x75b   : > { %5046 = vmatpush3.msra.mxu1 %v869_v44 }
 0x75c   : > { %5419 = vmatprep.subr.bf16.mxu1 %v5747_v3 }
 0x75d   : > { %v1435_v47 = vpop.f32.mrb[22].mxu1 }
 0x75e   : > { %v6131_v48 = vadd.f32 %v1524_v39, %v1435_v47  ;;  %v5003_v49 = vpop.f32.mrb[23].mxu1 }
 0x761   : > { %v1618_v50 = vpop.f32.mrb[24].mxu1 }
 0x762   : > { %v1632_v51 = vmul.f32 0.35355338, %v1618_v50  ;;  %v5023_v52 = vpop.f32.mrb[25].mxu1 }
 0x764   : > { %v1635_v53 = vsel %vm976_vm6, %v1632_v51, -inf }
 0x765   : > { %1636 = vmax.xlane.f32.xlu0 %v1635_v53  ;;  %v1623_v54 = vpop.f32.mrb[26].mxu1 }
 0x766   : > { %v1633_v55 = vmul.f32 0.35355338, %v1623_v54  ;;  %v5026_v56 = vpop.f32.mrb[27].mxu1 }
 0x768   : > { %v1638_v57 = vsel %vm976_vm6, %v1633_v55, -inf }
 0x769   : > { %1639 = vmax.xlane.f32.xlu1 %v1638_v57  ;;  %v1628_v58 = vpop.f32.mrb[28].mxu1 }
 0x76a   : > { %v1634_v59 = vmul.f32 0.35355338, %v1628_v58  ;;  %v5029_v60 = vpop.f32.mrb[29].mxu1 }
 0x76c   : > { %v1641_v61 = vsel %vm983_vm7, %v1634_v59, -inf }
 0x76d   : > { %1642 = vmax.xlane.f32.xlu0 %v1641_v61 }
 0x77a   : > { %1672 = vrot.lane.b32.xlu1 %v5980_v22, %s6804_s20 }
 0x77e   : > { %5552 = vrot.lane.b32.xlu1 %v5978_v19, %s6800_s2 }
 0x782   : > { %1869 = vrot.lane.b32.xlu1 %v5980_v22, %s6800_s2  ;;  %s6824_s2 = smov 120  }
 0x7f2   : > { %v1637_v62 = vpop.xlane.xlu0 %1636 }
 0x7f3   : > { %v1644_v63 = vsub.f32 %v1632_v51, %v1637_v62 }
 0x7f5   : > { %v1647_v0 = vmul.f32 1.442695, %v1644_v63 }
 0x7f6   : > { %v1640_v1 = vpop.xlane.xlu1 %1639 }
 0x7f7   : > { %5631 = vpow2.f32 %v1647_v0  ;;  %v1645_v2 = vsub.f32 %v1633_v55, %v1640_v1 }
 0x7f9   : > { %v1649_v4 = vmul.f32 1.442695, %v1645_v2 }
 0x7fa   : > { %v1643_v5 = vpop.xlane.xlu0 %1642  ;;  %v1673_v18 = vpop.permute.xlu1 %1672 }
 0x7fb   : > { %5633 = vpow2.f32 %v1649_v4  ;;  %v1646_v7 = vsub.f32 %v1634_v59, %v1643_v5 }
 0x7fd   : > { %v1651_v8 = vmul.f32 1.442695, %v1646_v7 }
 0x7fe   : > { %v5553_v20 = vpop.permute.xlu1 %5552 }
 0x7ff   : > { %5635 = vpow2.f32 %v1651_v8  ;;  %v5555_v34 = vunpack.i.h.bf16 %v5553_v20  ;;  %v5554_v35 = vunpack.i.l.bf16 %v5553_v20 }
 0x801   : > { %v5632_v9 = vpop.eup %5631  ;;  %v5416_v38 = vpack.c.bf16 %v5555_v34, %v5554_v35 }
 0x802   : > { %v1653_v10 = vsel %vm976_vm6, %v5632_v9, 0.0  ;;  %v1870_v24 = vpop.permute.xlu1 %1869 }
 0x803   : > { %1654 = vadd.xlane.f32.xlu0 %v1653_v10 }
 0x805   : > { %v5634_v11 = vpop.eup %5633 }
 0x806   : > { %v1656_v12 = vsel %vm976_vm6, %v5634_v11, 0.0 }
 0x807   : > { %1657 = vadd.xlane.f32.xlu0 %v1656_v12 }
 0x809   : > { %v5636_v13 = vpop.eup %5635 }
 0x80a   : > { %v1659_v14 = vsel %vm983_vm7, %v5636_v13, 0.0 }
 0x80b   : > { %1660 = vadd.xlane.f32.xlu1 %v1659_v14 }
 0x81c   : > { %1861 = vrot.lane.b32.xlu1 %v5974_v17, %s6798_s23 }
 0x81d   : > { %5547 = vrot.lane.b32.xlu0 %v5978_v19, %s6804_s20  ;;  %s602_s20 = scalar_lea.vmem %s6791_s19, %s6833_s26 }
 0x821   : > { %1859 = vrot.lane.b32.xlu0 %v5972_v15, %s6798_s23 }
 0x825   : > { %1863 = vrot.lane.b32.xlu0 %v5980_v22, %s6798_s23  ;;  %s6802_s23 = smov 40  }
 0x890   : > { %v1655_v23 = vpop.xlane.xlu0 %1654 }
 0x891   : > { %5637 = vrcp.f32 %v1655_v23 }
 0x894   : > { %v1658_v25 = vpop.xlane.xlu0 %1657 }
 0x895   : > { %5639 = vrcp.f32 %v1658_v25 }
 0x898   : > { %v1661_v27 = vpop.xlane.xlu1 %1660  ;;  %v5548_v28 = vpop.permute.xlu0 %5547 }
 0x899   : > { %v5550_v30 = vunpack.i.h.bf16 %v5548_v28  ;;  %v5549_v17 = vunpack.i.l.bf16 %v5548_v28  ;;  %5641 = vrcp.f32 %v1661_v27 }
 0x89b   : > { %v5413_v31 = vpack.c.bf16 %v5550_v30, %v5549_v17  ;;  %v5638_v32 = vpop.eup %5637 }
 0x89c   : > { %v1665_v15 = vmul.f32 %v5638_v32, %v5632_v9  ;;  %v1860_v40 = vpop.permute.xlu0 %1859  ;;  %v1862_v41 = vpop.permute.xlu1 %1861 }
 0x89d   : > { %5414 = vmatpush3.bf16.msra.mxu0 %v5413_v31  ;;  %v870_v31 = vld [vmem:[%s6779_s7 + $0x18] sm:$0xff] }
 0x89e   : > { %5034 = vmatprep.subr.mxu0 %v5749_v6 }
 0x89f   : > { %v5640_v33 = vpop.eup %5639 }
 0x8a0   : > { %v1666_v36 = vmul.f32 %v5640_v33, %v5634_v11  ;;  %v1864_v43 = vpop.permute.xlu0 %1863 }
 0x8a1   : > { %5035 = vmatpush3.msk.msra.mxu0 %vm1028_vm8, %v1673_v18 }
 0x8a2   : > { %5037 = vmatmul.mubr.msk.f32.vlgmr.msra.gmra.mrb[24].mxu0 %vm976_vm6, %v1665_v15  ;;  %5415 = vmatprep.subr.bf16.mxu0 %v5747_v3 }
 0x8a3   : > { %5039 = vmatprep.mubr.msk.f32.mxu0 %vm5748_vm0, %v5749_v6  ;;  %v5642_v37 = vpop.eup %5641 }
 0x8a4   : > { %v1667_v39 = vmul.f32 %v5642_v37, %v5636_v13 }
 0x8a6   : > { %5040 = vmatmul.mubr.msk.f32.gmra.mrb[26].mxu0 %vm976_vm6, %v1666_v36 }
 0x8a7   : > { %5042 = vmatprep.mubr.msk.f32.mxu0 %vm5748_vm0, %v5749_v6 }
 0x8a8   : > { %5418 = vmatpush3.bf16.xpose.msk.msra.mxu0 %vm5998_vm5, %v5416_v38 }
 0x8a9   : > { %5060 = vmatprep.subr.mxu0 %v5749_v6 }
 0x8aa   : > { %5043 = vmatmul.mubr.msk.f32.gmra.mrb[28].mxu0 %vm976_vm6, %v1667_v39 }
 0x8ab   : > { %5062 = vmatprep.mubr.msk.f32.mxu0 %vm5748_vm0, %v5749_v6 }
 0x8b0   : > { %5061 = vmatpush3.xpose.msk.msra.mxu0 %vm880_vm4, %v1870_v24 }
 0x8b1   : > { %5086 = vmatprep.subr.mxu0 %v5749_v6 }
 0x8b3   : > { %5063 = vmatmul.mubr.msk.f32.vlgmr.msra.gmra.mrb[30].mxu0 %vm880_vm4, %v1860_v40 }
 0x8b4   : > { %5065 = vmatprep.mubr.msk.f32.mxu0 %vm5748_vm0, %v5749_v6  ;;  %5087 = vmatpush3.msra.mxu0 %v870_v31  ;;  %v2264_v31 = vld [vmem:[%s6783_s11 + $0x10] sm:$0xff] }
 0x8b5   : > { %5428 = vmatprep.subr.bf16.mxu0 %v5747_v3 }
 0x8b7   : > { %5066 = vmatmul.mubr.msk.f32.gmra.mrb[32].mxu0 %vm880_vm4, %v1862_v41 }
 0x8b8   : > { %5068 = vmatprep.mubr.msk.f32.mxu0 %vm5748_vm0, %v5749_v6 }
 0x8bb   : > { %5069 = vmatmul.mubr.msk.f32.gmra.mrb[34].mxu0 %vm880_vm4, %v1864_v43 }
 0x8bc   : > { %5088 = vmatprep.mubr.msk.f32.mxu0 %vm5748_vm0, %v5749_v6 }
 0x975   : > { %v1753_v46 = vpop.f32.mrb[24].mxu0 }
 0x976   : > { %v5038_v47 = vpop.f32.mrb[25].mxu0  ;;  %5048 = vmatmul.mubr.msk.f32.vlgmr.msra.gmra.mrb[30].mxu1 %vm880_vm4, %v1753_v46 }
 0x977   : > { %5050 = vmatprep.mubr.msk.f32.mxu1 %vm5748_vm0, %v5749_v6 }
 0x979   : > { %v1758_v49 = vpop.f32.mrb[26].mxu0 }
 0x97a   : > { %v5041_v50 = vpop.f32.mrb[27].mxu0  ;;  %5051 = vmatmul.mubr.msk.f32.gmra.mrb[32].mxu1 %vm880_vm4, %v1758_v49 }
 0x97b   : > { %5053 = vmatprep.mubr.msk.f32.mxu1 %vm5748_vm0, %v5749_v6 }
 0x97d   : > { %v1763_v51 = vpop.f32.mrb[28].mxu0 }
 0x97e   : > { %v5044_v52 = vpop.f32.mrb[29].mxu0  ;;  %5054 = vmatmul.mubr.msk.f32.gmra.mrb[34].mxu1 %vm880_vm4, %v1763_v51 }
 0x97f   : > { %5077 = vmatprep.mubr.msk.f32.mxu1 %vm5748_vm0, %v5749_v6 }
 0x986   : > { %v1949_v53 = vpop.f32.mrb[30].mxu0 }
 0x987   : > { %v1963_v54 = vmul.f32 0.35355338, %v1949_v53  ;;  %v5064_v55 = vpop.f32.mrb[31].mxu0 }
 0x988   : > { %v4585_v55 = vld [vmem:[%s6780_s8] ss:$0 sm:$0xff] }
 0x989   : > { %v1966_v56 = vsel %vm976_vm6, %v1963_v54, -inf }
 0x98a   : > { %1967 = vmax.xlane.f32.xlu1 %v1966_v56  ;;  %v1954_v57 = vpop.f32.mrb[32].mxu0 }
 0x98b   : > { %v1964_v58 = vmul.f32 0.35355338, %v1954_v57  ;;  %v5067_v59 = vpop.f32.mrb[33].mxu0 }
 0x98d   : > { %v1969_v60 = vsel %vm976_vm6, %v1964_v58, -inf }
 0x98e   : > { %1970 = vmax.xlane.f32.xlu0 %v1969_v60  ;;  %v1959_v61 = vpop.f32.mrb[34].mxu0 }
 0x98f   : > { %v1965_v62 = vmul.f32 0.35355338, %v1959_v61  ;;  %v5070_v63 = vpop.f32.mrb[35].mxu0 }
 0x991   : > { %v1972_v0 = vsel %vm983_vm7, %v1965_v62, -inf }
 0x992   : > { %1973 = vmax.xlane.f32.xlu0 %v1972_v0 }
 0xa17   : > { %v1968_v1 = vpop.xlane.xlu1 %1967 }
 0xa18   : > { %v1975_v2 = vsub.f32 %v1963_v54, %v1968_v1 }
 0xa1a   : > { %v1978_v4 = vmul.f32 1.442695, %v1975_v2 }
 0xa1b   : > { %v1971_v5 = vpop.xlane.xlu0 %1970 }
 0xa1c   : > { %5643 = vpow2.f32 %v1978_v4  ;;  %v1976_v7 = vsub.f32 %v1964_v58, %v1971_v5 }
 0xa1e   : > { %v1980_v8 = vmul.f32 1.442695, %v1976_v7 }
 0xa1f   : > { %v1974_v9 = vpop.xlane.xlu0 %1973 }
 0xa20   : > { %5645 = vpow2.f32 %v1980_v8  ;;  %v1977_v10 = vsub.f32 %v1965_v62, %v1974_v9 }
 0xa22   : > { %v1982_v11 = vmul.f32 1.442695, %v1977_v10 }
 0xa24   : > { %5647 = vpow2.f32 %v1982_v11 }
 0xa26   : > { %v5644_v12 = vpop.eup %5643 }
 0xa27   : > { %v1984_v13 = vsel %vm976_vm6, %v5644_v12, 0.0 }
 0xa28   : > { %1985 = vadd.xlane.f32.xlu0 %v1984_v13 }
 0xa2a   : > { %v5646_v14 = vpop.eup %5645 }
 0xa2b   : > { %v1987_v18 = vsel %vm976_vm6, %v5646_v14, 0.0 }
 0xa2c   : > { %1988 = vadd.xlane.f32.xlu1 %v1987_v18 }
 0xa2e   : > { %v5648_v20 = vpop.eup %5647 }
 0xa2f   : > { %v1990_v23 = vsel %vm983_vm7, %v5648_v20, 0.0 }
 0xa30   : > { %1991 = vadd.xlane.f32.xlu0 %v1990_v23 }
 0xa3d   : > { %5557 = vrot.lane.b32.xlu1 %v5978_v19, %s6802_s23 }
 0xa46   : > { %2003 = vrot.lane.b32.xlu0 %v5980_v22, %s6802_s23  ;;  %s6829_s23 = smov 48  }
 0xa49   : > { %v1842_v24 = vpop.f32.mrb[30].mxu1 }
 0xa4a   : > { %v1856_v25 = vadd.f32 %v1842_v24, %v6127_v42  ;;  %v5049_v27 = vpop.f32.mrb[31].mxu1 }
 0xa4d   : > { %v1847_v28 = vpop.f32.mrb[32].mxu1 }
 0xa4e   : > { %v1857_v30 = vadd.f32 %v1847_v28, %v6129_v45  ;;  %v5052_v17 = vpop.f32.mrb[33].mxu1  ;;  %v2262_v28 = vld [vmem:[%s6783_s11] sm:$0xff] }
 0xa51   : > { %v1852_v32 = vpop.f32.mrb[34].mxu1 }
 0xa52   : > { %v1858_v19 = vadd.f32 %v1852_v32, %v6131_v48  ;;  %v5055_v15 = vpop.f32.mrb[35].mxu1  ;;  %v2265_v32 = vld [vmem:[%s6783_s11 + $0x18] sm:$0xff] }
 0xab5   : > { %v1986_v22 = vpop.xlane.xlu0 %1985 }
 0xab6   : > { %5649 = vrcp.f32 %v1986_v22 }
 0xab9   : > { %v1989_v33 = vpop.xlane.xlu1 %1988 }
 0xaba   : > { %5651 = vrcp.f32 %v1989_v33 }
 0xabd   : > { %v5558_v42 = vpop.permute.xlu1 %5557  ;;  %v1992_v34 = vpop.xlane.xlu0 %1991 }
 0xabe   : > { %v5560_v35 = vunpack.i.h.bf16 %v5558_v42  ;;  %v5559_v45 = vunpack.i.l.bf16 %v5558_v42  ;;  %5653 = vrcp.f32 %v1992_v34 }
 0xac0   : > { %v5420_v36 = vpack.c.bf16 %v5560_v35, %v5559_v45  ;;  %v5650_v37 = vpop.eup %5649 }
 0xac1   : > { %v1996_v38 = vmul.f32 %v5650_v37, %v5644_v12  ;;  %v2004_v39 = vpop.permute.xlu0 %2003 }
 0xac2   : > { %5421 = vmatpush3.bf16.msra.mxu1 %v5420_v36 }
 0xac3   : > { %5075 = vmatprep.subr.mxu1 %v5749_v6 }
 0xac4   : > { %v5652_v40 = vpop.eup %5651 }
 0xac5   : > { %v1997_v48 = vmul.f32 %v5652_v40, %v5646_v14 }
 0xac6   : > { %5076 = vmatpush3.msk.msra.mxu1 %vm1028_vm8, %v2004_v39  ;;  %v4586_v39 = vld [vmem:[%s6781_s9] ss:$0 sm:$0xff] }
 0xac7   : > { %5078 = vmatmul.mubr.msk.f32.vlgmr.msra.gmra.mrb[36].mxu1 %vm976_vm6, %v1996_v38  ;;  %5422 = vmatprep.subr.bf16.mxu1 %v5747_v3 }
 0xac8   : > { %5080 = vmatprep.mubr.msk.f32.mxu1 %vm5748_vm0, %v5749_v6  ;;  %v5654_v41 = vpop.eup %5653 }
 0xac9   : > { %v1998_v43 = vmul.f32 %v5654_v41, %v5648_v20 }
 0xacb   : > { %5081 = vmatmul.mubr.msk.f32.gmra.mrb[38].mxu1 %vm976_vm6, %v1997_v48  ;;  %v4587_v48 = vld [vmem:[%s6782_s10] ss:$0 sm:$0xff] }
 0xacc   : > { %5083 = vmatprep.mubr.msk.f32.mxu1 %vm5748_vm0, %v5749_v6 }
 0xacf   : > { %5084 = vmatmul.mubr.msk.f32.gmra.mrb[40].mxu1 %vm976_vm6, %v1998_v43 }
 0xad0   : > { %5105 = vmatprep.mubr.msk.f32.mxu1 %vm5748_vm0, %v5749_v6 }
 0xb9a   : > { %v2084_v44 = vpop.f32.mrb[36].mxu1 }
 0xb9b   : > { %v5079_v46 = vpop.f32.mrb[37].mxu1  ;;  %5089 = vmatmul.mubr.msk.f32.vlgmr.msra.gmra.mrb[36].mxu0 %vm880_vm4, %v2084_v44 }
 0xb9c   : > { %5091 = vmatprep.mubr.msk.f32.mxu0 %vm5748_vm0, %v5749_v6 }
 0xb9e   : > { %v2089_v47 = vpop.f32.mrb[38].mxu1 }
 0xb9f   : > { %v5082_v49 = vpop.f32.mrb[39].mxu1  ;;  %5092 = vmatmul.mubr.msk.f32.gmra.mrb[38].mxu0 %vm880_vm4, %v2089_v47 }
 0xba0   : > { %5094 = vmatprep.mubr.msk.f32.mxu0 %vm5748_vm0, %v5749_v6 }
 0xba2   : > { %v2094_v50 = vpop.f32.mrb[40].mxu1 }
 0xba3   : > { %v5085_v51 = vpop.f32.mrb[41].mxu1  ;;  %5095 = vmatmul.mubr.msk.f32.gmra.mrb[40].mxu0 %vm880_vm4, %v2094_v50 }
 0xba4   : > { %5130 = vmatprep.mubr.msk.f32.mxu0 %vm5748_vm0, %v5749_v6 }
 0xc6e   : > { %v2173_v52 = vpop.f32.mrb[36].mxu0 }
 0xc6f   : > { %v2187_v53 = vadd.f32 %v2173_v52, %v1856_v25  ;;  %v5090_v54 = vpop.f32.mrb[37].mxu0 }
 0xc70   : > { %v2389_v54 = vld [vmem:[%s6785_s13] sm:$0xff] }
 0xc71   : > { %v2190_v56 = vadd.f32 %v2187_v53, %v5916_v16 }
 0xc72   : > { %v2178_v57 = vpop.f32.mrb[38].mxu0 }
 0xc73   : > { %v6234_v58 = vadd.f32 %v4585_v55, %v2190_v56  ;;  %v2188_v59 = vadd.f32 %v2178_v57, %v1857_v30  ;;  %v5093_v60 = vpop.f32.mrb[39].mxu0  ;;  %v2263_v30 = vld [vmem:[%s6783_s11 + $0x8] sm:$0xff]  ;;  %v2391_v57 = vld [vmem:[%s6785_s13 + $0x10] sm:$0xff] }
 0xc74   : > { %v5423_v17 = vpack.c.bf16 %v2263_v30, %v2262_v28 }
 0xc75   : > { %v2191_v61 = vadd.f32 %v2188_v59, %v5923_v21  ;;  %v2205_v62 = vsel %vm707_vm2, %v6234_v58, 0.0  ;;  %v2392_v59 = vld [vmem:[%s6785_s13 + $0x18] sm:$0xff] }
 0xc76   : > { %2206 = vadd.xlane.f32.xlu1 %v2205_v62  ;;  %v2183_v63 = vpop.f32.mrb[40].mxu0  ;;  %5424 = vmatpush3.bf16.msra.mxu1 %v5423_v17  ;;  %v5432_v60 = vpack.c.bf16 %v2392_v59, %v2391_v57  ;;  %v2394_v62 = vld [vmem:[%s6785_s13 + $0x28] sm:$0xff] }
 0xc77   : > { %v6239_v0 = vadd.f32 %v4585_v55, %v2191_v61  ;;  %v2189_v1 = vadd.f32 %v2183_v63, %v1858_v19  ;;  %v5096_v2 = vpop.f32.mrb[41].mxu0  ;;  %5425 = vmatprep.subr.bf16.mxu1 %v5747_v3  ;;  %v5426_v19 = vpack.c.bf16 %v2265_v32, %v2264_v31  ;;  %v2393_v61 = vld [vmem:[%s6785_s13 + $0x20] sm:$0xff] }
 0xc78   : > { %v5435_v63 = vpack.c.bf16 %v2394_v62, %v2393_v61  ;;  %v2396_v2 = vld [vmem:[%s6785_s13 + $0x38] sm:$0xff] }
 0xc79   : > { %v2192_v4 = vadd.f32 %v2189_v1, %v5930_v26  ;;  %v2208_v16 = vsel %vm707_vm2, %v6239_v0, 0.0  ;;  %v2395_v1 = vld [vmem:[%s6785_s13 + $0x30] sm:$0xff] }
 0xc7a   : > { %2209 = vadd.xlane.f32.xlu0 %v2208_v16  ;;  %5427 = vmatpush3.bf16.msra.mxu1 %v5426_v19  ;;  %v4588_v16 = vld [vmem:[%s6784_s12] ss:$0 sm:$0xff] }
 0xc7b   : > { %v6244_v5 = vadd.f32 %v4585_v55, %v2192_v4  ;;  %5440 = vmatprep.subr.bf16.mxu1 %v5747_v3  ;;  %v2390_v55 = vld [vmem:[%s6785_s13 + $0x8] sm:$0xff]  ;;  %v5438_v4 = vpack.c.bf16 %v2396_v2, %v2395_v1 }
 0xc7c   : > { %v5429_v56 = vpack.c.bf16 %v2390_v55, %v2389_v54 }
 0xc7d   : > { %v2211_v21 = vsel %vm714_vm3, %v6244_v5, 0.0 }
 0xc7e   : > { %2212 = vadd.xlane.f32.xlu1 %v2211_v21  ;;  %5430 = vmatpush3.bf16.msra.mxu0 %v5429_v56 }
 0xc7f   : > { %5431 = vmatprep.subr.bf16.mxu0 %v5747_v3 }
 0xc82   : > { %5433 = vmatpush3.bf16.msra.mxu0 %v5432_v60 }
 0xc83   : > { %5434 = vmatprep.subr.bf16.mxu0 %v5747_v3 }
 0xc86   : > { %5436 = vmatpush3.bf16.msra.mxu0 %v5435_v63 }
 0xc87   : > { %5437 = vmatprep.subr.bf16.mxu0 %v5747_v3 }
 0xc8a   : > { %5439 = vmatpush3.bf16.msra.mxu0 %v5438_v4 }
 0xc8b   : > { %5446 = vmatprep.subr.bf16.mxu0 %v5747_v3 }
 0xd03   : > { %v2207_v7 = vpop.xlane.xlu1 %2206 }
 0xd04   : > { %v2214_v8 = vmul.f32 0.03125, %v2207_v7 }
 0xd06   : > { %v2217_v9 = vsub.f32 %v6234_v58, %v2214_v8 }
 0xd07   : > { %v2210_v10 = vpop.xlane.xlu0 %2209 }
 0xd08   : > { %v2215_v11 = vmul.f32 0.03125, %v2210_v10  ;;  %v2220_v12 = vmul.f32 %v2217_v9, %v2217_v9 }
 0xd0a   : > { %v2218_v13 = vsub.f32 %v6239_v0, %v2215_v11  ;;  %v2223_v26 = vsel %vm707_vm2, %v2220_v12, 0.0 }
 0xd0b   : > { %2224 = vadd.xlane.f32.xlu0 %v2223_v26  ;;  %v2213_v14 = vpop.xlane.xlu1 %2212 }
 0xd0c   : > { %v2216_v18 = vmul.f32 0.03125, %v2213_v14  ;;  %v2221_v20 = vmul.f32 %v2218_v13, %v2218_v13 }
 0xd0e   : > { %v2219_v23 = vsub.f32 %v6244_v5, %v2216_v18  ;;  %v2226_v24 = vsel %vm707_vm2, %v2221_v20, 0.0 }
 0xd0f   : > { %2227 = vadd.xlane.f32.xlu1 %v2226_v24 }
 0xd10   : > { %v2222_v25 = vmul.f32 %v2219_v23, %v2219_v23 }
 0xd12   : > { %v2229_v27 = vsel %vm714_vm3, %v2222_v25, 0.0 }
 0xd13   : > { %2230 = vadd.xlane.f32.xlu0 %v2229_v27 }
 0xd98   : > { %v2225_v15 = vpop.xlane.xlu0 %2224 }
 0xd99   : > { %v2232_v22 = vmul.f32 0.03125, %v2225_v15 }
 0xd9b   : > { %v2235_v33 = vadd.f32 1e-12, %v2232_v22 }
 0xd9c   : > { %v2228_v42 = vpop.xlane.xlu1 %2227 }
 0xd9d   : > { %5655 = vrsqrt.f32 %v2235_v33  ;;  %v2233_v34 = vmul.f32 0.03125, %v2228_v42 }
 0xd9f   : > { %v2236_v35 = vadd.f32 1e-12, %v2233_v34 }
 0xda0   : > { %v2231_v45 = vpop.xlane.xlu0 %2230 }
 0xda1   : > { %5657 = vrsqrt.f32 %v2236_v35  ;;  %v2234_v36 = vmul.f32 0.03125, %v2231_v45 }
 0xda3   : > { %v2237_v37 = vadd.f32 1e-12, %v2234_v36 }
 0xda5   : > { %5659 = vrsqrt.f32 %v2237_v37 }
 0xda7   : > { %v5656_v38 = vpop.eup %5655 }
 0xda8   : > { %v2241_v40 = vmul.f32 %v5656_v38, %v2217_v9 }
 0xdaa   : > { %v2250_v41 = vmul.f32 %v4586_v39, %v2241_v40 }
 0xdab   : > { %v5658_v43 = vpop.eup %5657 }
 0xdac   : > { %v2259_v44 = vadd.f32 %v4587_v48, %v2250_v41  ;;  %v2242_v46 = vmul.f32 %v5658_v43, %v2218_v13 }
 0xdae   : > { %5106 = vmatmul.mubr.msk.f32.vlgmr.msra.gmra.mrb[42].mxu1 %vm707_vm2, %v2259_v44  ;;  %v2251_v47 = vmul.f32 %v4586_v39, %v2242_v46  ;;  %v4595_v44 = vld [vmem:[%s6786_s14] ss:$0 sm:$0xff] }
 0xdaf   : > { %v5660_v49 = vpop.eup %5659  ;;  %5108 = vmatprep.mubr.msk.f32.mxu1 %vm5748_vm0, %v5749_v6 }
 0xdb0   : > { %v2260_v50 = vadd.f32 %v4587_v48, %v2251_v47  ;;  %v2243_v51 = vmul.f32 %v5660_v49, %v2219_v23 }
 0xdb2   : > { %5109 = vmatmul.mubr.msk.f32.gmra.mrb[44].mxu1 %vm707_vm2, %v2260_v50  ;;  %v2252_v52 = vmul.f32 %v4586_v39, %v2243_v51 }
 0xdb3   : > { %5111 = vmatprep.mubr.msk.f32.mxu1 %vm5748_vm0, %v5749_v6 }
 0xdb4   : > { %v2261_v53 = vadd.f32 %v4587_v48, %v2252_v52 }
 0xdb6   : > { %5112 = vmatmul.mubr.msk.f32.gmra.mrb[46].mxu1 %vm707_vm2, %v2261_v53 }
 0xdb7   : > { %5147 = vmatprep.mubr.msk.f32.mxu1 %vm5748_vm0, %v5749_v6 }
 0xe81   : > { %v2348_v21 = vpop.f32.mrb[42].mxu1 }
 0xe82   : > { %v2349_v7 = vadd.f32 %v4588_v16, %v2348_v21  ;;  %v5107_v8 = vpop.f32.mrb[43].mxu1 }
 0xe84   : > { %v2365_v9 = vmul.f32 0.044715, %v2349_v7  ;;  %v2362_v42 = vmul.f32 0.5, %v2349_v7 }
 0xe85   : > { %v2353_v10 = vpop.f32.mrb[44].mxu1 }
 0xe86   : > { %v2368_v11 = vmul.f32 %v2365_v9, %v2349_v7  ;;  %v2354_v12 = vadd.f32 %v4588_v16, %v2353_v10  ;;  %v5110_v13 = vpop.f32.mrb[45].mxu1 }
 0xe87   : > { %v4601_v13 = vld [vmem:[%s6777_s5 + $0x28] sm:$0xff] }
 0xe88   : > { %v2371_v26 = vmul.f32 %v2368_v11, %v2349_v7  ;;  %v2366_v14 = vmul.f32 0.044715, %v2354_v12  ;;  %v2363_v36 = vmul.f32 0.5, %v2354_v12 }
 0xe89   : > { %v2358_v18 = vpop.f32.mrb[46].mxu1 }
 0xe8a   : > { %v2374_v20 = vadd.f32 %v2371_v26, %v2349_v7  ;;  %v2369_v23 = vmul.f32 %v2366_v14, %v2354_v12  ;;  %v2359_v24 = vadd.f32 %v4588_v16, %v2358_v18  ;;  %v5113_v25 = vpop.f32.mrb[47].mxu1  ;;  %v4602_v14 = vld [vmem:[%s6777_s5 + $0x30] sm:$0xff]  ;;  %v4603_v18 = vld [vmem:[%s6777_s5 + $0x38] sm:$0xff] }
 0xe8c   : > { %v2377_v27 = vmul.f32 0.7978846, %v2374_v20  ;;  %v2372_v28 = vmul.f32 %v2369_v23, %v2354_v12  ;;  %v2367_v30 = vmul.f32 0.044715, %v2359_v24  ;;  %v2364_v40 = vmul.f32 0.5, %v2359_v24 }
 0xe8d   : > { %v5444_v20 = vpack.c.bf16 %v4603_v18, %v4602_v14 }
 0xe8e   : > { %5661 = vtanh.f32 %v2377_v27  ;;  %v2375_v17 = vadd.f32 %v2372_v28, %v2354_v12  ;;  %v2370_v31 = vmul.f32 %v2367_v30, %v2359_v24  ;;  %v4600_v12 = vld [vmem:[%s6777_s5 + $0x20] sm:$0xff] }
 0xe8f   : > { %v5441_v26 = vpack.c.bf16 %v4601_v13, %v4600_v12 }
 0xe90   : > { %v2373_v32 = vmul.f32 %v2370_v31, %v2359_v24  ;;  %v2378_v19 = vmul.f32 0.7978846, %v2375_v17 }
 0xe91   : > { %5442 = vmatpush3.bf16.msra.mxu1 %v5441_v26 }
 0xe92   : > { %v2376_v15 = vadd.f32 %v2373_v32, %v2359_v24  ;;  %5663 = vtanh.f32 %v2378_v19  ;;  %5443 = vmatprep.subr.bf16.mxu1 %v5747_v3 }
 0xe94   : > { %v2379_v22 = vmul.f32 0.7978846, %v2376_v15  ;;  %v4598_v15 = vld [vmem:[%s6821_s21 + $0x1] ss:$0 sm:$0xff] }
 0xe95   : > { %5445 = vmatpush3.bf16.msra.mxu1 %v5444_v20 }
 0xe96   : > { %5665 = vtanh.f32 %v2379_v22  ;;  %5450 = vmatprep.subr.bf16.mxu1 %v5747_v3 }
 0xe98   : > { %v5662_v33 = vpop.eup %5661 }
 0xe99   : > { %v2383_v34 = vadd.f32 1.0, %v5662_v33  ;;  %v4599_v33 = vld [vmem:[%s6776_s4 + $0x1] ss:$0 sm:$0xff] }
 0xe9b   : > { %v2386_v35 = vmul.f32 %v2383_v34, %v2362_v42 }
 0xe9c   : > { %v5664_v45 = vpop.eup %5663 }
 0xe9d   : > { %5131 = vmatmul.mubr.msk.f32.vlgmr.msra.gmra.mrb[42].mxu0 %vm2397_vm9, %v2386_v35  ;;  %v2384_v37 = vadd.f32 1.0, %v5664_v45 }
 0xe9e   : > { %5133 = vmatprep.mubr.msk.f32.mxu0 %vm5748_vm0, %v5749_v6 }
 0xe9f   : > { %v2387_v38 = vmul.f32 %v2384_v37, %v2363_v36 }
 0xea0   : > { %v5666_v39 = vpop.eup %5665 }
 0xea1   : > { %5134 = vmatmul.mubr.msk.f32.gmra.mrb[44].mxu0 %vm2397_vm9, %v2387_v38  ;;  %v2385_v48 = vadd.f32 1.0, %v5666_v39 }
 0xea2   : > { %5136 = vmatprep.mubr.msk.f32.mxu0 %vm5748_vm0, %v5749_v6 }
 0xea3   : > { %v2388_v41 = vmul.f32 %v2385_v48, %v2364_v40 }
 0xea5   : > { %5137 = vmatmul.mubr.msk.f32.gmra.mrb[46].mxu0 %vm2397_vm9, %v2388_v41 }
 0xea6   : > { %5162 = vmatprep.mubr.msk.f32.mxu0 %vm5748_vm0, %v5749_v6 }
 0xf70   : > { %v2473_v43 = vpop.f32.mrb[42].mxu0 }
 0xf71   : > { %v2487_v46 = vadd.f32 %v2473_v43, %v6234_v58  ;;  %v5132_v47 = vpop.f32.mrb[43].mxu0 }
 0xf73   : > { %v6327_v49 = vadd.f32 %v4595_v44, %v2487_v46 }
 0xf74   : > { %v2478_v50 = vpop.f32.mrb[44].mxu0 }
 0xf75   : > { %v2488_v51 = vadd.f32 %v2478_v50, %v6239_v0  ;;  %v5135_v52 = vpop.f32.mrb[45].mxu0  ;;  %v2504_v53 = vsel %vm707_vm2, %v6327_v49, 0.0 }
 0xf76   : > { %2505 = vadd.xlane.f32.xlu1 %v2504_v53 }
 0xf77   : > { %v6332_v54 = vadd.f32 %v4595_v44, %v2488_v51 }
 0xf78   : > { %v2483_v55 = vpop.f32.mrb[46].mxu0 }
 0xf79   : > { %v2489_v56 = vadd.f32 %v2483_v55, %v6244_v5  ;;  %v5138_v57 = vpop.f32.mrb[47].mxu0  ;;  %v2507_v58 = vsel %vm707_vm2, %v6332_v54, 0.0 }
 0xf7a   : > { %2508 = vadd.xlane.f32.xlu0 %v2507_v58 }
 0xf7b   : > { %v6337_v59 = vadd.f32 %v4595_v44, %v2489_v56  ;;  %v4605_v44 = vld [vmem:[%s6778_s6 + $0x1] ss:$0 sm:$0xff] }
 0xf7d   : > { %v2510_v0 = vsel %vm714_vm3, %v6337_v59, 0.0 }
 0xf7e   : > { %2511 = vadd.xlane.f32.xlu1 %v2510_v0 }
0x1003   : > { %v2506_v60 = vpop.xlane.xlu1 %2505 }
0x1004   : > { %v2513_v61 = vmul.f32 0.03125, %v2506_v60 }
0x1006   : > { %v2516_v62 = vsub.f32 %v6327_v49, %v2513_v61 }
0x1007   : > { %v2509_v63 = vpop.xlane.xlu0 %2508 }
0x1008   : > { %v2514_v1 = vmul.f32 0.03125, %v2509_v63  ;;  %v2519_v2 = vmul.f32 %v2516_v62, %v2516_v62 }
0x100a   : > { %v2517_v5 = vsub.f32 %v6332_v54, %v2514_v1  ;;  %v2522_v4 = vsel %vm707_vm2, %v2519_v2, 0.0 }
0x100b   : > { %2523 = vadd.xlane.f32.xlu0 %v2522_v4  ;;  %v2512_v16 = vpop.xlane.xlu1 %2511 }
0x100c   : > { %v2515_v21 = vmul.f32 0.03125, %v2512_v16  ;;  %v2520_v7 = vmul.f32 %v2517_v5, %v2517_v5 }
0x100e   : > { %v2518_v8 = vsub.f32 %v6337_v59, %v2515_v21  ;;  %v2525_v9 = vsel %vm707_vm2, %v2520_v7, 0.0 }
0x100f   : > { %2526 = vadd.xlane.f32.xlu1 %v2525_v9 }
0x1010   : > { %v2521_v10 = vmul.f32 %v2518_v8, %v2518_v8 }
0x1012   : > { %v2528_v11 = vsel %vm714_vm3, %v2521_v10, 0.0 }
0x1013   : > { %2529 = vadd.xlane.f32.xlu0 %v2528_v11 }
0x1098   : > { %v2524_v23 = vpop.xlane.xlu0 %2523 }
0x1099   : > { %v2531_v24 = vmul.f32 0.03125, %v2524_v23 }
0x109b   : > { %v2534_v25 = vadd.f32 1e-12, %v2531_v24 }
0x109c   : > { %v2527_v27 = vpop.xlane.xlu1 %2526 }
0x109d   : > { %5667 = vrsqrt.f32 %v2534_v25  ;;  %v2532_v28 = vmul.f32 0.03125, %v2527_v27 }
0x109f   : > { %v2535_v30 = vadd.f32 1e-12, %v2532_v28 }
0x10a0   : > { %v2530_v17 = vpop.xlane.xlu0 %2529 }
0x10a1   : > { %5669 = vrsqrt.f32 %v2535_v30  ;;  %v2533_v31 = vmul.f32 0.03125, %v2530_v17 }
0x10a3   : > { %v2536_v32 = vadd.f32 1e-12, %v2533_v31 }
0x10a5   : > { %5671 = vrsqrt.f32 %v2536_v32 }
0x10a7   : > { %v5668_v19 = vpop.eup %5667 }
0x10a8   : > { %v2540_v22 = vmul.f32 %v5668_v19, %v2516_v62 }
0x10aa   : > { %v2549_v42 = vmul.f32 %v4598_v15, %v2540_v22 }
0x10ab   : > { %v5670_v34 = vpop.eup %5669 }
0x10ac   : > { %v2558_v35 = vadd.f32 %v4599_v33, %v2549_v42  ;;  %v2541_v45 = vmul.f32 %v5670_v34, %v2517_v5 }
0x10ae   : > { %5148 = vmatmul.mubr.msk.f32.vlgmr.msra.gmra.mrb[48].mxu1 %vm707_vm2, %v2558_v35  ;;  %v2550_v36 = vmul.f32 %v4598_v15, %v2541_v45 }
0x10af   : > { %v5672_v37 = vpop.eup %5671  ;;  %5150 = vmatprep.mubr.msk.f32.mxu1 %vm5748_vm0, %v5749_v6 }
0x10b0   : > { %v2559_v38 = vadd.f32 %v4599_v33, %v2550_v36  ;;  %v2542_v39 = vmul.f32 %v5672_v37, %v2518_v8 }
0x10b2   : > { %5151 = vmatmul.mubr.msk.f32.gmra.mrb[50].mxu1 %vm707_vm2, %v2559_v38  ;;  %v2551_v40 = vmul.f32 %v4598_v15, %v2542_v39 }
0x10b3   : > { %5153 = vmatprep.mubr.msk.f32.mxu1 %vm5748_vm0, %v5749_v6 }
0x10b4   : > { %v2560_v48 = vadd.f32 %v4599_v33, %v2551_v40 }
0x10b6   : > { %5154 = vmatmul.mubr.msk.f32.gmra.mrb[52].mxu1 %vm707_vm2, %v2560_v48 }
0x10b7   : > { %5177 = vmatprep.mubr.msk.f32.mxu1 %vm5748_vm0, %v5749_v6 }
0x1181   : > { %v2649_v41 = vpop.f32.mrb[48].mxu1 }
0x1182   : > { %v5149_v43 = vpop.f32.mrb[49].mxu1  ;;  %v6379_v47 = vadd.f32 %v4605_v44, %v2649_v41 }
0x1185   : > { %v2654_v46 = vpop.f32.mrb[50].mxu1 }
0x1186   : > { %v6381_v50 = vadd.f32 %v4605_v44, %v2654_v46  ;;  %v5152_v51 = vpop.f32.mrb[51].mxu1 }
0x1188   : > { %v6385_v52 = vpack.i.bf16 %v6381_v50, %v6379_v47 }
0x1189   : > { %v2659_v53 = vpop.f32.mrb[52].mxu1 }
0x118a   : > { %v6387_v55 = vadd.f32 %v4605_v44, %v2659_v53  ;;  %5562 = vrot.lane.b32.xlu1 %v6385_v52, %s5750_s25  ;;  %v5155_v56 = vpop.f32.mrb[53].mxu1 }
0x118c   : > { %2675 = vrot.lane.b32.xlu0 %v6387_v55, %s5750_s25  ;;  %s6825_s25 = smov 64  }
0x118e   : > { %5567 = vrot.lane.b32.xlu1 %v6385_v52, %s5752_s27 }
0x1190   : > { %2906 = vrot.lane.b32.xlu0 %v6381_v50, %s6824_s2 }
0x1192   : > { %2914 = vrot.lane.b32.xlu1 %v6387_v55, %s5752_s27  ;;  %s6826_s27 = smov 56  }
0x1196   : > { %2904 = vrot.lane.b32.xlu1 %v6379_v47, %s6824_s2 }
0x119a   : > { %2908 = vrot.lane.b32.xlu1 %v6387_v55, %s6824_s2  ;;  %s6830_s2 = smov 72  }
0x11fc   : > { %v5563_v57 = vpop.permute.xlu1 %5562 }
0x11fd   : > { %v5565_v58 = vunpack.i.h.bf16 %v5563_v57  ;;  %v5564_v0 = vunpack.i.l.bf16 %v5563_v57 }
0x11fe   : > { %v2676_v1 = vpop.permute.xlu0 %2675 }
0x11ff   : > { %v5447_v60 = vpack.c.bf16 %v5565_v58, %v5564_v0 }
0x1200   : > { %v5568_v61 = vpop.permute.xlu1 %5567 }
0x1201   : > { %5449 = vmatpush3.bf16.xpose.msk.msra.mxu0 %vm5998_vm5, %v5447_v60  ;;  %v5570_v62 = vunpack.i.h.bf16 %v5568_v61  ;;  %v5569_v63 = vunpack.i.l.bf16 %v5568_v61 }
0x1202   : > { %5160 = vmatprep.subr.mxu0 %v5749_v6  ;;  %v2907_v16 = vpop.permute.xlu0 %2906 }
0x1203   : > { %v5454_v2 = vpack.c.bf16 %v5570_v62, %v5569_v63 }
0x1204   : > { %v2915_v5 = vpop.permute.xlu1 %2914 }
0x1208   : > { %v2905_v4 = vpop.permute.xlu1 %2904 }
0x1209   : > { %5161 = vmatpush3.xpose.msk.msra.mxu0 %vm880_vm4, %v2676_v1 }
0x120a   : > { %5453 = vmatprep.subr.bf16.mxu0 %v5747_v3 }
0x120c   : > { %5163 = vmatmul.mubr.msk.f32.vlgmr.msra.gmra.mrb[48].mxu0 %vm880_vm4, %v6379_v47  ;;  %v2909_v21 = vpop.permute.xlu1 %2908 }
0x120d   : > { %5456 = vmatpush3.bf16.xpose.msk.msra.mxu0 %vm5998_vm5, %v5454_v2  ;;  %5165 = vmatprep.mubr.msk.f32.mxu0 %vm5748_vm0, %v5749_v6 }
0x120e   : > { %5190 = vmatprep.subr.mxu0 %v5749_v6 }
0x1210   : > { %5166 = vmatmul.mubr.msk.f32.gmra.mrb[50].mxu0 %vm880_vm4, %v6381_v50 }
0x1211   : > { %5168 = vmatprep.mubr.msk.f32.mxu0 %vm5748_vm0, %v5749_v6 }
0x1214   : > { %5169 = vmatmul.mubr.msk.f32.gmra.mrb[52].mxu0 %vm880_vm4, %v6387_v55 }
0x1215   : > { %5191 = vmatpush3.xpose.msk.msra.mxu0 %vm880_vm4, %v2915_v5  ;;  %5192 = vmatprep.mubr.msk.f32.mxu0 %vm5748_vm0, %v5749_v6 }
0x1216   : > { %5216 = vmatprep.subr.mxu0 %v5749_v6 }
0x1218   : > { %5193 = vmatmul.mubr.msk.f32.vlgmr.msra.gmra.mrb[54].mxu0 %vm880_vm4, %v2905_v4 }
0x1219   : > { %5195 = vmatprep.mubr.msk.f32.mxu0 %vm5748_vm0, %v5749_v6 }
0x121c   : > { %5196 = vmatmul.mubr.msk.f32.gmra.mrb[56].mxu0 %vm880_vm4, %v2907_v16 }
0x121d   : > { %5198 = vmatprep.mubr.msk.f32.mxu0 %vm5748_vm0, %v5749_v6 }
0x1220   : > { %5199 = vmatmul.mubr.msk.f32.gmra.mrb[58].mxu0 %vm880_vm4, %v2909_v21 }
0x1221   : > { %5218 = vmatprep.mubr.msk.f32.mxu0 %vm5748_vm0, %v5749_v6 }
0x12df   : > { %v2755_v7 = vpop.f32.mrb[48].mxu0 }
0x12e0   : > { %v2769_v8 = vmul.f32 0.35355338, %v2755_v7  ;;  %v5164_v9 = vpop.f32.mrb[49].mxu0 }
0x12e2   : > { %v2772_v10 = vsel %vm976_vm6, %v2769_v8, -inf }
0x12e3   : > { %2773 = vmax.xlane.f32.xlu0 %v2772_v10  ;;  %v2760_v11 = vpop.f32.mrb[50].mxu0 }
0x12e4   : > { %v2770_v12 = vmul.f32 0.35355338, %v2760_v11  ;;  %v5167_v13 = vpop.f32.mrb[51].mxu0 }
0x12e6   : > { %v2775_v26 = vsel %vm976_vm6, %v2770_v12, -inf }
0x12e7   : > { %2776 = vmax.xlane.f32.xlu1 %v2775_v26  ;;  %v2765_v14 = vpop.f32.mrb[52].mxu0 }
0x12e8   : > { %v2771_v18 = vmul.f32 0.35355338, %v2765_v14  ;;  %v5170_v20 = vpop.f32.mrb[53].mxu0 }
0x12ea   : > { %v2778_v23 = vsel %vm983_vm7, %v2771_v18, -inf }
0x12eb   : > { %2779 = vmax.xlane.f32.xlu0 %v2778_v23  ;;  %v2994_v24 = vpop.f32.mrb[54].mxu0 }
0x12ec   : > { %v3008_v25 = vmul.f32 0.35355338, %v2994_v24  ;;  %v5194_v27 = vpop.f32.mrb[55].mxu0 }
0x12ee   : > { %v3011_v28 = vsel %vm976_vm6, %v3008_v25, -inf }
0x12ef   : > { %3012 = vmax.xlane.f32.xlu0 %v3011_v28  ;;  %v2999_v30 = vpop.f32.mrb[56].mxu0 }
0x12f0   : > { %v3009_v17 = vmul.f32 0.35355338, %v2999_v30  ;;  %v5197_v31 = vpop.f32.mrb[57].mxu0 }
0x12f2   : > { %v3014_v32 = vsel %vm976_vm6, %v3009_v17, -inf }
0x12f3   : > { %3015 = vmax.xlane.f32.xlu0 %v3014_v32  ;;  %v3004_v19 = vpop.f32.mrb[58].mxu0 }
0x12f4   : > { %v3010_v15 = vmul.f32 0.35355338, %v3004_v19  ;;  %v5200_v22 = vpop.f32.mrb[59].mxu0 }
0x12f6   : > { %v3017_v33 = vsel %vm983_vm7, %v3010_v15, -inf }
0x12f7   : > { %3018 = vmax.xlane.f32.xlu1 %v3017_v33 }
0x1308   : > { %5572 = vrot.lane.b32.xlu1 %v6385_v52, %s6825_s25 }
0x1370   : > { %v2774_v42 = vpop.xlane.xlu0 %2773 }
0x1371   : > { %v2781_v34 = vsub.f32 %v2769_v8, %v2774_v42 }
0x1373   : > { %v2784_v35 = vmul.f32 1.442695, %v2781_v34 }
0x1374   : > { %v2777_v45 = vpop.xlane.xlu1 %2776 }
0x1375   : > { %5673 = vpow2.f32 %v2784_v35  ;;  %v2782_v36 = vsub.f32 %v2770_v12, %v2777_v45 }
0x1377   : > { %v2786_v37 = vmul.f32 1.442695, %v2782_v36  ;;  %v4609_v36 = vld [vmem:[%s6779_s7 + $0x20] sm:$0xff] }
0x1378   : > { %v2780_v38 = vpop.xlane.xlu0 %2779 }
0x1379   : > { %5675 = vpow2.f32 %v2786_v37  ;;  %v2783_v39 = vsub.f32 %v2771_v18, %v2780_v38  ;;  %v4610_v37 = vld [vmem:[%s6779_s7 + $0x28] sm:$0xff] }
0x137a   : > { %5217 = vmatpush3.msra.mxu0 %v4610_v37 }
0x137b   : > { %v2788_v40 = vmul.f32 1.442695, %v2783_v39  ;;  %5460 = vmatprep.subr.bf16.mxu0 %v5747_v3 }
0x137c   : > { %v3013_v48 = vpop.xlane.xlu0 %3012 }
0x137d   : > { %5677 = vpow2.f32 %v2788_v40  ;;  %v3020_v41 = vsub.f32 %v3008_v25, %v3013_v48 }
0x137f   : > { %v5674_v43 = vpop.eup %5673  ;;  %v3023_v44 = vmul.f32 1.442695, %v3020_v41 }
0x1380   : > { %v3016_v46 = vpop.xlane.xlu0 %3015  ;;  %v2790_v51 = vsel %vm976_vm6, %v5674_v43, 0.0 }
0x1381   : > { %5679 = vpow2.f32 %v3023_v44  ;;  %v3021_v53 = vsub.f32 %v3009_v17, %v3016_v46  ;;  %2791 = vadd.xlane.f32.xlu0 %v2790_v51 }
0x1383   : > { %v5676_v56 = vpop.eup %5675  ;;  %v3025_v57 = vmul.f32 1.442695, %v3021_v53 }
0x1384   : > { %v3019_v58 = vpop.xlane.xlu1 %3018  ;;  %v2793_v0 = vsel %vm976_vm6, %v5676_v56, 0.0 }
0x1385   : > { %5681 = vpow2.f32 %v3025_v57  ;;  %v3022_v60 = vsub.f32 %v3010_v15, %v3019_v58  ;;  %2794 = vadd.xlane.f32.xlu1 %v2793_v0 }
0x1387   : > { %v5678_v61 = vpop.eup %5677  ;;  %v3027_v62 = vmul.f32 1.442695, %v3022_v60 }
0x1388   : > { %v5573_v63 = vpop.permute.xlu1 %5572  ;;  %v2796_v1 = vsel %vm983_vm7, %v5678_v61, 0.0 }
0x1389   : > { %5683 = vpow2.f32 %v3027_v62  ;;  %v5575_v2 = vunpack.i.h.bf16 %v5573_v63  ;;  %v5574_v5 = vunpack.i.l.bf16 %v5573_v63  ;;  %2797 = vadd.xlane.f32.xlu0 %v2796_v1 }
0x138b   : > { %v5680_v4 = vpop.eup %5679  ;;  %v5451_v16 = vpack.c.bf16 %v5575_v2, %v5574_v5 }
0x138c   : > { %v3029_v21 = vsel %vm976_vm6, %v5680_v4, 0.0 }
0x138d   : > { %3030 = vadd.xlane.f32.xlu1 %v3029_v21  ;;  %5452 = vmatpush3.bf16.msra.mxu1 %v5451_v16 }
0x138e   : > { %5175 = vmatprep.subr.mxu1 %v5749_v6 }
0x138f   : > { %v5682_v7 = vpop.eup %5681 }
0x1390   : > { %v3032_v8 = vsel %vm976_vm6, %v5682_v7, 0.0 }
0x1391   : > { %3033 = vadd.xlane.f32.xlu0 %v3032_v8 }
0x1393   : > { %v5684_v9 = vpop.eup %5683 }
0x1394   : > { %v3035_v10 = vsel %vm983_vm7, %v5684_v9, 0.0 }
0x1395   : > { %3036 = vadd.xlane.f32.xlu0 %v3035_v10 }
0x139e   : > { %5577 = vrot.lane.b32.xlu1 %v6385_v52, %s6826_s27 }
0x13a2   : > { %3048 = vrot.lane.b32.xlu1 %v6387_v55, %s6826_s27 }
0x13a6   : > { %5582 = vrot.lane.b32.xlu1 %v6385_v52, %s6827_s24 }
0x13aa   : > { %3331 = vrot.lane.b32.xlu1 %v6387_v55, %s6827_s24 }
0x13ab   : > { %2809 = vrot.lane.b32.xlu0 %v6387_v55, %s6825_s25  ;;  %s6831_s25 = smov 104  }
0x13ae   : > { %3323 = vrot.lane.b32.xlu1 %v6381_v50, %s6828_s29 }
0x13af   : > { %3321 = vrot.lane.b32.xlu0 %v6379_v47, %s6828_s29 }
0x13b3   : > { %3325 = vrot.lane.b32.xlu0 %v6387_v55, %s6828_s29  ;;  %s6832_s29 = smov 40  }
0x140e   : > { %v2792_v11 = vpop.xlane.xlu0 %2791 }
0x140f   : > { %5685 = vrcp.f32 %v2792_v11 }
0x1412   : > { %v2795_v12 = vpop.xlane.xlu1 %2794 }
0x1413   : > { %5687 = vrcp.f32 %v2795_v12 }
0x1416   : > { %v2798_v13 = vpop.xlane.xlu0 %2797 }
0x1417   : > { %5689 = vrcp.f32 %v2798_v13 }
0x1419   : > { %v5686_v23 = vpop.eup %5685 }
0x141a   : > { %v3031_v26 = vpop.xlane.xlu1 %3030  ;;  %v2802_v27 = vmul.f32 %v5686_v23, %v5674_v43 }
0x141b   : > { %5691 = vrcp.f32 %v3031_v26 }
0x141d   : > { %v5688_v30 = vpop.eup %5687 }
0x141e   : > { %v3034_v14 = vpop.xlane.xlu0 %3033  ;;  %v5578_v18 = vpop.permute.xlu1 %5577  ;;  %v2803_v31 = vmul.f32 %v5688_v30, %v5676_v56 }
0x141f   : > { %v5580_v24 = vunpack.i.h.bf16 %v5578_v18  ;;  %v5579_v25 = vunpack.i.l.bf16 %v5578_v18  ;;  %5693 = vrcp.f32 %v3034_v14 }
0x1421   : > { %v5458_v17 = vpack.c.bf16 %v5580_v24, %v5579_v25  ;;  %v5690_v32 = vpop.eup %5689 }
0x1422   : > { %v3037_v20 = vpop.xlane.xlu0 %3036  ;;  %v3049_v19 = vpop.permute.xlu1 %3048  ;;  %v2804_v15 = vmul.f32 %v5690_v32, %v5678_v61 }
0x1423   : > { %5695 = vrcp.f32 %v3037_v20 }
0x1425   : > { %v5692_v22 = vpop.eup %5691 }
0x1426   : > { %v2810_v28 = vpop.permute.xlu0 %2809  ;;  %v3041_v33 = vmul.f32 %v5692_v22, %v5680_v4  ;;  %v5583_v48 = vpop.permute.xlu1 %5582 }
0x1427   : > { %5176 = vmatpush3.msk.msra.mxu1 %vm1028_vm8, %v2810_v28  ;;  %v5585_v43 = vunpack.i.h.bf16 %v5583_v48  ;;  %v5584_v44 = vunpack.i.l.bf16 %v5583_v48 }
0x1428   : > { %5178 = vmatmul.mubr.msk.f32.vlgmr.msra.gmra.mrb[54].mxu1 %vm976_vm6, %v2802_v27  ;;  %5457 = vmatprep.subr.bf16.mxu1 %v5747_v3 }
0x1429   : > { %5459 = vmatpush3.bf16.msra.mxu1 %v5458_v17  ;;  %5180 = vmatprep.mubr.msk.f32.mxu1 %vm5748_vm0, %v5749_v6  ;;  %v5694_v42 = vpop.eup %5693  ;;  %v5461_v53 = vpack.c.bf16 %v5585_v43, %v5584_v44 }
0x142a   : > { %5205 = vmatprep.subr.mxu1 %v5749_v6  ;;  %v3042_v34 = vmul.f32 %v5694_v42, %v5682_v7  ;;  %v3332_v61 = vpop.permute.xlu1 %3331  ;;  %v3322_v63 = vpop.permute.xlu0 %3321 }
0x142c   : > { %5181 = vmatmul.mubr.msk.f32.gmra.mrb[56].mxu1 %vm976_vm6, %v2803_v31 }
0x142d   : > { %5206 = vmatpush3.msk.msra.mxu1 %vm1028_vm8, %v3049_v19  ;;  %5183 = vmatprep.mubr.msk.f32.mxu1 %vm5748_vm0, %v5749_v6  ;;  %v5696_v35 = vpop.eup %5695 }
0x142e   : > { %5227 = vmatprep.subr.mxu1 %v5749_v6  ;;  %v3043_v45 = vmul.f32 %v5696_v35, %v5684_v9  ;;  %v3324_v1 = vpop.permute.xlu1 %3323  ;;  %v3326_v2 = vpop.permute.xlu0 %3325 }
0x1430   : > { %5184 = vmatmul.mubr.msk.f32.gmra.mrb[58].mxu1 %vm976_vm6, %v2804_v15 }
0x1431   : > { %5207 = vmatprep.mubr.msk.f32.mxu1 %vm5748_vm0, %v5749_v6 }
0x1434   : > { %5208 = vmatmul.mubr.msk.f32.vlgmr.msra.gmra.mrb[60].mxu1 %vm976_vm6, %v3041_v33 }
0x1435   : > { %5210 = vmatprep.mubr.msk.f32.mxu1 %vm5748_vm0, %v5749_v6  ;;  %5228 = vmatpush3.msra.mxu1 %v4609_v36 }
0x1436   : > { %5464 = vmatprep.subr.bf16.mxu1 %v5747_v3 }
0x1438   : > { %5211 = vmatmul.mubr.msk.f32.gmra.mrb[62].mxu1 %vm976_vm6, %v3042_v34 }
0x1439   : > { %5213 = vmatprep.mubr.msk.f32.mxu1 %vm5748_vm0, %v5749_v6 }
0x143c   : > { %5214 = vmatmul.mubr.msk.f32.gmra.mrb[64].mxu1 %vm976_vm6, %v3043_v45 }
0x143d   : > { %5229 = vmatprep.mubr.msk.f32.mxu1 %vm5748_vm0, %v5749_v6 }
0x14fb   : > { %v2890_v38 = vpop.f32.mrb[54].mxu1 }
0x14fc   : > { %v5179_v39 = vpop.f32.mrb[55].mxu1  ;;  %5230 = vmatmul.mubr.msk.f32.vlgmr.msra.gmra.mrb[66].mxu1 %vm880_vm4, %v2890_v38 }
0x14fd   : > { %5232 = vmatprep.mubr.msk.f32.mxu1 %vm5748_vm0, %v5749_v6 }
0x14ff   : > { %v2895_v40 = vpop.f32.mrb[56].mxu1 }
0x1500   : > { %v5182_v41 = vpop.f32.mrb[57].mxu1  ;;  %5233 = vmatmul.mubr.msk.f32.gmra.mrb[68].mxu1 %vm880_vm4, %v2895_v40 }
0x1501   : > { %5235 = vmatprep.mubr.msk.f32.mxu1 %vm5748_vm0, %v5749_v6 }
0x1503   : > { %v2900_v46 = vpop.f32.mrb[58].mxu1 }
0x1504   : > { %v5185_v51 = vpop.f32.mrb[59].mxu1  ;;  %5236 = vmatmul.mubr.msk.f32.gmra.mrb[70].mxu1 %vm880_vm4, %v2900_v46 }
0x1505   : > { %5259 = vmatprep.mubr.msk.f32.mxu1 %vm5748_vm0, %v5749_v6 }
0x1507   : > { %v3129_v56 = vpop.f32.mrb[60].mxu1 }
0x1508   : > { %v5209_v57 = vpop.f32.mrb[61].mxu1  ;;  %5219 = vmatmul.mubr.msk.f32.vlgmr.msra.gmra.mrb[60].mxu0 %vm880_vm4, %v3129_v56 }
0x1509   : > { %5463 = vmatpush3.bf16.xpose.msk.msra.mxu0 %vm5998_vm5, %v5461_v53  ;;  %5221 = vmatprep.mubr.msk.f32.mxu0 %vm5748_vm0, %v5749_v6 }
0x150a   : > { %5242 = vmatprep.subr.mxu0 %v5749_v6 }
0x150b   : > { %v3134_v58 = vpop.f32.mrb[62].mxu1 }
0x150c   : > { %v5212_v0 = vpop.f32.mrb[63].mxu1  ;;  %5222 = vmatmul.mubr.msk.f32.gmra.mrb[62].mxu0 %vm880_vm4, %v3134_v58 }
0x150d   : > { %5224 = vmatprep.mubr.msk.f32.mxu0 %vm5748_vm0, %v5749_v6 }
0x150f   : > { %v3139_v60 = vpop.f32.mrb[64].mxu1 }
0x1510   : > { %v5215_v62 = vpop.f32.mrb[65].mxu1  ;;  %5225 = vmatmul.mubr.msk.f32.gmra.mrb[64].mxu0 %vm880_vm4, %v3139_v60 }
0x1511   : > { %5243 = vmatpush3.xpose.msk.msra.mxu0 %vm880_vm4, %v3332_v61  ;;  %5244 = vmatprep.mubr.msk.f32.mxu0 %vm5748_vm0, %v5749_v6 }
0x1512   : > { %5268 = vmatprep.subr.mxu0 %v5749_v6 }
0x1514   : > { %5245 = vmatmul.mubr.msk.f32.vlgmr.msra.gmra.mrb[66].mxu0 %vm880_vm4, %v3322_v63 }
0x1515   : > { %5247 = vmatprep.mubr.msk.f32.mxu0 %vm5748_vm0, %v5749_v6 }
0x1518   : > { %5248 = vmatmul.mubr.msk.f32.gmra.mrb[68].mxu0 %vm880_vm4, %v3324_v1 }
0x1519   : > { %5250 = vmatprep.mubr.msk.f32.mxu0 %vm5748_vm0, %v5749_v6 }
0x151c   : > { %5251 = vmatmul.mubr.msk.f32.gmra.mrb[70].mxu0 %vm880_vm4, %v3326_v2 }
0x151d   : > { %5270 = vmatprep.mubr.msk.f32.mxu0 %vm5748_vm0, %v5749_v6 }
0x15cf   : > { %v3307_v5 = vpop.f32.mrb[66].mxu1 }
0x15d0   : > { %v5231_v4 = vpop.f32.mrb[67].mxu1 }
0x15d3   : > { %v3312_v16 = vpop.f32.mrb[68].mxu1 }
0x15d4   : > { %v5234_v21 = vpop.f32.mrb[69].mxu1 }
0x15d7   : > { %v3317_v7 = vpop.f32.mrb[70].mxu1 }
0x15d8   : > { %v5237_v8 = vpop.f32.mrb[71].mxu1 }
0x15db   : > { %v3218_v9 = vpop.f32.mrb[60].mxu0 }
0x15dc   : > { %v6528_v10 = vadd.f32 %v3307_v5, %v3218_v9  ;;  %v5220_v11 = vpop.f32.mrb[61].mxu0 }
0x15dd   : > { %v4611_v11 = vld [vmem:[%s6779_s7 + $0x30] sm:$0xff] }
0x15de   : > { %5269 = vmatpush3.msra.mxu0 %v4611_v11 }
0x15df   : > { %v3223_v12 = vpop.f32.mrb[62].mxu0  ;;  %5471 = vmatprep.subr.bf16.mxu0 %v5747_v3 }
0x15e0   : > { %v6530_v13 = vadd.f32 %v3312_v16, %v3223_v12  ;;  %v5223_v26 = vpop.f32.mrb[63].mxu0 }
0x15e3   : > { %v3228_v14 = vpop.f32.mrb[64].mxu0 }
0x15e4   : > { %v6532_v18 = vadd.f32 %v3317_v7, %v3228_v14  ;;  %v5226_v20 = vpop.f32.mrb[65].mxu0 }
0x15e7   : > { %v3411_v23 = vpop.f32.mrb[66].mxu0 }
0x15e8   : > { %v3425_v24 = vmul.f32 0.35355338, %v3411_v23  ;;  %v5246_v25 = vpop.f32.mrb[67].mxu0 }
0x15ea   : > { %v3428_v27 = vsel %vm976_vm6, %v3425_v24, -inf }
0x15eb   : > { %3429 = vmax.xlane.f32.xlu1 %v3428_v27  ;;  %v3416_v28 = vpop.f32.mrb[68].mxu0 }
0x15ec   : > { %v3426_v30 = vmul.f32 0.35355338, %v3416_v28  ;;  %v5249_v17 = vpop.f32.mrb[69].mxu0 }
0x15ee   : > { %v3431_v31 = vsel %vm976_vm6, %v3426_v30, -inf }
0x15ef   : > { %3432 = vmax.xlane.f32.xlu0 %v3431_v31  ;;  %v3421_v32 = vpop.f32.mrb[70].mxu0 }
0x15f0   : > { %v3427_v19 = vmul.f32 0.35355338, %v3421_v32  ;;  %v5252_v15 = vpop.f32.mrb[71].mxu0 }
0x15f2   : > { %v3434_v22 = vsel %vm983_vm7, %v3427_v19, -inf }
0x15f3   : > { %3435 = vmax.xlane.f32.xlu0 %v3434_v22 }
0x15fc   : > { %5587 = vrot.lane.b32.xlu1 %v6385_v52, %s6829_s23 }
0x1678   : > { %v3430_v33 = vpop.xlane.xlu1 %3429 }
0x1679   : > { %v3437_v42 = vsub.f32 %v3425_v24, %v3430_v33 }
0x167b   : > { %v3440_v34 = vmul.f32 1.442695, %v3437_v42 }
0x167c   : > { %v5588_v35 = vpop.permute.xlu1 %5587  ;;  %v3433_v45 = vpop.xlane.xlu0 %3432 }
0x167d   : > { %5697 = vpow2.f32 %v3440_v34  ;;  %v5590_v36 = vunpack.i.h.bf16 %v5588_v35  ;;  %v5589_v37 = vunpack.i.l.bf16 %v5588_v35  ;;  %v3438_v38 = vsub.f32 %v3426_v30, %v3433_v45 }
0x167f   : > { %v5465_v39 = vpack.c.bf16 %v5590_v36, %v5589_v37  ;;  %v3442_v40 = vmul.f32 1.442695, %v3438_v38 }
0x1680   : > { %v3436_v48 = vpop.xlane.xlu0 %3435 }
0x1681   : > { %5699 = vpow2.f32 %v3442_v40  ;;  %v3439_v41 = vsub.f32 %v3427_v19, %v3436_v48  ;;  %5466 = vmatpush3.bf16.msra.mxu1 %v5465_v39 }
0x1682   : > { %5257 = vmatprep.subr.mxu1 %v5749_v6 }
0x1683   : > { %v3444_v43 = vmul.f32 1.442695, %v3439_v41 }
0x1685   : > { %5701 = vpow2.f32 %v3444_v43 }
0x1687   : > { %v5698_v44 = vpop.eup %5697 }
0x1688   : > { %v3446_v46 = vsel %vm976_vm6, %v5698_v44, 0.0 }
0x1689   : > { %3447 = vadd.xlane.f32.xlu0 %v3446_v46 }
0x168b   : > { %v5700_v51 = vpop.eup %5699 }
0x168c   : > { %v3449_v53 = vsel %vm976_vm6, %v5700_v51, 0.0 }
0x168d   : > { %3450 = vadd.xlane.f32.xlu1 %v3449_v53 }
0x168f   : > { %v5702_v56 = vpop.eup %5701 }
0x1690   : > { %v3452_v57 = vsel %vm983_vm7, %v5702_v56, 0.0 }
0x1691   : > { %3453 = vadd.xlane.f32.xlu0 %v3452_v57 }
0x169e   : > { %5592 = vrot.lane.b32.xlu1 %v6385_v52, %s6830_s2 }
0x16a2   : > { %3662 = vrot.lane.b32.xlu1 %v6387_v55, %s6830_s2 }
0x16a6   : > { %3652 = vrot.lane.b32.xlu1 %v6379_v47, %s6831_s25 }
0x16a7   : > { %3465 = vrot.lane.b32.xlu0 %v6387_v55, %s6829_s23 }
0x16aa   : > { %3656 = vrot.lane.b32.xlu1 %v6387_v55, %s6831_s25 }
0x16ab   : > { %3654 = vrot.lane.b32.xlu0 %v6381_v50, %s6831_s25 }
0x1716   : > { %v3448_v58 = vpop.xlane.xlu0 %3447 }
0x1717   : > { %5703 = vrcp.f32 %v3448_v58 }
0x171a   : > { %v3451_v0 = vpop.xlane.xlu1 %3450 }
0x171b   : > { %5705 = vrcp.f32 %v3451_v0 }
0x171e   : > { %v3454_v60 = vpop.xlane.xlu0 %3453  ;;  %v5593_v62 = vpop.permute.xlu1 %5592 }
0x171f   : > { %5707 = vrcp.f32 %v3454_v60  ;;  %v5595_v47 = vunpack.i.h.bf16 %v5593_v62  ;;  %v5594_v2 = vunpack.i.l.bf16 %v5593_v62  ;;  %v4612_v62 = vld [vmem:[%s6779_s7 + $0x38] sm:$0xff] }
0x1721   : > { %v5704_v61 = vpop.eup %5703  ;;  %v5468_v4 = vpack.c.bf16 %v5595_v47, %v5594_v2 }
0x1722   : > { %v3458_v63 = vmul.f32 %v5704_v61, %v5698_v44  ;;  %v3466_v1 = vpop.permute.xlu0 %3465  ;;  %v3663_v7 = vpop.permute.xlu1 %3662 }
0x1723   : > { %5258 = vmatpush3.msk.msra.mxu1 %vm1028_vm8, %v3466_v1 }
0x1724   : > { %5260 = vmatmul.mubr.msk.f32.vlgmr.msra.gmra.mrb[72].mxu1 %vm976_vm6, %v3458_v63  ;;  %5467 = vmatprep.subr.bf16.mxu1 %v5747_v3 }
0x1725   : > { %v5706_v5 = vpop.eup %5705  ;;  %5262 = vmatprep.mubr.msk.f32.mxu1 %vm5748_vm0, %v5749_v6 }
0x1726   : > { %v3459_v50 = vmul.f32 %v5706_v5, %v5700_v51  ;;  %v3653_v8 = vpop.permute.xlu1 %3652  ;;  %v3655_v29 = vpop.permute.xlu0 %3654 }
0x1728   : > { %5263 = vmatmul.mubr.msk.f32.gmra.mrb[74].mxu1 %vm976_vm6, %v3459_v50 }
0x1729   : > { %v5708_v16 = vpop.eup %5707  ;;  %5265 = vmatprep.mubr.msk.f32.mxu1 %vm5748_vm0, %v5749_v6 }
0x172a   : > { %5470 = vmatpush3.bf16.xpose.msk.msra.mxu1 %vm5998_vm5, %v5468_v4  ;;  %v3460_v21 = vmul.f32 %v5708_v16, %v5702_v56  ;;  %v3657_v9 = vpop.permute.xlu1 %3656 }
0x172b   : > { %5283 = vmatprep.subr.mxu1 %v5749_v6 }
0x172c   : > { %5266 = vmatmul.mubr.msk.f32.gmra.mrb[76].mxu1 %vm976_vm6, %v3460_v21 }
0x172d   : > { %5285 = vmatprep.mubr.msk.f32.mxu1 %vm5748_vm0, %v5749_v6 }
0x1732   : > { %5284 = vmatpush3.xpose.msk.msra.mxu1 %vm880_vm4, %v3663_v7 }
0x1733   : > { %5309 = vmatprep.subr.mxu1 %v5749_v6 }
0x1735   : > { %5286 = vmatmul.mubr.msk.f32.vlgmr.msra.gmra.mrb[78].mxu1 %vm880_vm4, %v3653_v8 }
0x1736   : > { %5288 = vmatprep.mubr.msk.f32.mxu1 %vm5748_vm0, %v5749_v6  ;;  %5310 = vmatpush3.msra.mxu1 %v4612_v62  ;;  %v4674_v62 = vld [vmem:[%s6783_s11 + $0x38] sm:$0xff] }
0x1737   : > { %5480 = vmatprep.subr.bf16.mxu1 %v5747_v3 }
0x1739   : > { %5289 = vmatmul.mubr.msk.f32.gmra.mrb[80].mxu1 %vm880_vm4, %v3655_v29 }
0x173a   : > { %5291 = vmatprep.mubr.msk.f32.mxu1 %vm5748_vm0, %v5749_v6 }
0x173d   : > { %5292 = vmatmul.mubr.msk.f32.gmra.mrb[82].mxu1 %vm880_vm4, %v3657_v9 }
0x173e   : > { %5311 = vmatprep.mubr.msk.f32.mxu1 %vm5748_vm0, %v5749_v6 }
0x17f7   : > { %v3546_v12 = vpop.f32.mrb[72].mxu1 }
0x17f8   : > { %v5261_v26 = vpop.f32.mrb[73].mxu1  ;;  %5271 = vmatmul.mubr.msk.f32.vlgmr.msra.gmra.mrb[72].mxu0 %vm880_vm4, %v3546_v12 }
0x17f9   : > { %5273 = vmatprep.mubr.msk.f32.mxu0 %vm5748_vm0, %v5749_v6 }
0x17fb   : > { %v3551_v14 = vpop.f32.mrb[74].mxu1 }
0x17fc   : > { %v5264_v20 = vpop.f32.mrb[75].mxu1  ;;  %5274 = vmatmul.mubr.msk.f32.gmra.mrb[74].mxu0 %vm880_vm4, %v3551_v14 }
0x17fd   : > { %5276 = vmatprep.mubr.msk.f32.mxu0 %vm5748_vm0, %v5749_v6 }
0x17ff   : > { %v3556_v23 = vpop.f32.mrb[76].mxu1 }
0x1800   : > { %v5267_v24 = vpop.f32.mrb[77].mxu1  ;;  %5277 = vmatmul.mubr.msk.f32.gmra.mrb[76].mxu0 %vm880_vm4, %v3556_v23 }
0x1801   : > { %5300 = vmatprep.mubr.msk.f32.mxu0 %vm5748_vm0, %v5749_v6 }
0x1808   : > { %v3742_v25 = vpop.f32.mrb[78].mxu1 }
0x1809   : > { %v3756_v27 = vmul.f32 0.35355338, %v3742_v25  ;;  %v5287_v28 = vpop.f32.mrb[79].mxu1 }
0x180b   : > { %v3759_v30 = vsel %vm976_vm6, %v3756_v27, -inf }
0x180c   : > { %3760 = vmax.xlane.f32.xlu0 %v3759_v30  ;;  %v3747_v17 = vpop.f32.mrb[80].mxu1 }
0x180d   : > { %v3757_v31 = vmul.f32 0.35355338, %v3747_v17  ;;  %v5290_v32 = vpop.f32.mrb[81].mxu1 }
0x180f   : > { %v3762_v19 = vsel %vm976_vm6, %v3757_v31, -inf }
0x1810   : > { %3763 = vmax.xlane.f32.xlu1 %v3762_v19  ;;  %v3752_v15 = vpop.f32.mrb[82].mxu1 }
0x1811   : > { %v3758_v22 = vmul.f32 0.35355338, %v3752_v15  ;;  %v5293_v33 = vpop.f32.mrb[83].mxu1 }
0x1813   : > { %v3765_v42 = vsel %vm983_vm7, %v3758_v22, -inf }
0x1814   : > { %3766 = vmax.xlane.f32.xlu0 %v3765_v42 }
0x1899   : > { %v3761_v34 = vpop.xlane.xlu0 %3760 }
0x189a   : > { %v3768_v35 = vsub.f32 %v3756_v27, %v3761_v34  ;;  %v4666_v27 = vld [vmem:[%s6780_s8 + $0x1] ss:$0 sm:$0xff] }
0x189c   : > { %v3771_v45 = vmul.f32 1.442695, %v3768_v35 }
0x189d   : > { %v3764_v36 = vpop.xlane.xlu1 %3763 }
0x189e   : > { %5709 = vpow2.f32 %v3771_v45  ;;  %v3769_v37 = vsub.f32 %v3757_v31, %v3764_v36 }
0x18a0   : > { %v3773_v38 = vmul.f32 1.442695, %v3769_v37 }
0x18a1   : > { %v3767_v39 = vpop.xlane.xlu0 %3766 }
0x18a2   : > { %5711 = vpow2.f32 %v3773_v38  ;;  %v3770_v40 = vsub.f32 %v3758_v22, %v3767_v39 }
0x18a4   : > { %v3775_v48 = vmul.f32 1.442695, %v3770_v40 }
0x18a6   : > { %5713 = vpow2.f32 %v3775_v48 }
0x18a8   : > { %v5710_v41 = vpop.eup %5709 }
0x18a9   : > { %v3777_v43 = vsel %vm976_vm6, %v5710_v41, 0.0 }
0x18aa   : > { %3778 = vadd.xlane.f32.xlu0 %v3777_v43 }
0x18ac   : > { %v5712_v44 = vpop.eup %5711 }
0x18ad   : > { %v3780_v46 = vsel %vm976_vm6, %v5712_v44, 0.0 }
0x18ae   : > { %3781 = vadd.xlane.f32.xlu0 %v3780_v46 }
0x18b0   : > { %v5714_v51 = vpop.eup %5713 }
0x18b1   : > { %v3783_v53 = vsel %vm983_vm7, %v5714_v51, 0.0 }
0x18b2   : > { %3784 = vadd.xlane.f32.xlu1 %v3783_v53 }
0x18c3   : > { %3796 = vrot.lane.b32.xlu1 %v6387_v55, %s6832_s29 }
0x18c4   : > { %5597 = vrot.lane.b32.xlu0 %v6385_v52, %s6832_s29 }
0x18cb   : > { %v3635_v56 = vpop.f32.mrb[72].mxu0 }
0x18cc   : > { %v3649_v57 = vadd.f32 %v3635_v56, %v6528_v10  ;;  %v5272_v58 = vpop.f32.mrb[73].mxu0 }
0x18cd   : > { %v4671_v58 = vld [vmem:[%s6783_s11 + $0x20] sm:$0xff] }
0x18cf   : > { %v3640_v0 = vpop.f32.mrb[74].mxu0 }
0x18d0   : > { %v3650_v60 = vadd.f32 %v3640_v0, %v6530_v13  ;;  %v5275_v61 = vpop.f32.mrb[75].mxu0  ;;  %v4672_v0 = vld [vmem:[%s6783_s11 + $0x28] sm:$0xff] }
0x18d1   : > { %v4673_v61 = vld [vmem:[%s6783_s11 + $0x30] sm:$0xff] }
0x18d3   : > { %v3645_v63 = vpop.f32.mrb[76].mxu0 }
0x18d4   : > { %v3651_v55 = vadd.f32 %v3645_v63, %v6532_v18  ;;  %v5278_v1 = vpop.f32.mrb[77].mxu0  ;;  %v5478_v63 = vpack.c.bf16 %v4674_v62, %v4673_v61 }
0x1937   : > { %v3779_v52 = vpop.xlane.xlu0 %3778 }
0x1938   : > { %5715 = vrcp.f32 %v3779_v52 }
0x193b   : > { %v3782_v47 = vpop.xlane.xlu0 %3781 }
0x193c   : > { %5717 = vrcp.f32 %v3782_v47 }
0x193f   : > { %v3785_v10 = vpop.xlane.xlu1 %3784  ;;  %v5598_v2 = vpop.permute.xlu0 %5597 }
0x1940   : > { %v5600_v5 = vunpack.i.h.bf16 %v5598_v2  ;;  %v5599_v13 = vunpack.i.l.bf16 %v5598_v2  ;;  %5719 = vrcp.f32 %v3785_v10 }
0x1942   : > { %v5472_v50 = vpack.c.bf16 %v5600_v5, %v5599_v13  ;;  %v5716_v4 = vpop.eup %5715 }
0x1943   : > { %v3789_v16 = vmul.f32 %v5716_v4, %v5710_v41  ;;  %v3797_v21 = vpop.permute.xlu1 %3796 }
0x1944   : > { %5473 = vmatpush3.bf16.msra.mxu0 %v5472_v50 }
0x1945   : > { %5298 = vmatprep.subr.mxu0 %v5749_v6 }
0x1946   : > { %v5718_v7 = vpop.eup %5717 }
0x1947   : > { %v3790_v18 = vmul.f32 %v5718_v7, %v5712_v44  ;;  %v4670_v7 = vld [vmem:[%s6782_s10 + $0x1] ss:$0 sm:$0xff] }
0x1948   : > { %5299 = vmatpush3.msk.msra.mxu0 %vm1028_vm8, %v3797_v21 }
0x1949   : > { %5301 = vmatmul.mubr.msk.f32.vlgmr.msra.gmra.mrb[78].mxu0 %vm976_vm6, %v3789_v16  ;;  %5474 = vmatprep.subr.bf16.mxu0 %v5747_v3  ;;  %v4669_v16 = vld [vmem:[%s6781_s9 + $0x1] ss:$0 sm:$0xff] }
0x194a   : > { %5303 = vmatprep.mubr.msk.f32.mxu0 %vm5748_vm0, %v5749_v6  ;;  %v5720_v8 = vpop.eup %5719 }
0x194b   : > { %v3791_v29 = vmul.f32 %v5720_v8, %v5714_v51 }
0x194d   : > { %5304 = vmatmul.mubr.msk.f32.gmra.mrb[80].mxu0 %vm976_vm6, %v3790_v18 }
0x194e   : > { %5306 = vmatprep.mubr.msk.f32.mxu0 %vm5748_vm0, %v5749_v6 }
0x1951   : > { %5307 = vmatmul.mubr.msk.f32.gmra.mrb[82].mxu0 %vm976_vm6, %v3791_v29 }
0x1952   : > { %5328 = vmatprep.mubr.msk.f32.mxu0 %vm5748_vm0, %v5749_v6 }
0x1a1c   : > { %v3877_v9 = vpop.f32.mrb[78].mxu0 }
0x1a1d   : > { %v5302_v11 = vpop.f32.mrb[79].mxu0  ;;  %5312 = vmatmul.mubr.msk.f32.vlgmr.msra.gmra.mrb[84].mxu1 %vm880_vm4, %v3877_v9 }
0x1a1e   : > { %5314 = vmatprep.mubr.msk.f32.mxu1 %vm5748_vm0, %v5749_v6 }
0x1a20   : > { %v3882_v12 = vpop.f32.mrb[80].mxu0 }
0x1a21   : > { %v5305_v26 = vpop.f32.mrb[81].mxu0  ;;  %5315 = vmatmul.mubr.msk.f32.gmra.mrb[86].mxu1 %vm880_vm4, %v3882_v12 }
0x1a22   : > { %5317 = vmatprep.mubr.msk.f32.mxu1 %vm5748_vm0, %v5749_v6 }
0x1a24   : > { %v3887_v14 = vpop.f32.mrb[82].mxu0 }
0x1a25   : > { %v5308_v20 = vpop.f32.mrb[83].mxu0  ;;  %5318 = vmatmul.mubr.msk.f32.gmra.mrb[88].mxu1 %vm880_vm4, %v3887_v14 }
0x1a26   : > { %5353 = vmatprep.mubr.msk.f32.mxu1 %vm5748_vm0, %v5749_v6 }
0x1af0   : > { %v3966_v23 = vpop.f32.mrb[84].mxu1 }
0x1af1   : > { %v3980_v24 = vadd.f32 %v3966_v23, %v3649_v57  ;;  %v5313_v25 = vpop.f32.mrb[85].mxu1 }
0x1af2   : > { %v4681_v25 = vld [vmem:[%s6785_s13 + $0x48] sm:$0xff] }
0x1af3   : > { %v3983_v28 = vadd.f32 %v3980_v24, %v6327_v49  ;;  %v4680_v24 = vld [vmem:[%s6785_s13 + $0x40] sm:$0xff] }
0x1af4   : > { %v3971_v30 = vpop.f32.mrb[86].mxu1 }
0x1af5   : > { %v6635_v17 = vadd.f32 %v4666_v27, %v3983_v28  ;;  %v3981_v31 = vadd.f32 %v3971_v30, %v3650_v60  ;;  %v5316_v32 = vpop.f32.mrb[87].mxu1  ;;  %v5475_v60 = vpack.c.bf16 %v4672_v0, %v4671_v58  ;;  %v4682_v28 = vld [vmem:[%s6785_s13 + $0x50] sm:$0xff]  ;;  %v4683_v30 = vld [vmem:[%s6785_s13 + $0x58] sm:$0xff] }
0x1af6   : > { %v4684_v32 = vld [vmem:[%s6785_s13 + $0x60] sm:$0xff] }
0x1af7   : > { %v3984_v19 = vadd.f32 %v3981_v31, %v6332_v54  ;;  %v4001_v15 = vsel %vm707_vm2, %v6635_v17, 0.0  ;;  %5476 = vmatpush3.bf16.msra.mxu0 %v5475_v60  ;;  %v5484_v31 = vpack.c.bf16 %v4683_v30, %v4682_v28 }
0x1af8   : > { %4002 = vadd.xlane.f32.xlu1 %v4001_v15  ;;  %v3976_v22 = vpop.f32.mrb[88].mxu1  ;;  %5477 = vmatprep.subr.bf16.mxu0 %v5747_v3 }
0x1af9   : > { %v6640_v33 = vadd.f32 %v4666_v27, %v3984_v19  ;;  %v3982_v42 = vadd.f32 %v3976_v22, %v3651_v55  ;;  %v5319_v34 = vpop.f32.mrb[89].mxu1  ;;  %v4685_v19 = vld [vmem:[%s6785_s13 + $0x68] sm:$0xff]  ;;  %v4686_v22 = vld [vmem:[%s6785_s13 + $0x70] sm:$0xff] }
0x1afa   : > { %v5487_v15 = vpack.c.bf16 %v4685_v19, %v4684_v32 }
0x1afb   : > { %v3985_v35 = vadd.f32 %v3982_v42, %v6337_v59  ;;  %v4004_v49 = vsel %vm707_vm2, %v6640_v33, 0.0  ;;  %5479 = vmatpush3.bf16.msra.mxu0 %v5478_v63  ;;  %v4687_v42 = vld [vmem:[%s6785_s13 + $0x78] sm:$0xff] }
0x1afc   : > { %4005 = vadd.xlane.f32.xlu0 %v4004_v49  ;;  %5492 = vmatprep.subr.bf16.mxu0 %v5747_v3  ;;  %v5490_v34 = vpack.c.bf16 %v4687_v42, %v4686_v22 }
0x1afd   : > { %v6645_v45 = vadd.f32 %v4666_v27, %v3985_v35  ;;  %v5481_v27 = vpack.c.bf16 %v4681_v25, %v4680_v24  ;;  %v4676_v35 = vld [vmem:[%s6784_s12 + $0x1] ss:$0 sm:$0xff] }
0x1aff   : > { %v4007_v54 = vsel %vm714_vm3, %v6645_v45, 0.0  ;;  %5482 = vmatpush3.bf16.msra.mxu1 %v5481_v27 }
0x1b00   : > { %4008 = vadd.xlane.f32.xlu0 %v4007_v54  ;;  %5483 = vmatprep.subr.bf16.mxu1 %v5747_v3 }
0x1b03   : > { %5485 = vmatpush3.bf16.msra.mxu1 %v5484_v31 }
0x1b04   : > { %5486 = vmatprep.subr.bf16.mxu1 %v5747_v3 }
0x1b07   : > { %5488 = vmatpush3.bf16.msra.mxu1 %v5487_v15 }
0x1b08   : > { %5489 = vmatprep.subr.bf16.mxu1 %v5747_v3 }
0x1b0b   : > { %5491 = vmatpush3.bf16.msra.mxu1 %v5490_v34 }
0x1b85   : > { %v4003_v36 = vpop.xlane.xlu1 %4002 }
0x1b86   : > { %v4010_v37 = vmul.f32 0.03125, %v4003_v36 }
0x1b88   : > { %v4013_v38 = vsub.f32 %v6635_v17, %v4010_v37 }
0x1b89   : > { %v4006_v39 = vpop.xlane.xlu0 %4005 }
0x1b8a   : > { %v4011_v40 = vmul.f32 0.03125, %v4006_v39  ;;  %v4016_v48 = vmul.f32 %v4013_v38, %v4013_v38 }
0x1b8c   : > { %v4014_v41 = vsub.f32 %v6640_v33, %v4011_v40  ;;  %v4019_v59 = vsel %vm707_vm2, %v4016_v48, 0.0 }
0x1b8d   : > { %4020 = vadd.xlane.f32.xlu1 %v4019_v59  ;;  %v4009_v43 = vpop.xlane.xlu0 %4008 }
0x1b8e   : > { %v4012_v44 = vmul.f32 0.03125, %v4009_v43  ;;  %v4017_v46 = vmul.f32 %v4014_v41, %v4014_v41 }
0x1b90   : > { %v4015_v51 = vsub.f32 %v6645_v45, %v4012_v44  ;;  %v4022_v53 = vsel %vm707_vm2, %v4017_v46, 0.0 }
0x1b91   : > { %4023 = vadd.xlane.f32.xlu0 %v4022_v53 }
0x1b92   : > { %v4018_v56 = vmul.f32 %v4015_v51, %v4015_v51 }
0x1b94   : > { %v4025_v57 = vsel %vm714_vm3, %v4018_v56, 0.0 }
0x1b95   : > { %4026 = vadd.xlane.f32.xlu1 %v4025_v57 }
0x1c1a   : > { %v4021_v55 = vpop.xlane.xlu1 %4020 }
0x1c1b   : > { %v4028_v1 = vmul.f32 0.03125, %v4021_v55 }
0x1c1d   : > { %v4031_v52 = vadd.f32 1e-12, %v4028_v1 }
0x1c1e   : > { %v4024_v47 = vpop.xlane.xlu0 %4023 }
0x1c1f   : > { %5721 = vrsqrt.f32 %v4031_v52  ;;  %v4029_v10 = vmul.f32 0.03125, %v4024_v47 }
0x1c21   : > { %v4032_v2 = vadd.f32 1e-12, %v4029_v10 }
0x1c22   : > { %v4027_v5 = vpop.xlane.xlu1 %4026 }
0x1c23   : > { %5723 = vrsqrt.f32 %v4032_v2  ;;  %v4030_v13 = vmul.f32 0.03125, %v4027_v5 }
0x1c25   : > { %v4033_v50 = vadd.f32 1e-12, %v4030_v13 }
0x1c27   : > { %5725 = vrsqrt.f32 %v4033_v50 }
0x1c29   : > { %v5722_v4 = vpop.eup %5721 }
0x1c2a   : > { %v4037_v21 = vmul.f32 %v5722_v4, %v4013_v38 }
0x1c2c   : > { %v4046_v18 = vmul.f32 %v4669_v16, %v4037_v21 }
0x1c2d   : > { %v5724_v8 = vpop.eup %5723 }
0x1c2e   : > { %v4055_v29 = vadd.f32 %v4670_v7, %v4046_v18  ;;  %v4038_v9 = vmul.f32 %v5724_v8, %v4014_v41  ;;  %v4692_v8 = vld [vmem:[%s6786_s14 + $0x1] ss:$0 sm:$0xff] }
0x1c30   : > { %5329 = vmatmul.mubr.msk.f32.vlgmr.msra.gmra.mrb[84].mxu0 %vm707_vm2, %v4055_v29  ;;  %v4047_v11 = vmul.f32 %v4669_v16, %v4038_v9 }
0x1c31   : > { %v5726_v12 = vpop.eup %5725  ;;  %5331 = vmatprep.mubr.msk.f32.mxu0 %vm5748_vm0, %v5749_v6 }
0x1c32   : > { %v4056_v26 = vadd.f32 %v4670_v7, %v4047_v11  ;;  %v4039_v14 = vmul.f32 %v5726_v12, %v4015_v51 }
0x1c34   : > { %5332 = vmatmul.mubr.msk.f32.gmra.mrb[86].mxu0 %vm707_vm2, %v4056_v26  ;;  %v4048_v20 = vmul.f32 %v4669_v16, %v4039_v14 }
0x1c35   : > { %5334 = vmatprep.mubr.msk.f32.mxu0 %vm5748_vm0, %v5749_v6 }
0x1c36   : > { %v4057_v23 = vadd.f32 %v4670_v7, %v4048_v20 }
0x1c38   : > { %5335 = vmatmul.mubr.msk.f32.gmra.mrb[88].mxu0 %vm707_vm2, %v4057_v23 }
0x1c39   : > { %5370 = vmatprep.mubr.msk.f32.mxu0 %vm5748_vm0, %v5749_v6 }
0x1d03   : > { %v4146_v49 = vpop.f32.mrb[84].mxu0 }
0x1d04   : > { %v4147_v54 = vadd.f32 %v4676_v35, %v4146_v49  ;;  %v5330_v36 = vpop.f32.mrb[85].mxu0 }
0x1d06   : > { %v4163_v37 = vmul.f32 0.044715, %v4147_v54  ;;  %v4160_v52 = vmul.f32 0.5, %v4147_v54 }
0x1d07   : > { %v4151_v38 = vpop.f32.mrb[86].mxu0 }
0x1d08   : > { %v4166_v39 = vmul.f32 %v4163_v37, %v4147_v54  ;;  %v4152_v40 = vadd.f32 %v4676_v35, %v4151_v38  ;;  %v5333_v48 = vpop.f32.mrb[87].mxu0 }
0x1d0a   : > { %v4169_v41 = vmul.f32 %v4166_v39, %v4147_v54  ;;  %v4164_v59 = vmul.f32 0.044715, %v4152_v40  ;;  %v4161_v5 = vmul.f32 0.5, %v4152_v40  ;;  %v4358_v39 = vld [vmem:[%s6789_s17] sm:$0xff] }
0x1d0b   : > { %v4156_v43 = vpop.f32.mrb[88].mxu0 }
0x1d0c   : > { %v4172_v44 = vadd.f32 %v4169_v41, %v4147_v54  ;;  %v4167_v46 = vmul.f32 %v4164_v59, %v4152_v40  ;;  %v4157_v51 = vadd.f32 %v4676_v35, %v4156_v43  ;;  %v5336_v53 = vpop.f32.mrb[89].mxu0  ;;  %v4360_v41 = vld [vmem:[%s6789_s17 + $0x10] sm:$0xff]  ;;  %v4361_v59 = vld [vmem:[%s6789_s17 + $0x18] sm:$0xff] }
0x1d0d   : > { %v5496_v43 = vpack.c.bf16 %v4361_v59, %v4360_v41 }
0x1d0e   : > { %v4175_v56 = vmul.f32 0.7978846, %v4172_v44  ;;  %v4170_v57 = vmul.f32 %v4167_v46, %v4152_v40  ;;  %v4165_v58 = vmul.f32 0.044715, %v4157_v51  ;;  %v4162_v16 = vmul.f32 0.5, %v4157_v51 }
0x1d10   : > { %5727 = vtanh.f32 %v4175_v56  ;;  %v4173_v0 = vadd.f32 %v4170_v57, %v4152_v40  ;;  %v4168_v60 = vmul.f32 %v4165_v58, %v4157_v51  ;;  %v4359_v40 = vld [vmem:[%s6789_s17 + $0x8] sm:$0xff] }
0x1d11   : > { %v5493_v48 = vpack.c.bf16 %v4359_v40, %v4358_v39 }
0x1d12   : > { %v4171_v61 = vmul.f32 %v4168_v60, %v4157_v51  ;;  %v4176_v62 = vmul.f32 0.7978846, %v4173_v0 }
0x1d13   : > { %5494 = vmatpush3.bf16.msra.mxu0 %v5493_v48 }
0x1d14   : > { %v4174_v63 = vadd.f32 %v4171_v61, %v4157_v51  ;;  %5729 = vtanh.f32 %v4176_v62  ;;  %5495 = vmatprep.subr.bf16.mxu0 %v5747_v3  ;;  %v4693_v61 = vld [vmem:[%s6787_s15] ss:$0 sm:$0xff] }
0x1d16   : > { %v4177_v55 = vmul.f32 0.7978846, %v4174_v63  ;;  %v4694_v63 = vld [vmem:[%s6788_s16] ss:$0 sm:$0xff] }
0x1d17   : > { %5497 = vmatpush3.bf16.msra.mxu0 %v5496_v43 }
0x1d18   : > { %5731 = vtanh.f32 %v4177_v55 }
0x1d1a   : > { %v5728_v1 = vpop.eup %5727 }
0x1d1b   : > { %v4181_v47 = vadd.f32 1.0, %v5728_v1 }
0x1d1d   : > { %v4184_v10 = vmul.f32 %v4181_v47, %v4160_v52 }
0x1d1e   : > { %v5730_v2 = vpop.eup %5729 }
0x1d1f   : > { %5354 = vmatmul.mubr.msk.f32.vlgmr.msra.gmra.mrb[90].mxu1 %vm2397_vm9, %v4184_v10  ;;  %v4182_v13 = vadd.f32 1.0, %v5730_v2 }
0x1d20   : > { %5356 = vmatprep.mubr.msk.f32.mxu1 %vm5748_vm0, %v5749_v6 }
0x1d21   : > { %v4185_v50 = vmul.f32 %v4182_v13, %v4161_v5 }
0x1d22   : > { %v5732_v4 = vpop.eup %5731 }
0x1d23   : > { %5357 = vmatmul.mubr.msk.f32.gmra.mrb[92].mxu1 %vm2397_vm9, %v4185_v50  ;;  %v4183_v21 = vadd.f32 1.0, %v5732_v4 }
0x1d24   : > { %5359 = vmatprep.mubr.msk.f32.mxu1 %vm5748_vm0, %v5749_v6 }
0x1d25   : > { %v4186_v7 = vmul.f32 %v4183_v21, %v4162_v16  ;;  %v4695_v16 = vld [vmem:[%s6790_s18] ss:$0 sm:$0xff] }
0x1d27   : > { %5360 = vmatmul.mubr.msk.f32.gmra.mrb[94].mxu1 %vm2397_vm9, %v4186_v7 }
0x1df2   : > { %v4271_v18 = vpop.f32.mrb[90].mxu1 }
0x1df3   : > { %v4285_v29 = vadd.f32 %v4271_v18, %v6635_v17  ;;  %v5355_v9 = vpop.f32.mrb[91].mxu1 }
0x1df5   : > { %v4296_v11 = vadd.f32 %v4692_v8, %v4285_v29 }
0x1df6   : > { %v4276_v12 = vpop.f32.mrb[92].mxu1 }
0x1df7   : > { %v4286_v26 = vadd.f32 %v4276_v12, %v6640_v33  ;;  %v5358_v14 = vpop.f32.mrb[93].mxu1  ;;  %v4301_v20 = vsel %vm707_vm2, %v4296_v11, 0.0 }
0x1df8   : > { %4302 = vadd.xlane.f32.xlu0 %v4301_v20 }
0x1df9   : > { %v4297_v23 = vadd.f32 %v4692_v8, %v4286_v26 }
0x1dfa   : > { %v4281_v24 = vpop.f32.mrb[94].mxu1 }
0x1dfb   : > { %v4287_v25 = vadd.f32 %v4281_v24, %v6645_v45  ;;  %v5361_v27 = vpop.f32.mrb[95].mxu1  ;;  %v4304_v28 = vsel %vm707_vm2, %v4297_v23, 0.0 }
0x1dfc   : > { %4305 = vadd.xlane.f32.xlu1 %v4304_v28 }
0x1dfd   : > { %v4298_v30 = vadd.f32 %v4692_v8, %v4287_v25 }
0x1dff   : > { %v4307_v17 = vsel %vm714_vm3, %v4298_v30, 0.0 }
0x1e00   : > { %4308 = vadd.xlane.f32.xlu0 %v4307_v17 }
0x1e85   : > { %v4303_v31 = vpop.xlane.xlu0 %4302 }
0x1e86   : > { %v4310_v32 = vmul.f32 0.03125, %v4303_v31 }
0x1e88   : > { %v4313_v19 = vsub.f32 %v4296_v11, %v4310_v32 }
0x1e89   : > { %v4306_v33 = vpop.xlane.xlu1 %4305 }
0x1e8a   : > { %v4311_v15 = vmul.f32 0.03125, %v4306_v33  ;;  %v4316_v22 = vmul.f32 %v4313_v19, %v4313_v19 }
0x1e8c   : > { %v4314_v42 = vsub.f32 %v4297_v23, %v4311_v15  ;;  %v4319_v34 = vsel %vm707_vm2, %v4316_v22, 0.0 }
0x1e8d   : > { %4320 = vadd.xlane.f32.xlu1 %v4319_v34  ;;  %v4309_v35 = vpop.xlane.xlu0 %4308 }
0x1e8e   : > { %v4312_v45 = vmul.f32 0.03125, %v4309_v35  ;;  %v4317_v49 = vmul.f32 %v4314_v42, %v4314_v42 }
0x1e90   : > { %v4315_v54 = vsub.f32 %v4298_v30, %v4312_v45  ;;  %v4322_v36 = vsel %vm707_vm2, %v4317_v49, 0.0 }
0x1e91   : > { %4323 = vadd.xlane.f32.xlu0 %v4322_v36 }
0x1e92   : > { %v4318_v37 = vmul.f32 %v4315_v54, %v4315_v54 }
0x1e94   : > { %v4325_v38 = vsel %vm714_vm3, %v4318_v37, 0.0 }
0x1e95   : > { %4326 = vadd.xlane.f32.xlu1 %v4325_v38 }
0x1f1a   : > { %v4321_v44 = vpop.xlane.xlu1 %4320 }
0x1f1b   : > { %v4328_v46 = vmul.f32 0.03125, %v4321_v44 }
0x1f1d   : > { %v4331_v51 = vadd.f32 1e-12, %v4328_v46 }
0x1f1e   : > { %v4324_v53 = vpop.xlane.xlu0 %4323 }
0x1f1f   : > { %5733 = vrsqrt.f32 %v4331_v51  ;;  %v4329_v56 = vmul.f32 0.03125, %v4324_v53 }
0x1f21   : > { %v4332_v57 = vadd.f32 1e-12, %v4329_v56 }
0x1f22   : > { %v4327_v58 = vpop.xlane.xlu1 %4326 }
0x1f23   : > { %5735 = vrsqrt.f32 %v4332_v57  ;;  %v4330_v3 = vmul.f32 0.03125, %v4327_v58 }
0x1f25   : > { %v4333_v0 = vadd.f32 1e-12, %v4330_v3 }
0x1f27   : > { %5737 = vrsqrt.f32 %v4333_v0 }
0x1f29   : > { %v5734_v60 = vpop.eup %5733 }
0x1f2a   : > { %v4337_v62 = vmul.f32 %v5734_v60, %v4313_v19 }
0x1f2c   : > { %v4346_v55 = vmul.f32 %v4693_v61, %v4337_v62 }
0x1f2d   : > { %v5736_v1 = vpop.eup %5735 }
0x1f2e   : > { %v4355_v52 = vadd.f32 %v4694_v63, %v4346_v55  ;;  %v4338_v47 = vmul.f32 %v5736_v1, %v4314_v42 }
0x1f30   : > { %5371 = vmatmul.mubr.msk.f32.vlgmr.msra.gmra.mrb[90].mxu0 %vm707_vm2, %v4355_v52  ;;  %v4347_v10 = vmul.f32 %v4693_v61, %v4338_v47 }
0x1f31   : > { %v5738_v2 = vpop.eup %5737  ;;  %5373 = vmatprep.mubr.msk.f32.mxu0 %vm5748_vm0, %v5749_v6 }
0x1f32   : > { %v4356_v5 = vadd.f32 %v4694_v63, %v4347_v10  ;;  %v4339_v13 = vmul.f32 %v5738_v2, %v4315_v54 }
0x1f34   : > { %5374 = vmatmul.mubr.msk.f32.gmra.mrb[92].mxu0 %vm707_vm2, %v4356_v5  ;;  %v4348_v50 = vmul.f32 %v4693_v61, %v4339_v13 }
0x1f35   : > { %5376 = vmatprep.mubr.msk.f32.mxu0 %vm5748_vm0, %v5749_v6 }
0x1f36   : > { %v4357_v4 = vadd.f32 %v4694_v63, %v4348_v50 }
0x1f38   : > { %5377 = vmatmul.mubr.msk.f32.gmra.mrb[94].mxu0 %vm707_vm2, %v4357_v4 }
0x2003   : > { %v4444_v21 = vpop.f32.mrb[90].mxu0 }
0x2004   : > { %v4445_v7 = vadd.f32 %v4695_v16, %v4444_v21  ;;  %v5372_v18 = vpop.f32.mrb[91].mxu0 }
0x2006   : > { %4458 = vst.msk [vmem:[%s602_s20] sm:$0xff] %vm615_vm1, %v4445_v7 }
0x2007   : > { %v4449_v8 = vpop.f32.mrb[92].mxu0 }
0x2008   : > { %v4450_v29 = vadd.f32 %v4695_v16, %v4449_v8  ;;  %v5375_v6 = vpop.f32.mrb[93].mxu0 }
0x200a   : > { %4459 = vst.msk [vmem:[%s602_s20 + $0x8] sm:$0xff] %vm615_vm1, %v4450_v29 }
0x200b   : > { %v4454_v9 = vpop.f32.mrb[94].mxu0 }
0x200c   : > { %v4455_v11 = vadd.f32 %v4695_v16, %v4454_v9  ;;  %v5378_v12 = vpop.f32.mrb[95].mxu0 }
0x200e   : > { %4461 = vst.msk [vmem:[%s602_s20 + $0x10] sm:$0x1] %vm4460_vm10, %v4455_v11 }
0x200f PF: > { %s29_s0 = sadd.s32 1, %s5745_s0  }
0x2010   : > { %p26_p4 = scmp.ge.s32.totalorder %s29_s0, 4  }
0x2012   :  { %28 = sbr.rel (!%p26_p4) target bundleno = 5 (0x5), region = 138 }

</bundles_post_ra>
